<compile_context>
chip_gen: v7x
topology: tpu7x:2x2x1
jax: 0.10.0
libtpu: 0.0.40
codegen_flags: <defaults>
</compile_context>

<pallas_src>
import jax
import jax.numpy as jnp
from jax.experimental import pallas as pl
from jax.experimental.pallas import tpu as pltpu

HEADS = 8        # nn.Module defaults (JointCrossAttentionBlock does not override)
DIM_HEAD = 64
LN_EPS = 1e-5

PARAM_ORDER = (
    "lnx_g", "lnx_b", "lnc_g", "lnc_b",
    "wxp", "wcp",                     # fused [Wqk*scale | Wv] and [Wcqk | Wcv]
    "wout", "bout", "wcout", "bcout",
    "fw1", "fb1", "fw2", "fb2",
    "cfw1", "cfb1", "cfw2", "cfb2",
)


def _gelu_exact(t):
    # torch.nn.GELU() default (erf-based, approximate='none')
    return 0.5 * t * (1.0 + jax.lax.erf(t * (1.0 / jnp.sqrt(2.0))))


def _layernorm(t, g, b):
    mu = jnp.mean(t, axis=-1, keepdims=True)
    var = jnp.mean(jnp.square(t - mu), axis=-1, keepdims=True)
    return (t - mu) * jax.lax.rsqrt(var + LN_EPS) * g + b


# --------------------------------- Pallas kernel ---------------------------------

def _block_kernel(x_ref, c_ref,
                  lnx_g, lnx_b, lnc_g, lnc_b,
                  wxp, wcp,
                  wout, bout, wcout, bcout,
                  fw1, fb1, fw2, fb2,
                  cfw1, cfb1, cfw2, cfb2,
                  xo_ref, co_ref,
                  x_carry, c_carry, xhd_sc, chd_sc):
    """One (batch-tile, layer) grid step of JointCrossAttentionBlock."""
    layer = pl.program_id(1)
    bt, I, dim = x_ref.shape
    _, J, cdim = c_ref.shape
    HD = wout.shape[1]            # H * D (inner dim)
    D = DIM_HEAD
    H = HD // D
    bf16 = jnp.bfloat16
    f32 = jnp.float32

    # Layer 0 of each batch tile: load residual streams into the resident VMEM carry.
    @pl.when(layer == 0)
    def _():
        x_carry[...] = x_ref[...].astype(f32)
        c_carry[...] = c_ref[...].astype(f32)

    x2d = x_carry[...].reshape(bt * I, dim)      # (Nx, dim)  f32 residual stream
    c2d = c_carry[...].reshape(bt * J, cdim)     # (Nc, cdim) f32 residual stream

    # prenorm LayerNorms in f32, then bf16 operands for the MXU.
    xn = _layernorm(x2d, lnx_g[0], lnx_b[0]).astype(bf16)
    cn = _layernorm(c2d, lnc_g[0], lnc_b[0]).astype(bf16)

    # Fused projections: one full-lane-width matmul per stream; layout [qk | v] on lanes.
    xp = jnp.dot(xn, wxp[0], preferred_element_type=f32).astype(bf16)   # (Nx, 2*H*D)
    cp = jnp.dot(cn, wcp[0], preferred_element_type=f32).astype(bf16)   # (Nc, 2*H*D)

    for h in range(H):  # static unroll; per-head operands are aligned 64-lane slices
        o = h * D
        qk3 = xp[:, o:o + D].reshape(bt, I, D)           # bf16, scale pre-folded
        v3 = xp[:, HD + o:HD + o + D].reshape(bt, I, D)
        cqk3 = cp[:, o:o + D].reshape(bt, J, D)
        cv3 = cp[:, HD + o:HD + o + D].reshape(bt, J, D)

        sim = jnp.einsum('bid,bjd->bij', qk3, cqk3,
                         preferred_element_type=f32)      # (bt, I, J)

        # shared-exp dual softmax (softmax over j and over i from one exp pass)
        m = jnp.max(jnp.max(sim, axis=2, keepdims=True), axis=1, keepdims=True)
        e = jnp.exp(sim - m)
        attn = e * pl.reciprocal(jnp.sum(e, axis=2, keepdims=True), approx=True)
        cattn = e * pl.reciprocal(jnp.sum(e, axis=1, keepdims=True), approx=True)

        out_h = jnp.einsum('bij,bjd->bid', attn.astype(bf16), cv3,
                           preferred_element_type=f32)    # (bt, I, D)
        # contract i directly: (bt,I,J) x (bt,I,D) -> (bt,J,D); no f32 XLU transpose
        cout_h = jax.lax.dot_general(cattn.astype(bf16), v3,
                                     dimension_numbers=(((1,), (1,)), ((0,), (0,))),
                                     preferred_element_type=f32)

        # scatter into the bf16 head-scratch; read back once for the fused out-proj
        xhd_sc[:, o:o + D] = out_h.reshape(bt * I, D).astype(bf16)
        chd_sc[:, o:o + D] = cout_h.reshape(bt * J, D).astype(bf16)

    # Single K = H*D output projection per stream (original (H*D, dim) weight layout).
    x2 = x2d + jnp.dot(xhd_sc[...], wout[0], preferred_element_type=f32) + bout[0]
    c2 = c2d + jnp.dot(chd_sc[...], wcout[0], preferred_element_type=f32) + bcout[0]

    # residual FeedForwards (dropout p=0 -> identity)
    xh = _gelu_exact(jnp.dot(x2.astype(bf16), fw1[0],
                             preferred_element_type=f32) + fb1[0])
    x3 = jnp.dot(xh.astype(bf16), fw2[0],
                 preferred_element_type=f32) + fb2[0] + x2

    ch = _gelu_exact(jnp.dot(c2.astype(bf16), cfw1[0],
                             preferred_element_type=f32) + cfb1[0])
    c3 = jnp.dot(ch.astype(bf16), cfw2[0],
                 preferred_element_type=f32) + cfb2[0] + c2

    x_carry[...] = x3.reshape(bt, I, dim)
    c_carry[...] = c3.reshape(bt, J, cdim)

    @pl.when(layer == pl.num_programs(1) - 1)
    def _():
        xo_ref[...] = x_carry[...].astype(xo_ref.dtype)
        co_ref[...] = c_carry[...].astype(co_ref.dtype)


# ------------------------------ wrapper / param prep ------------------------------

def prepare_block_params(layer_params):
    """Stack per-layer params on a depth axis, fuse the qk/v projection weights into one
    wide matrix per stream, fold the 1/sqrt(dim_head) scale into Wqk, and cast matmul
    weights to bf16."""
    scale = DIM_HEAD ** (-0.5)
    prepared = []
    for p in layer_params:
        prepared.append({
            "lnx_g": p["lnx_g"].astype(jnp.float32), "lnx_b": p["lnx_b"].astype(jnp.float32),
            "lnc_g": p["lnc_g"].astype(jnp.float32), "lnc_b": p["lnc_b"].astype(jnp.float32),
            # fused [qk | v] projection, scale folded into the qk half (x side only)
            "wxp": jnp.concatenate([p["wqk"] * scale, p["wv"]], axis=1).astype(jnp.bfloat16),
            "wcp": jnp.concatenate([p["wcqk"], p["wcv"]], axis=1).astype(jnp.bfloat16),
            # output projections kept in the original (H*D, out) layout for the K=H*D matmul
            "wout": p["wout"].astype(jnp.bfloat16),
            "bout": p["bout"].astype(jnp.float32),
            "wcout": p["wcout"].astype(jnp.bfloat16),
            "bcout": p["bcout"].astype(jnp.float32),
            "fw1": p["fw1"].astype(jnp.bfloat16), "fb1": p["fb1"].astype(jnp.float32),
            "fw2": p["fw2"].astype(jnp.bfloat16), "fb2": p["fb2"].astype(jnp.float32),
            "cfw1": p["cfw1"].astype(jnp.bfloat16), "cfb1": p["cfb1"].astype(jnp.float32),
            "cfw2": p["cfw2"].astype(jnp.bfloat16), "cfb2": p["cfb2"].astype(jnp.float32),
        })
    return {k: jnp.stack([q[k] for q in prepared], axis=0) for k in PARAM_ORDER}


def _vmem_limit_bytes():
    # Generation-aware scoped-VMEM budget (v5e/v6e: 128 MiB physical, v7x: 64 MiB).
    try:
        cap = int(pltpu.get_tpu_info().vmem_capacity_bytes)
    except Exception:
        return 32 * 1024 * 1024
    return int(min(0.75 * cap, 100 * 1024 * 1024))


def _pick_b_tile(B, I, J, dim, cdim, mlp_dim, vmem_budget):
    """Largest divisor of B whose activation working set fits (half of) the scoped VMEM
    budget, while keeping >= 2 batch tiles so the parallel axis can split across cores."""
    inner = HEADS * DIM_HEAD
    # per-batch-element footprint: f32 carries + pipelined in/out blocks + bf16 head
    # scratch + headroom for a few f32 intermediates of the widest activation.
    per_b = (4 * 4 * (I * dim + J * cdim)
             + 2 * (I + J) * inner
             + 3 * 4 * (I + J) * max(2 * inner, mlp_dim, dim, cdim))
    cap_bt = max(1, int((0.5 * vmem_budget) // max(per_b, 1)))
    max_bt = max(1, B // 2) if B >= 2 else B          # keep >= 2 tiles (v7x: 2 TCs)
    limit = max(1, min(cap_bt, max_bt))
    bt = 1
    for cand in range(1, B + 1):
        if B % cand == 0 and cand <= limit:
            bt = cand
    return bt


def _cost_estimate(B, I, J, dim, cdim, mlp_dim, depth, b_tile):
    inner = HEADS * DIM_HEAD
    proj = 2 * B * I * dim * 2 * inner + 2 * B * J * cdim * 2 * inner
    attn = HEADS * 6 * B * I * J * DIM_HEAD
    outp = 2 * B * I * inner * dim + 2 * B * J * inner * cdim
    ffn = 4 * B * I * dim * mlp_dim + 4 * B * J * cdim * mlp_dim
    flops = depth * (proj + attn + outp + ffn)
    transcendentals = depth * B * (HEADS * I * J + (I + J) * mlp_dim)
    layer_w_bytes = 2 * (dim * 2 * inner + cdim * 2 * inner + inner * dim + inner * cdim
                         + 2 * dim * mlp_dim + 2 * cdim * mlp_dim)
    bytes_accessed = (depth * (B // b_tile) * layer_w_bytes
                      + 2 * 4 * (B * I * dim + B * J * cdim))
    return pl.CostEstimate(flops=int(flops), transcendentals=int(transcendentals),
                           bytes_accessed=int(bytes_accessed))


def joint_cross_attention_block(x, ctx, stacked_params, b_tile=None):
    B, I, dim = x.shape
    _, J, cdim = ctx.shape
    depth = stacked_params["wxp"].shape[0]
    mlp_dim = stacked_params["fw1"].shape[-1]
    inner = HEADS * DIM_HEAD
    vmem_budget = _vmem_limit_bytes()
    if b_tile is None:
        b_tile = _pick_b_tile(B, I, J, dim, cdim, mlp_dim, vmem_budget)
    assert B % b_tile == 0

    weights = [stacked_params[k] for k in PARAM_ORDER]

    def w_spec(w):
        nd = w.ndim
        # one layer's slab per step; the layer axis varies with the inner grid dim, so the
        # default double-buffering prefetches layer l+1 weights while layer l computes.
        return pl.BlockSpec((1,) + w.shape[1:],
                            lambda b, l, _nd=nd: (l,) + (0,) * (_nd - 1))

    in_specs = [
        pl.BlockSpec((b_tile, I, dim), lambda b, l: (b, 0, 0)),
        pl.BlockSpec((b_tile, J, cdim), lambda b, l: (b, 0, 0)),
    ] + [w_spec(w) for w in weights]

    out_specs = (
        pl.BlockSpec((b_tile, I, dim), lambda b, l: (b, 0, 0)),
        pl.BlockSpec((b_tile, J, cdim), lambda b, l: (b, 0, 0)),
    )
    out_shape = (
        jax.ShapeDtypeStruct((B, I, dim), x.dtype),
        jax.ShapeDtypeStruct((B, J, cdim), ctx.dtype),
    )

    return pl.pallas_call(
        _block_kernel,
        grid=(B // b_tile, depth),
        in_specs=in_specs,
        out_specs=out_specs,
        out_shape=out_shape,
        scratch_shapes=[
            pltpu.VMEM((b_tile, I, dim), jnp.float32),    # x residual carry across layers
            pltpu.VMEM((b_tile, J, cdim), jnp.float32),   # ctx residual carry across layers
            pltpu.VMEM((b_tile * I, inner), jnp.bfloat16),  # per-head attn outputs (x side)
            pltpu.VMEM((b_tile * J, inner), jnp.bfloat16),  # per-head attn outputs (ctx side)
        ],
        compiler_params=pltpu.CompilerParams(
            dimension_semantics=("parallel", "arbitrary"),
            vmem_limit_bytes=vmem_budget,
        ),
        cost_estimate=_cost_estimate(B, I, J, dim, cdim, mlp_dim, depth, b_tile),
    )(x, ctx, *weights)


# ------------------------- parameter init (deterministic) -------------------------

def init_layer_params(key, dim, cdim, mlp_dim):
    inner = HEADS * DIM_HEAD
    ks = jax.random.split(key, 20)

    def w(k, shape, s=0.05):
        return jax.random.normal(k, shape, jnp.float32) * s

    return {
        "lnx_g": 1.0 + w(ks[0], (1, dim), 0.1), "lnx_b": w(ks[1], (1, dim), 0.1),
        "lnc_g": 1.0 + w(ks[2], (1, cdim), 0.1), "lnc_b": w(ks[3], (1, cdim), 0.1),
        "wqk": w(ks[4], (dim, inner)), "wv": w(ks[5], (dim, inner)),
        "wcqk": w(ks[6], (cdim, inner)), "wcv": w(ks[7], (cdim, inner)),
        "wout": w(ks[8], (inner, dim)), "bout": w(ks[9], (1, dim)),
        "wcout": w(ks[10], (inner, cdim)), "bcout": w(ks[11], (1, cdim)),
        "fw1": w(ks[12], (dim, mlp_dim)), "fb1": w(ks[13], (1, mlp_dim)),
        "fw2": w(ks[14], (mlp_dim, dim)), "fb2": w(ks[15], (1, dim)),
        "cfw1": w(ks[16], (cdim, mlp_dim)), "cfb1": w(ks[17], (1, mlp_dim)),
        "cfw2": w(ks[18], (mlp_dim, cdim)), "cfb2": w(ks[19], (1, cdim)),
    }


# ------------------------------ pure-JAX reference ------------------------------

def _ref_layer(x, ctx, p):
    scale = DIM_HEAD ** (-0.5)
    xn = _layernorm(x, p["lnx_g"][0], p["lnx_b"][0])
    cn = _layernorm(ctx, p["lnc_g"][0], p["lnc_b"][0])
    qk, v = xn @ p["wqk"], xn @ p["wv"]
    cqk, cv = cn @ p["wcqk"], cn @ p["wcv"]

    def split(t):  # (B, N, H*D) -> (B, H, N, D)
        B, N, _ = t.shape
        return t.reshape(B, N, HEADS, DIM_HEAD).transpose(0, 2, 1, 3)

    qk, cqk, v, cv = map(split, (qk, cqk, v, cv))
    sim = jnp.einsum("bhid,bhjd->bhij", qk, cqk) * scale
    attn = jax.nn.softmax(sim, axis=-1)
    cattn = jax.nn.softmax(sim, axis=-2)
    out = jnp.einsum("bhij,bhjd->bhid", attn, cv)
    cout = jnp.einsum("bhij,bhid->bhjd", cattn, v)

    def merge(t):
        B, H, N, D = t.shape
        return t.transpose(0, 2, 1, 3).reshape(B, N, H * D)

    x2 = x + (merge(out) @ p["wout"] + p["bout"][0])
    c2 = ctx + (merge(cout) @ p["wcout"] + p["bcout"][0])
    x3 = _gelu_exact(x2 @ p["fw1"] + p["fb1"][0]) @ p["fw2"] + p["fb2"][0] + x2
    c3 = _gelu_exact(c2 @ p["cfw1"] + p["cfb1"][0]) @ p["cfw2"] + p["cfb2"][0] + c2
    return x3, c3


def _ref_block(x, ctx, layer_params):
    for p in layer_params:
        x, ctx = _ref_layer(x, ctx, p)
    return x, ctx


# ------------------------------------ main ------------------------------------

if __name__ == "__main__":
    B, I, J = 2, 8, 16
    DIM, CDIM, MLP_DIM, DEPTH = 32, 48, 64, 2

    key = jax.random.PRNGKey(0)
    kx, kc, kp = jax.random.split(key, 3)
    x = jax.random.normal(kx, (B, I, DIM), jnp.float32)
    ctx = jax.random.normal(kc, (B, J, CDIM), jnp.float32)

    layer_keys = jax.random.split(kp, DEPTH)
    layer_params = [init_layer_params(k, DIM, CDIM, MLP_DIM) for k in layer_keys]

    stacked = prepare_block_params(layer_params)   # one-time host-side weight transform
    x_out, ctx_out = jax.block_until_ready(
        joint_cross_attention_block(x, ctx, stacked))

    x_ref, ctx_ref = jax.block_until_ready(_ref_block(x, ctx, layer_params))

    assert x_out.shape == (B, I, DIM) and ctx_out.shape == (B, J, CDIM)
    assert jnp.max(jnp.abs(x_out - x_ref)) < 5e-2
    assert jnp.max(jnp.abs(ctx_out - ctx_ref)) < 5e-2

    print("KERNEL_OK")
</pallas_src>

<mosaic_0001>
module attributes {stable_mosaic.version = 11 : i64} {
  func.func @_block_kernel(%arg0: i32, %arg1: i32, %arg2: memref<1x8x32xf32, #tpu.memory_space<vmem>>, %arg3: memref<1x16x48xf32, #tpu.memory_space<vmem>>, %arg4: memref<1x1x32xf32, #tpu.memory_space<vmem>>, %arg5: memref<1x1x32xf32, #tpu.memory_space<vmem>>, %arg6: memref<1x1x48xf32, #tpu.memory_space<vmem>>, %arg7: memref<1x1x48xf32, #tpu.memory_space<vmem>>, %arg8: memref<1x32x1024xbf16, #tpu.memory_space<vmem>>, %arg9: memref<1x48x1024xbf16, #tpu.memory_space<vmem>>, %arg10: memref<1x512x32xbf16, #tpu.memory_space<vmem>>, %arg11: memref<1x1x32xf32, #tpu.memory_space<vmem>>, %arg12: memref<1x512x48xbf16, #tpu.memory_space<vmem>>, %arg13: memref<1x1x48xf32, #tpu.memory_space<vmem>>, %arg14: memref<1x32x64xbf16, #tpu.memory_space<vmem>>, %arg15: memref<1x1x64xf32, #tpu.memory_space<vmem>>, %arg16: memref<1x64x32xbf16, #tpu.memory_space<vmem>>, %arg17: memref<1x1x32xf32, #tpu.memory_space<vmem>>, %arg18: memref<1x48x64xbf16, #tpu.memory_space<vmem>>, %arg19: memref<1x1x64xf32, #tpu.memory_space<vmem>>, %arg20: memref<1x64x48xbf16, #tpu.memory_space<vmem>>, %arg21: memref<1x1x48xf32, #tpu.memory_space<vmem>>, %arg22: memref<1x8x32xf32, #tpu.memory_space<vmem>>, %arg23: memref<1x16x48xf32, #tpu.memory_space<vmem>>, %arg24: memref<1x8x32xf32, #tpu.memory_space<vmem>>, %arg25: memref<1x16x48xf32, #tpu.memory_space<vmem>>, %arg26: memref<8x512xbf16, #tpu.memory_space<vmem>>, %arg27: memref<16x512xbf16, #tpu.memory_space<vmem>>) attributes {dimension_semantics = [#tpu.dimension_semantics<parallel>, #tpu.dimension_semantics<arbitrary>], iteration_bounds = array<i64: 2, 2>, scalar_prefetch = 0 : i64, scratch_operands = 4 : i64, tpu.core_type = #tpu.core_type<tc>, window_params = [{transform_indices = @transform_0, window_bounds = array<i64: 1, 8, 32>}, {transform_indices = @transform_1, window_bounds = array<i64: 1, 16, 48>}, {transform_indices = @transform_2, window_bounds = array<i64: 1, 1, 32>}, {transform_indices = @transform_3, window_bounds = array<i64: 1, 1, 32>}, {transform_indices = @transform_4, window_bounds = array<i64: 1, 1, 48>}, {transform_indices = @transform_5, window_bounds = array<i64: 1, 1, 48>}, {transform_indices = @transform_6, window_bounds = array<i64: 1, 32, 1024>}, {transform_indices = @transform_7, window_bounds = array<i64: 1, 48, 1024>}, {transform_indices = @transform_8, window_bounds = array<i64: 1, 512, 32>}, {transform_indices = @transform_9, window_bounds = array<i64: 1, 1, 32>}, {transform_indices = @transform_10, window_bounds = array<i64: 1, 512, 48>}, {transform_indices = @transform_11, window_bounds = array<i64: 1, 1, 48>}, {transform_indices = @transform_12, window_bounds = array<i64: 1, 32, 64>}, {transform_indices = @transform_13, window_bounds = array<i64: 1, 1, 64>}, {transform_indices = @transform_14, window_bounds = array<i64: 1, 64, 32>}, {transform_indices = @transform_15, window_bounds = array<i64: 1, 1, 32>}, {transform_indices = @transform_16, window_bounds = array<i64: 1, 48, 64>}, {transform_indices = @transform_17, window_bounds = array<i64: 1, 1, 64>}, {transform_indices = @transform_18, window_bounds = array<i64: 1, 64, 48>}, {transform_indices = @transform_19, window_bounds = array<i64: 1, 1, 48>}, {transform_indices = @transform_20, window_bounds = array<i64: 1, 8, 32>}, {transform_indices = @transform_21, window_bounds = array<i64: 1, 16, 48>}]} {
    %c0_i32 = arith.constant 0 : i32
    %0 = arith.cmpi eq, %arg1, %c0_i32 : i32
    %1 = arith.extui %0 : i1 to i32
    %c0_i32_0 = arith.constant 0 : i32
    %2 = arith.cmpi ne, %1, %c0_i32_0 : i32
    scf.if %2 {
      %c0_177 = arith.constant 0 : index
      %c0_178 = arith.constant 0 : index
      %c0_179 = arith.constant 0 : index
      %436 = vector.load %arg2[%c0_177, %c0_178, %c0_179] : memref<1x8x32xf32, #tpu.memory_space<vmem>>, vector<1x8x32xf32>
      %c0_180 = arith.constant 0 : index
      %c0_181 = arith.constant 0 : index
      %c0_182 = arith.constant 0 : index
      %437 = vector.load %arg24[%c0_180, %c0_181, %c0_182] : memref<1x8x32xf32, #tpu.memory_space<vmem>>, vector<1x8x32xf32>
      tpu.vector_store %arg24[%c0_180, %c0_181, %c0_182], %436 {strides = array<i32>} : memref<1x8x32xf32, #tpu.memory_space<vmem>>, vector<1x8x32xf32>,
      %c0_183 = arith.constant 0 : index
      %c0_184 = arith.constant 0 : index
      %c0_185 = arith.constant 0 : index
      %438 = vector.load %arg3[%c0_183, %c0_184, %c0_185] : memref<1x16x48xf32, #tpu.memory_space<vmem>>, vector<1x16x48xf32>
      %c0_186 = arith.constant 0 : index
      %c0_187 = arith.constant 0 : index
      %c0_188 = arith.constant 0 : index
      %439 = vector.load %arg25[%c0_186, %c0_187, %c0_188] : memref<1x16x48xf32, #tpu.memory_space<vmem>>, vector<1x16x48xf32>
      tpu.vector_store %arg25[%c0_186, %c0_187, %c0_188], %438 {strides = array<i32>} : memref<1x16x48xf32, #tpu.memory_space<vmem>>, vector<1x16x48xf32>,
    } else {
    }
    %c0 = arith.constant 0 : index
    %c0_1 = arith.constant 0 : index
    %c0_2 = arith.constant 0 : index
    %3 = vector.load %arg24[%c0, %c0_1, %c0_2] : memref<1x8x32xf32, #tpu.memory_space<vmem>>, vector<1x8x32xf32>
    %4 = vector.shape_cast %3 : vector<1x8x32xf32> to vector<8x32xf32>
    %c0_3 = arith.constant 0 : index
    %c0_4 = arith.constant 0 : index
    %c0_5 = arith.constant 0 : index
    %5 = vector.load %arg25[%c0_3, %c0_4, %c0_5] : memref<1x16x48xf32, #tpu.memory_space<vmem>>, vector<1x16x48xf32>
    %6 = vector.shape_cast %5 : vector<1x16x48xf32> to vector<16x48xf32>
    %c0_6 = arith.constant 0 : index
    %c0_7 = arith.constant 0 : index
    %c0_8 = arith.constant 0 : index
    %7 = vector.load %arg4[%c0_6, %c0_7, %c0_8] : memref<1x1x32xf32, #tpu.memory_space<vmem>>, vector<1x1x32xf32>
    %8 = vector.shape_cast %7 : vector<1x1x32xf32> to vector<1x32xf32>
    %c0_9 = arith.constant 0 : index
    %c0_10 = arith.constant 0 : index
    %c0_11 = arith.constant 0 : index
    %9 = vector.load %arg5[%c0_9, %c0_10, %c0_11] : memref<1x1x32xf32, #tpu.memory_space<vmem>>, vector<1x1x32xf32>
    %10 = vector.shape_cast %9 : vector<1x1x32xf32> to vector<1x32xf32>
    %cst = arith.constant dense<0.000000e+00> : vector<8xf32>
    %11 = vector.multi_reduction <add>, %4, %cst [1] : vector<8x32xf32> to vector<8xf32>
    %12 = vector.shape_cast %11 : vector<8xf32> to vector<8x1xf32>
    %cst_12 = arith.constant 3.200000e+01 : f32
    %13 = vector.broadcast %cst_12 : f32 to vector<8x1xf32>
    %14 = arith.divf %12, %13 : vector<8x1xf32>
    %15 = vector.broadcast %14 : vector<8x1xf32> to vector<8x32xf32>
    %16 = arith.subf %4, %15 : vector<8x32xf32>
    %17 = arith.mulf %16, %16 : vector<8x32xf32>
    %cst_13 = arith.constant dense<0.000000e+00> : vector<8xf32>
    %18 = vector.multi_reduction <add>, %17, %cst_13 [1] : vector<8x32xf32> to vector<8xf32>
    %19 = vector.shape_cast %18 : vector<8xf32> to vector<8x1xf32>
    %cst_14 = arith.constant 3.200000e+01 : f32
    %20 = vector.broadcast %cst_14 : f32 to vector<8x1xf32>
    %21 = arith.divf %19, %20 : vector<8x1xf32>
    %22 = vector.broadcast %14 : vector<8x1xf32> to vector<8x32xf32>
    %23 = arith.subf %4, %22 : vector<8x32xf32>
    %cst_15 = arith.constant 9.99999974E-6 : f32
    %24 = vector.broadcast %cst_15 : f32 to vector<8x1xf32>
    %25 = arith.addf %21, %24 : vector<8x1xf32>
    %26 = math.rsqrt %25 : vector<8x1xf32>
    %27 = vector.broadcast %26 : vector<8x1xf32> to vector<8x32xf32>
    %28 = arith.mulf %23, %27 : vector<8x32xf32>
    %29 = vector.broadcast %8 : vector<1x32xf32> to vector<8x32xf32>
    %30 = arith.mulf %28, %29 : vector<8x32xf32>
    %31 = vector.broadcast %10 : vector<1x32xf32> to vector<8x32xf32>
    %32 = arith.addf %30, %31 : vector<8x32xf32>
    %33 = arith.truncf %32 : vector<8x32xf32> to vector<8x32xbf16>
    %c0_16 = arith.constant 0 : index
    %c0_17 = arith.constant 0 : index
    %c0_18 = arith.constant 0 : index
    %34 = vector.load %arg6[%c0_16, %c0_17, %c0_18] : memref<1x1x48xf32, #tpu.memory_space<vmem>>, vector<1x1x48xf32>
    %35 = vector.shape_cast %34 : vector<1x1x48xf32> to vector<1x48xf32>
    %c0_19 = arith.constant 0 : index
    %c0_20 = arith.constant 0 : index
    %c0_21 = arith.constant 0 : index
    %36 = vector.load %arg7[%c0_19, %c0_20, %c0_21] : memref<1x1x48xf32, #tpu.memory_space<vmem>>, vector<1x1x48xf32>
    %37 = vector.shape_cast %36 : vector<1x1x48xf32> to vector<1x48xf32>
    %cst_22 = arith.constant dense<0.000000e+00> : vector<16xf32>
    %38 = vector.multi_reduction <add>, %6, %cst_22 [1] : vector<16x48xf32> to vector<16xf32>
    %39 = vector.shape_cast %38 : vector<16xf32> to vector<16x1xf32>
    %cst_23 = arith.constant 4.800000e+01 : f32
    %40 = vector.broadcast %cst_23 : f32 to vector<16x1xf32>
    %41 = arith.divf %39, %40 : vector<16x1xf32>
    %42 = vector.broadcast %41 : vector<16x1xf32> to vector<16x48xf32>
    %43 = arith.subf %6, %42 : vector<16x48xf32>
    %44 = arith.mulf %43, %43 : vector<16x48xf32>
    %cst_24 = arith.constant dense<0.000000e+00> : vector<16xf32>
    %45 = vector.multi_reduction <add>, %44, %cst_24 [1] : vector<16x48xf32> to vector<16xf32>
    %46 = vector.shape_cast %45 : vector<16xf32> to vector<16x1xf32>
    %cst_25 = arith.constant 4.800000e+01 : f32
    %47 = vector.broadcast %cst_25 : f32 to vector<16x1xf32>
    %48 = arith.divf %46, %47 : vector<16x1xf32>
    %49 = vector.broadcast %41 : vector<16x1xf32> to vector<16x48xf32>
    %50 = arith.subf %6, %49 : vector<16x48xf32>
    %cst_26 = arith.constant 9.99999974E-6 : f32
    %51 = vector.broadcast %cst_26 : f32 to vector<16x1xf32>
    %52 = arith.addf %48, %51 : vector<16x1xf32>
    %53 = math.rsqrt %52 : vector<16x1xf32>
    %54 = vector.broadcast %53 : vector<16x1xf32> to vector<16x48xf32>
    %55 = arith.mulf %50, %54 : vector<16x48xf32>
    %56 = vector.broadcast %35 : vector<1x48xf32> to vector<16x48xf32>
    %57 = arith.mulf %55, %56 : vector<16x48xf32>
    %58 = vector.broadcast %37 : vector<1x48xf32> to vector<16x48xf32>
    %59 = arith.addf %57, %58 : vector<16x48xf32>
    %60 = arith.truncf %59 : vector<16x48xf32> to vector<16x48xbf16>
    %c0_27 = arith.constant 0 : index
    %c0_28 = arith.constant 0 : index
    %c0_29 = arith.constant 0 : index
    %61 = vector.load %arg8[%c0_27, %c0_28, %c0_29] : memref<1x32x1024xbf16, #tpu.memory_space<vmem>>, vector<1x32x1024xbf16>
    %62 = vector.shape_cast %61 : vector<1x32x1024xbf16> to vector<32x1024xbf16>
    %cst_30 = arith.constant dense<0.000000e+00> : vector<8x1024xf32>
    %63 = tpu.matmul %33, %62, %cst_30 {dimension_numbers = #tpu.dot_dimension_numbers<[1], [0], [0], [1], [0, 0, 1, 1], [], []>} : vector<8x32xbf16>, vector<32x1024xbf16>, vector<8x1024xf32> -> vector<8x1024xf32>
    %64 = arith.truncf %63 : vector<8x1024xf32> to vector<8x1024xbf16>
    %c0_31 = arith.constant 0 : index
    %c0_32 = arith.constant 0 : index
    %c0_33 = arith.constant 0 : index
    %65 = vector.load %arg9[%c0_31, %c0_32, %c0_33] : memref<1x48x1024xbf16, #tpu.memory_space<vmem>>, vector<1x48x1024xbf16>
    %66 = vector.shape_cast %65 : vector<1x48x1024xbf16> to vector<48x1024xbf16>
    %cst_34 = arith.constant dense<0.000000e+00> : vector<16x1024xf32>
    %67 = tpu.matmul %60, %66, %cst_34 {dimension_numbers = #tpu.dot_dimension_numbers<[1], [0], [0], [1], [0, 0, 1, 1], [], []>} : vector<16x48xbf16>, vector<48x1024xbf16>, vector<16x1024xf32> -> vector<16x1024xf32>
    %68 = arith.truncf %67 : vector<16x1024xf32> to vector<16x1024xbf16>
    %69 = vector.extract_strided_slice %64 {offsets = [0, 0], sizes = [8, 64], strides = [1, 1]} : vector<8x1024xbf16> to vector<8x64xbf16>
    %70 = vector.shape_cast %69 : vector<8x64xbf16> to vector<1x8x64xbf16>
    %71 = vector.extract_strided_slice %64 {offsets = [0, 512], sizes = [8, 64], strides = [1, 1]} : vector<8x1024xbf16> to vector<8x64xbf16>
    %72 = vector.shape_cast %71 : vector<8x64xbf16> to vector<1x8x64xbf16>
    %73 = vector.extract_strided_slice %68 {offsets = [0, 0], sizes = [16, 64], strides = [1, 1]} : vector<16x1024xbf16> to vector<16x64xbf16>
    %74 = vector.shape_cast %73 : vector<16x64xbf16> to vector<1x16x64xbf16>
    %75 = vector.extract_strided_slice %68 {offsets = [0, 512], sizes = [16, 64], strides = [1, 1]} : vector<16x1024xbf16> to vector<16x64xbf16>
    %76 = vector.shape_cast %75 : vector<16x64xbf16> to vector<1x16x64xbf16>
    "tpu.trace_start"() <{level = 10 : i32, message = "bid,bjd->bij"}> : () -> ()
    %cst_35 = arith.constant dense<0.000000e+00> : vector<1x8x16xf32>
    %77 = tpu.matmul %70, %74, %cst_35 {dimension_numbers = #tpu.dot_dimension_numbers<[2], [2], [1], [1], [0, 0, 0, 1, 1, 1], [0], [0]>} : vector<1x8x64xbf16>, vector<1x16x64xbf16>, vector<1x8x16xf32> -> vector<1x8x16xf32>
    "tpu.trace_stop"() : () -> ()
    %cst_36 = arith.constant dense<0xFF800000> : vector<1x8xf32>
    %78 = vector.multi_reduction <maximumf>, %77, %cst_36 [2] : vector<1x8x16xf32> to vector<1x8xf32>
    %79 = vector.shape_cast %78 : vector<1x8xf32> to vector<1x8x1xf32>
    %cst_37 = arith.constant dense<0xFF800000> : vector<1x1xf32>
    %80 = vector.multi_reduction <maximumf>, %79, %cst_37 [1] : vector<1x8x1xf32> to vector<1x1xf32>
    %81 = vector.shape_cast %80 : vector<1x1xf32> to vector<1x1x1xf32>
    %82 = vector.broadcast %81 : vector<1x1x1xf32> to vector<1x8x16xf32>
    %83 = arith.subf %77, %82 : vector<1x8x16xf32>
    %84 = math.exp %83 : vector<1x8x16xf32>
    %cst_38 = arith.constant dense<0.000000e+00> : vector<1x8xf32>
    %85 = vector.multi_reduction <add>, %84, %cst_38 [2] : vector<1x8x16xf32> to vector<1x8xf32>
    %86 = vector.shape_cast %85 : vector<1x8xf32> to vector<1x8x1xf32>
    %87 = tpu.reciprocal %86 {approx = true} : vector<1x8x1xf32> -> vector<1x8x1xf32>
    %88 = vector.broadcast %87 : vector<1x8x1xf32> to vector<1x8x16xf32>
    %89 = arith.mulf %84, %88 : vector<1x8x16xf32>
    %cst_39 = arith.constant dense<0.000000e+00> : vector<1x16xf32>
    %90 = vector.multi_reduction <add>, %84, %cst_39 [1] : vector<1x8x16xf32> to vector<1x16xf32>
    %91 = vector.shape_cast %90 : vector<1x16xf32> to vector<1x1x16xf32>
    %92 = tpu.reciprocal %91 {approx = true} : vector<1x1x16xf32> -> vector<1x1x16xf32>
    %93 = vector.broadcast %92 : vector<1x1x16xf32> to vector<1x8x16xf32>
    %94 = arith.mulf %84, %93 : vector<1x8x16xf32>
    %95 = arith.truncf %89 : vector<1x8x16xf32> to vector<1x8x16xbf16>
    "tpu.trace_start"() <{level = 10 : i32, message = "bij,bjd->bid"}> : () -> ()
    %cst_40 = arith.constant dense<0.000000e+00> : vector<1x8x64xf32>
    %96 = tpu.matmul %95, %76, %cst_40 {dimension_numbers = #tpu.dot_dimension_numbers<[2], [1], [1], [2], [0, 0, 0, 1, 1, 2], [0], [0]>} : vector<1x8x16xbf16>, vector<1x16x64xbf16>, vector<1x8x64xf32> -> vector<1x8x64xf32>
    "tpu.trace_stop"() : () -> ()
    %97 = arith.truncf %94 : vector<1x8x16xf32> to vector<1x8x16xbf16>
    %cst_41 = arith.constant dense<0.000000e+00> : vector<1x16x64xf32>
    %98 = tpu.matmul %97, %72, %cst_41 {dimension_numbers = #tpu.dot_dimension_numbers<[1], [1], [2], [2], [0, 0, 0, 2, 1, 2], [0], [0]>} : vector<1x8x16xbf16>, vector<1x8x64xbf16>, vector<1x16x64xf32> -> vector<1x16x64xf32>
    %99 = vector.shape_cast %96 : vector<1x8x64xf32> to vector<8x64xf32>
    %100 = arith.truncf %99 : vector<8x64xf32> to vector<8x64xbf16>
    %c0_42 = arith.constant 0 : index
    %c0_43 = arith.constant 0 : index
    %101 = vector.load %arg26[%c0_42, %c0_43] : memref<8x512xbf16, #tpu.memory_space<vmem>>, vector<8x64xbf16>
    tpu.vector_store %arg26[%c0_42, %c0_43], %100 {strides = array<i32>} : memref<8x512xbf16, #tpu.memory_space<vmem>>, vector<8x64xbf16>,
    %102 = vector.shape_cast %98 : vector<1x16x64xf32> to vector<16x64xf32>
    %103 = arith.truncf %102 : vector<16x64xf32> to vector<16x64xbf16>
    %c0_44 = arith.constant 0 : index
    %c0_45 = arith.constant 0 : index
    %104 = vector.load %arg27[%c0_44, %c0_45] : memref<16x512xbf16, #tpu.memory_space<vmem>>, vector<16x64xbf16>
    tpu.vector_store %arg27[%c0_44, %c0_45], %103 {strides = array<i32>} : memref<16x512xbf16, #tpu.memory_space<vmem>>, vector<16x64xbf16>,
    %105 = vector.extract_strided_slice %64 {offsets = [0, 64], sizes = [8, 64], strides = [1, 1]} : vector<8x1024xbf16> to vector<8x64xbf16>
    %106 = vector.shape_cast %105 : vector<8x64xbf16> to vector<1x8x64xbf16>
    %107 = vector.extract_strided_slice %64 {offsets = [0, 576], sizes = [8, 64], strides = [1, 1]} : vector<8x1024xbf16> to vector<8x64xbf16>
    %108 = vector.shape_cast %107 : vector<8x64xbf16> to vector<1x8x64xbf16>
    %109 = vector.extract_strided_slice %68 {offsets = [0, 64], sizes = [16, 64], strides = [1, 1]} : vector<16x1024xbf16> to vector<16x64xbf16>
    %110 = vector.shape_cast %109 : vector<16x64xbf16> to vector<1x16x64xbf16>
    %111 = vector.extract_strided_slice %68 {offsets = [0, 576], sizes = [16, 64], strides = [1, 1]} : vector<16x1024xbf16> to vector<16x64xbf16>
    %112 = vector.shape_cast %111 : vector<16x64xbf16> to vector<1x16x64xbf16>
    "tpu.trace_start"() <{level = 10 : i32, message = "bid,bjd->bij"}> : () -> ()
    %cst_46 = arith.constant dense<0.000000e+00> : vector<1x8x16xf32>
    %113 = tpu.matmul %106, %110, %cst_46 {dimension_numbers = #tpu.dot_dimension_numbers<[2], [2], [1], [1], [0, 0, 0, 1, 1, 1], [0], [0]>} : vector<1x8x64xbf16>, vector<1x16x64xbf16>, vector<1x8x16xf32> -> vector<1x8x16xf32>
    "tpu.trace_stop"() : () -> ()
    %cst_47 = arith.constant dense<0xFF800000> : vector<1x8xf32>
    %114 = vector.multi_reduction <maximumf>, %113, %cst_47 [2] : vector<1x8x16xf32> to vector<1x8xf32>
    %115 = vector.shape_cast %114 : vector<1x8xf32> to vector<1x8x1xf32>
    %cst_48 = arith.constant dense<0xFF800000> : vector<1x1xf32>
    %116 = vector.multi_reduction <maximumf>, %115, %cst_48 [1] : vector<1x8x1xf32> to vector<1x1xf32>
    %117 = vector.shape_cast %116 : vector<1x1xf32> to vector<1x1x1xf32>
    %118 = vector.broadcast %117 : vector<1x1x1xf32> to vector<1x8x16xf32>
    %119 = arith.subf %113, %118 : vector<1x8x16xf32>
    %120 = math.exp %119 : vector<1x8x16xf32>
    %cst_49 = arith.constant dense<0.000000e+00> : vector<1x8xf32>
    %121 = vector.multi_reduction <add>, %120, %cst_49 [2] : vector<1x8x16xf32> to vector<1x8xf32>
    %122 = vector.shape_cast %121 : vector<1x8xf32> to vector<1x8x1xf32>
    %123 = tpu.reciprocal %122 {approx = true} : vector<1x8x1xf32> -> vector<1x8x1xf32>
    %124 = vector.broadcast %123 : vector<1x8x1xf32> to vector<1x8x16xf32>
    %125 = arith.mulf %120, %124 : vector<1x8x16xf32>
    %cst_50 = arith.constant dense<0.000000e+00> : vector<1x16xf32>
    %126 = vector.multi_reduction <add>, %120, %cst_50 [1] : vector<1x8x16xf32> to vector<1x16xf32>
    %127 = vector.shape_cast %126 : vector<1x16xf32> to vector<1x1x16xf32>
    %128 = tpu.reciprocal %127 {approx = true} : vector<1x1x16xf32> -> vector<1x1x16xf32>
    %129 = vector.broadcast %128 : vector<1x1x16xf32> to vector<1x8x16xf32>
    %130 = arith.mulf %120, %129 : vector<1x8x16xf32>
    %131 = arith.truncf %125 : vector<1x8x16xf32> to vector<1x8x16xbf16>
    "tpu.trace_start"() <{level = 10 : i32, message = "bij,bjd->bid"}> : () -> ()
    %cst_51 = arith.constant dense<0.000000e+00> : vector<1x8x64xf32>
    %132 = tpu.matmul %131, %112, %cst_51 {dimension_numbers = #tpu.dot_dimension_numbers<[2], [1], [1], [2], [0, 0, 0, 1, 1, 2], [0], [0]>} : vector<1x8x16xbf16>, vector<1x16x64xbf16>, vector<1x8x64xf32> -> vector<1x8x64xf32>
    "tpu.trace_stop"() : () -> ()
    %133 = arith.truncf %130 : vector<1x8x16xf32> to vector<1x8x16xbf16>
    %cst_52 = arith.constant dense<0.000000e+00> : vector<1x16x64xf32>
    %134 = tpu.matmul %133, %108, %cst_52 {dimension_numbers = #tpu.dot_dimension_numbers<[1], [1], [2], [2], [0, 0, 0, 2, 1, 2], [0], [0]>} : vector<1x8x16xbf16>, vector<1x8x64xbf16>, vector<1x16x64xf32> -> vector<1x16x64xf32>
    %135 = vector.shape_cast %132 : vector<1x8x64xf32> to vector<8x64xf32>
    %136 = arith.truncf %135 : vector<8x64xf32> to vector<8x64xbf16>
    %c0_53 = arith.constant 0 : index
    %c64 = arith.constant 64 : index
    %137 = vector.load %arg26[%c0_53, %c64] : memref<8x512xbf16, #tpu.memory_space<vmem>>, vector<8x64xbf16>
    tpu.vector_store %arg26[%c0_53, %c64], %136 {strides = array<i32>} : memref<8x512xbf16, #tpu.memory_space<vmem>>, vector<8x64xbf16>,
    %138 = vector.shape_cast %134 : vector<1x16x64xf32> to vector<16x64xf32>
    %139 = arith.truncf %138 : vector<16x64xf32> to vector<16x64xbf16>
    %c0_54 = arith.constant 0 : index
    %c64_55 = arith.constant 64 : index
    %140 = vector.load %arg27[%c0_54, %c64_55] : memref<16x512xbf16, #tpu.memory_space<vmem>>, vector<16x64xbf16>
    tpu.vector_store %arg27[%c0_54, %c64_55], %139 {strides = array<i32>} : memref<16x512xbf16, #tpu.memory_space<vmem>>, vector<16x64xbf16>,
    %141 = vector.extract_strided_slice %64 {offsets = [0, 128], sizes = [8, 64], strides = [1, 1]} : vector<8x1024xbf16> to vector<8x64xbf16>
    %142 = vector.shape_cast %141 : vector<8x64xbf16> to vector<1x8x64xbf16>
    %143 = vector.extract_strided_slice %64 {offsets = [0, 640], sizes = [8, 64], strides = [1, 1]} : vector<8x1024xbf16> to vector<8x64xbf16>
    %144 = vector.shape_cast %143 : vector<8x64xbf16> to vector<1x8x64xbf16>
    %145 = vector.extract_strided_slice %68 {offsets = [0, 128], sizes = [16, 64], strides = [1, 1]} : vector<16x1024xbf16> to vector<16x64xbf16>
    %146 = vector.shape_cast %145 : vector<16x64xbf16> to vector<1x16x64xbf16>
    %147 = vector.extract_strided_slice %68 {offsets = [0, 640], sizes = [16, 64], strides = [1, 1]} : vector<16x1024xbf16> to vector<16x64xbf16>
    %148 = vector.shape_cast %147 : vector<16x64xbf16> to vector<1x16x64xbf16>
    "tpu.trace_start"() <{level = 10 : i32, message = "bid,bjd->bij"}> : () -> ()
    %cst_56 = arith.constant dense<0.000000e+00> : vector<1x8x16xf32>
    %149 = tpu.matmul %142, %146, %cst_56 {dimension_numbers = #tpu.dot_dimension_numbers<[2], [2], [1], [1], [0, 0, 0, 1, 1, 1], [0], [0]>} : vector<1x8x64xbf16>, vector<1x16x64xbf16>, vector<1x8x16xf32> -> vector<1x8x16xf32>
    "tpu.trace_stop"() : () -> ()
    %cst_57 = arith.constant dense<0xFF800000> : vector<1x8xf32>
    %150 = vector.multi_reduction <maximumf>, %149, %cst_57 [2] : vector<1x8x16xf32> to vector<1x8xf32>
    %151 = vector.shape_cast %150 : vector<1x8xf32> to vector<1x8x1xf32>
    %cst_58 = arith.constant dense<0xFF800000> : vector<1x1xf32>
    %152 = vector.multi_reduction <maximumf>, %151, %cst_58 [1] : vector<1x8x1xf32> to vector<1x1xf32>
    %153 = vector.shape_cast %152 : vector<1x1xf32> to vector<1x1x1xf32>
    %154 = vector.broadcast %153 : vector<1x1x1xf32> to vector<1x8x16xf32>
    %155 = arith.subf %149, %154 : vector<1x8x16xf32>
    %156 = math.exp %155 : vector<1x8x16xf32>
    %cst_59 = arith.constant dense<0.000000e+00> : vector<1x8xf32>
    %157 = vector.multi_reduction <add>, %156, %cst_59 [2] : vector<1x8x16xf32> to vector<1x8xf32>
    %158 = vector.shape_cast %157 : vector<1x8xf32> to vector<1x8x1xf32>
    %159 = tpu.reciprocal %158 {approx = true} : vector<1x8x1xf32> -> vector<1x8x1xf32>
    %160 = vector.broadcast %159 : vector<1x8x1xf32> to vector<1x8x16xf32>
    %161 = arith.mulf %156, %160 : vector<1x8x16xf32>
    %cst_60 = arith.constant dense<0.000000e+00> : vector<1x16xf32>
    %162 = vector.multi_reduction <add>, %156, %cst_60 [1] : vector<1x8x16xf32> to vector<1x16xf32>
    %163 = vector.shape_cast %162 : vector<1x16xf32> to vector<1x1x16xf32>
    %164 = tpu.reciprocal %163 {approx = true} : vector<1x1x16xf32> -> vector<1x1x16xf32>
    %165 = vector.broadcast %164 : vector<1x1x16xf32> to vector<1x8x16xf32>
    %166 = arith.mulf %156, %165 : vector<1x8x16xf32>
    %167 = arith.truncf %161 : vector<1x8x16xf32> to vector<1x8x16xbf16>
    "tpu.trace_start"() <{level = 10 : i32, message = "bij,bjd->bid"}> : () -> ()
    %cst_61 = arith.constant dense<0.000000e+00> : vector<1x8x64xf32>
    %168 = tpu.matmul %167, %148, %cst_61 {dimension_numbers = #tpu.dot_dimension_numbers<[2], [1], [1], [2], [0, 0, 0, 1, 1, 2], [0], [0]>} : vector<1x8x16xbf16>, vector<1x16x64xbf16>, vector<1x8x64xf32> -> vector<1x8x64xf32>
    "tpu.trace_stop"() : () -> ()
    %169 = arith.truncf %166 : vector<1x8x16xf32> to vector<1x8x16xbf16>
    %cst_62 = arith.constant dense<0.000000e+00> : vector<1x16x64xf32>
    %170 = tpu.matmul %169, %144, %cst_62 {dimension_numbers = #tpu.dot_dimension_numbers<[1], [1], [2], [2], [0, 0, 0, 2, 1, 2], [0], [0]>} : vector<1x8x16xbf16>, vector<1x8x64xbf16>, vector<1x16x64xf32> -> vector<1x16x64xf32>
    %171 = vector.shape_cast %168 : vector<1x8x64xf32> to vector<8x64xf32>
    %172 = arith.truncf %171 : vector<8x64xf32> to vector<8x64xbf16>
    %c0_63 = arith.constant 0 : index
    %c128 = arith.constant 128 : index
    %173 = vector.load %arg26[%c0_63, %c128] : memref<8x512xbf16, #tpu.memory_space<vmem>>, vector<8x64xbf16>
    tpu.vector_store %arg26[%c0_63, %c128], %172 {strides = array<i32>} : memref<8x512xbf16, #tpu.memory_space<vmem>>, vector<8x64xbf16>,
    %174 = vector.shape_cast %170 : vector<1x16x64xf32> to vector<16x64xf32>
    %175 = arith.truncf %174 : vector<16x64xf32> to vector<16x64xbf16>
    %c0_64 = arith.constant 0 : index
    %c128_65 = arith.constant 128 : index
    %176 = vector.load %arg27[%c0_64, %c128_65] : memref<16x512xbf16, #tpu.memory_space<vmem>>, vector<16x64xbf16>
    tpu.vector_store %arg27[%c0_64, %c128_65], %175 {strides = array<i32>} : memref<16x512xbf16, #tpu.memory_space<vmem>>, vector<16x64xbf16>,
    %177 = vector.extract_strided_slice %64 {offsets = [0, 192], sizes = [8, 64], strides = [1, 1]} : vector<8x1024xbf16> to vector<8x64xbf16>
    %178 = vector.shape_cast %177 : vector<8x64xbf16> to vector<1x8x64xbf16>
    %179 = vector.extract_strided_slice %64 {offsets = [0, 704], sizes = [8, 64], strides = [1, 1]} : vector<8x1024xbf16> to vector<8x64xbf16>
    %180 = vector.shape_cast %179 : vector<8x64xbf16> to vector<1x8x64xbf16>
    %181 = vector.extract_strided_slice %68 {offsets = [0, 192], sizes = [16, 64], strides = [1, 1]} : vector<16x1024xbf16> to vector<16x64xbf16>
    %182 = vector.shape_cast %181 : vector<16x64xbf16> to vector<1x16x64xbf16>
    %183 = vector.extract_strided_slice %68 {offsets = [0, 704], sizes = [16, 64], strides = [1, 1]} : vector<16x1024xbf16> to vector<16x64xbf16>
    %184 = vector.shape_cast %183 : vector<16x64xbf16> to vector<1x16x64xbf16>
    "tpu.trace_start"() <{level = 10 : i32, message = "bid,bjd->bij"}> : () -> ()
    %cst_66 = arith.constant dense<0.000000e+00> : vector<1x8x16xf32>
    %185 = tpu.matmul %178, %182, %cst_66 {dimension_numbers = #tpu.dot_dimension_numbers<[2], [2], [1], [1], [0, 0, 0, 1, 1, 1], [0], [0]>} : vector<1x8x64xbf16>, vector<1x16x64xbf16>, vector<1x8x16xf32> -> vector<1x8x16xf32>
    "tpu.trace_stop"() : () -> ()
    %cst_67 = arith.constant dense<0xFF800000> : vector<1x8xf32>
    %186 = vector.multi_reduction <maximumf>, %185, %cst_67 [2] : vector<1x8x16xf32> to vector<1x8xf32>
    %187 = vector.shape_cast %186 : vector<1x8xf32> to vector<1x8x1xf32>
    %cst_68 = arith.constant dense<0xFF800000> : vector<1x1xf32>
    %188 = vector.multi_reduction <maximumf>, %187, %cst_68 [1] : vector<1x8x1xf32> to vector<1x1xf32>
    %189 = vector.shape_cast %188 : vector<1x1xf32> to vector<1x1x1xf32>
    %190 = vector.broadcast %189 : vector<1x1x1xf32> to vector<1x8x16xf32>
    %191 = arith.subf %185, %190 : vector<1x8x16xf32>
    %192 = math.exp %191 : vector<1x8x16xf32>
    %cst_69 = arith.constant dense<0.000000e+00> : vector<1x8xf32>
    %193 = vector.multi_reduction <add>, %192, %cst_69 [2] : vector<1x8x16xf32> to vector<1x8xf32>
    %194 = vector.shape_cast %193 : vector<1x8xf32> to vector<1x8x1xf32>
    %195 = tpu.reciprocal %194 {approx = true} : vector<1x8x1xf32> -> vector<1x8x1xf32>
    %196 = vector.broadcast %195 : vector<1x8x1xf32> to vector<1x8x16xf32>
    %197 = arith.mulf %192, %196 : vector<1x8x16xf32>
    %cst_70 = arith.constant dense<0.000000e+00> : vector<1x16xf32>
    %198 = vector.multi_reduction <add>, %192, %cst_70 [1] : vector<1x8x16xf32> to vector<1x16xf32>
    %199 = vector.shape_cast %198 : vector<1x16xf32> to vector<1x1x16xf32>
    %200 = tpu.reciprocal %199 {approx = true} : vector<1x1x16xf32> -> vector<1x1x16xf32>
    %201 = vector.broadcast %200 : vector<1x1x16xf32> to vector<1x8x16xf32>
    %202 = arith.mulf %192, %201 : vector<1x8x16xf32>
    %203 = arith.truncf %197 : vector<1x8x16xf32> to vector<1x8x16xbf16>
    "tpu.trace_start"() <{level = 10 : i32, message = "bij,bjd->bid"}> : () -> ()
    %cst_71 = arith.constant dense<0.000000e+00> : vector<1x8x64xf32>
    %204 = tpu.matmul %203, %184, %cst_71 {dimension_numbers = #tpu.dot_dimension_numbers<[2], [1], [1], [2], [0, 0, 0, 1, 1, 2], [0], [0]>} : vector<1x8x16xbf16>, vector<1x16x64xbf16>, vector<1x8x64xf32> -> vector<1x8x64xf32>
    "tpu.trace_stop"() : () -> ()
    %205 = arith.truncf %202 : vector<1x8x16xf32> to vector<1x8x16xbf16>
    %cst_72 = arith.constant dense<0.000000e+00> : vector<1x16x64xf32>
    %206 = tpu.matmul %205, %180, %cst_72 {dimension_numbers = #tpu.dot_dimension_numbers<[1], [1], [2], [2], [0, 0, 0, 2, 1, 2], [0], [0]>} : vector<1x8x16xbf16>, vector<1x8x64xbf16>, vector<1x16x64xf32> -> vector<1x16x64xf32>
    %207 = vector.shape_cast %204 : vector<1x8x64xf32> to vector<8x64xf32>
    %208 = arith.truncf %207 : vector<8x64xf32> to vector<8x64xbf16>
    %c0_73 = arith.constant 0 : index
    %c192 = arith.constant 192 : index
    %209 = vector.load %arg26[%c0_73, %c192] : memref<8x512xbf16, #tpu.memory_space<vmem>>, vector<8x64xbf16>
    tpu.vector_store %arg26[%c0_73, %c192], %208 {strides = array<i32>} : memref<8x512xbf16, #tpu.memory_space<vmem>>, vector<8x64xbf16>,
    %210 = vector.shape_cast %206 : vector<1x16x64xf32> to vector<16x64xf32>
    %211 = arith.truncf %210 : vector<16x64xf32> to vector<16x64xbf16>
    %c0_74 = arith.constant 0 : index
    %c192_75 = arith.constant 192 : index
    %212 = vector.load %arg27[%c0_74, %c192_75] : memref<16x512xbf16, #tpu.memory_space<vmem>>, vector<16x64xbf16>
    tpu.vector_store %arg27[%c0_74, %c192_75], %211 {strides = array<i32>} : memref<16x512xbf16, #tpu.memory_space<vmem>>, vector<16x64xbf16>,
    %213 = vector.extract_strided_slice %64 {offsets = [0, 256], sizes = [8, 64], strides = [1, 1]} : vector<8x1024xbf16> to vector<8x64xbf16>
    %214 = vector.shape_cast %213 : vector<8x64xbf16> to vector<1x8x64xbf16>
    %215 = vector.extract_strided_slice %64 {offsets = [0, 768], sizes = [8, 64], strides = [1, 1]} : vector<8x1024xbf16> to vector<8x64xbf16>
    %216 = vector.shape_cast %215 : vector<8x64xbf16> to vector<1x8x64xbf16>
    %217 = vector.extract_strided_slice %68 {offsets = [0, 256], sizes = [16, 64], strides = [1, 1]} : vector<16x1024xbf16> to vector<16x64xbf16>
    %218 = vector.shape_cast %217 : vector<16x64xbf16> to vector<1x16x64xbf16>
    %219 = vector.extract_strided_slice %68 {offsets = [0, 768], sizes = [16, 64], strides = [1, 1]} : vector<16x1024xbf16> to vector<16x64xbf16>
    %220 = vector.shape_cast %219 : vector<16x64xbf16> to vector<1x16x64xbf16>
    "tpu.trace_start"() <{level = 10 : i32, message = "bid,bjd->bij"}> : () -> ()
    %cst_76 = arith.constant dense<0.000000e+00> : vector<1x8x16xf32>
    %221 = tpu.matmul %214, %218, %cst_76 {dimension_numbers = #tpu.dot_dimension_numbers<[2], [2], [1], [1], [0, 0, 0, 1, 1, 1], [0], [0]>} : vector<1x8x64xbf16>, vector<1x16x64xbf16>, vector<1x8x16xf32> -> vector<1x8x16xf32>
    "tpu.trace_stop"() : () -> ()
    %cst_77 = arith.constant dense<0xFF800000> : vector<1x8xf32>
    %222 = vector.multi_reduction <maximumf>, %221, %cst_77 [2] : vector<1x8x16xf32> to vector<1x8xf32>
    %223 = vector.shape_cast %222 : vector<1x8xf32> to vector<1x8x1xf32>
    %cst_78 = arith.constant dense<0xFF800000> : vector<1x1xf32>
    %224 = vector.multi_reduction <maximumf>, %223, %cst_78 [1] : vector<1x8x1xf32> to vector<1x1xf32>
    %225 = vector.shape_cast %224 : vector<1x1xf32> to vector<1x1x1xf32>
    %226 = vector.broadcast %225 : vector<1x1x1xf32> to vector<1x8x16xf32>
    %227 = arith.subf %221, %226 : vector<1x8x16xf32>
    %228 = math.exp %227 : vector<1x8x16xf32>
    %cst_79 = arith.constant dense<0.000000e+00> : vector<1x8xf32>
    %229 = vector.multi_reduction <add>, %228, %cst_79 [2] : vector<1x8x16xf32> to vector<1x8xf32>
    %230 = vector.shape_cast %229 : vector<1x8xf32> to vector<1x8x1xf32>
    %231 = tpu.reciprocal %230 {approx = true} : vector<1x8x1xf32> -> vector<1x8x1xf32>
    %232 = vector.broadcast %231 : vector<1x8x1xf32> to vector<1x8x16xf32>
    %233 = arith.mulf %228, %232 : vector<1x8x16xf32>
    %cst_80 = arith.constant dense<0.000000e+00> : vector<1x16xf32>
    %234 = vector.multi_reduction <add>, %228, %cst_80 [1] : vector<1x8x16xf32> to vector<1x16xf32>
    %235 = vector.shape_cast %234 : vector<1x16xf32> to vector<1x1x16xf32>
    %236 = tpu.reciprocal %235 {approx = true} : vector<1x1x16xf32> -> vector<1x1x16xf32>
    %237 = vector.broadcast %236 : vector<1x1x16xf32> to vector<1x8x16xf32>
    %238 = arith.mulf %228, %237 : vector<1x8x16xf32>
    %239 = arith.truncf %233 : vector<1x8x16xf32> to vector<1x8x16xbf16>
    "tpu.trace_start"() <{level = 10 : i32, message = "bij,bjd->bid"}> : () -> ()
    %cst_81 = arith.constant dense<0.000000e+00> : vector<1x8x64xf32>
    %240 = tpu.matmul %239, %220, %cst_81 {dimension_numbers = #tpu.dot_dimension_numbers<[2], [1], [1], [2], [0, 0, 0, 1, 1, 2], [0], [0]>} : vector<1x8x16xbf16>, vector<1x16x64xbf16>, vector<1x8x64xf32> -> vector<1x8x64xf32>
    "tpu.trace_stop"() : () -> ()
    %241 = arith.truncf %238 : vector<1x8x16xf32> to vector<1x8x16xbf16>
    %cst_82 = arith.constant dense<0.000000e+00> : vector<1x16x64xf32>
    %242 = tpu.matmul %241, %216, %cst_82 {dimension_numbers = #tpu.dot_dimension_numbers<[1], [1], [2], [2], [0, 0, 0, 2, 1, 2], [0], [0]>} : vector<1x8x16xbf16>, vector<1x8x64xbf16>, vector<1x16x64xf32> -> vector<1x16x64xf32>
    %243 = vector.shape_cast %240 : vector<1x8x64xf32> to vector<8x64xf32>
    %244 = arith.truncf %243 : vector<8x64xf32> to vector<8x64xbf16>
    %c0_83 = arith.constant 0 : index
    %c256 = arith.constant 256 : index
    %245 = vector.load %arg26[%c0_83, %c256] : memref<8x512xbf16, #tpu.memory_space<vmem>>, vector<8x64xbf16>
    tpu.vector_store %arg26[%c0_83, %c256], %244 {strides = array<i32>} : memref<8x512xbf16, #tpu.memory_space<vmem>>, vector<8x64xbf16>,
    %246 = vector.shape_cast %242 : vector<1x16x64xf32> to vector<16x64xf32>
    %247 = arith.truncf %246 : vector<16x64xf32> to vector<16x64xbf16>
    %c0_84 = arith.constant 0 : index
    %c256_85 = arith.constant 256 : index
    %248 = vector.load %arg27[%c0_84, %c256_85] : memref<16x512xbf16, #tpu.memory_space<vmem>>, vector<16x64xbf16>
    tpu.vector_store %arg27[%c0_84, %c256_85], %247 {strides = array<i32>} : memref<16x512xbf16, #tpu.memory_space<vmem>>, vector<16x64xbf16>,
    %249 = vector.extract_strided_slice %64 {offsets = [0, 320], sizes = [8, 64], strides = [1, 1]} : vector<8x1024xbf16> to vector<8x64xbf16>
    %250 = vector.shape_cast %249 : vector<8x64xbf16> to vector<1x8x64xbf16>
    %251 = vector.extract_strided_slice %64 {offsets = [0, 832], sizes = [8, 64], strides = [1, 1]} : vector<8x1024xbf16> to vector<8x64xbf16>
    %252 = vector.shape_cast %251 : vector<8x64xbf16> to vector<1x8x64xbf16>
    %253 = vector.extract_strided_slice %68 {offsets = [0, 320], sizes = [16, 64], strides = [1, 1]} : vector<16x1024xbf16> to vector<16x64xbf16>
    %254 = vector.shape_cast %253 : vector<16x64xbf16> to vector<1x16x64xbf16>
    %255 = vector.extract_strided_slice %68 {offsets = [0, 832], sizes = [16, 64], strides = [1, 1]} : vector<16x1024xbf16> to vector<16x64xbf16>
    %256 = vector.shape_cast %255 : vector<16x64xbf16> to vector<1x16x64xbf16>
    "tpu.trace_start"() <{level = 10 : i32, message = "bid,bjd->bij"}> : () -> ()
    %cst_86 = arith.constant dense<0.000000e+00> : vector<1x8x16xf32>
    %257 = tpu.matmul %250, %254, %cst_86 {dimension_numbers = #tpu.dot_dimension_numbers<[2], [2], [1], [1], [0, 0, 0, 1, 1, 1], [0], [0]>} : vector<1x8x64xbf16>, vector<1x16x64xbf16>, vector<1x8x16xf32> -> vector<1x8x16xf32>
    "tpu.trace_stop"() : () -> ()
    %cst_87 = arith.constant dense<0xFF800000> : vector<1x8xf32>
    %258 = vector.multi_reduction <maximumf>, %257, %cst_87 [2] : vector<1x8x16xf32> to vector<1x8xf32>
    %259 = vector.shape_cast %258 : vector<1x8xf32> to vector<1x8x1xf32>
    %cst_88 = arith.constant dense<0xFF800000> : vector<1x1xf32>
    %260 = vector.multi_reduction <maximumf>, %259, %cst_88 [1] : vector<1x8x1xf32> to vector<1x1xf32>
    %261 = vector.shape_cast %260 : vector<1x1xf32> to vector<1x1x1xf32>
    %262 = vector.broadcast %261 : vector<1x1x1xf32> to vector<1x8x16xf32>
    %263 = arith.subf %257, %262 : vector<1x8x16xf32>
    %264 = math.exp %263 : vector<1x8x16xf32>
    %cst_89 = arith.constant dense<0.000000e+00> : vector<1x8xf32>
    %265 = vector.multi_reduction <add>, %264, %cst_89 [2] : vector<1x8x16xf32> to vector<1x8xf32>
    %266 = vector.shape_cast %265 : vector<1x8xf32> to vector<1x8x1xf32>
    %267 = tpu.reciprocal %266 {approx = true} : vector<1x8x1xf32> -> vector<1x8x1xf32>
    %268 = vector.broadcast %267 : vector<1x8x1xf32> to vector<1x8x16xf32>
    %269 = arith.mulf %264, %268 : vector<1x8x16xf32>
    %cst_90 = arith.constant dense<0.000000e+00> : vector<1x16xf32>
    %270 = vector.multi_reduction <add>, %264, %cst_90 [1] : vector<1x8x16xf32> to vector<1x16xf32>
    %271 = vector.shape_cast %270 : vector<1x16xf32> to vector<1x1x16xf32>
    %272 = tpu.reciprocal %271 {approx = true} : vector<1x1x16xf32> -> vector<1x1x16xf32>
    %273 = vector.broadcast %272 : vector<1x1x16xf32> to vector<1x8x16xf32>
    %274 = arith.mulf %264, %273 : vector<1x8x16xf32>
    %275 = arith.truncf %269 : vector<1x8x16xf32> to vector<1x8x16xbf16>
    "tpu.trace_start"() <{level = 10 : i32, message = "bij,bjd->bid"}> : () -> ()
    %cst_91 = arith.constant dense<0.000000e+00> : vector<1x8x64xf32>
    %276 = tpu.matmul %275, %256, %cst_91 {dimension_numbers = #tpu.dot_dimension_numbers<[2], [1], [1], [2], [0, 0, 0, 1, 1, 2], [0], [0]>} : vector<1x8x16xbf16>, vector<1x16x64xbf16>, vector<1x8x64xf32> -> vector<1x8x64xf32>
    "tpu.trace_stop"() : () -> ()
    %277 = arith.truncf %274 : vector<1x8x16xf32> to vector<1x8x16xbf16>
    %cst_92 = arith.constant dense<0.000000e+00> : vector<1x16x64xf32>
    %278 = tpu.matmul %277, %252, %cst_92 {dimension_numbers = #tpu.dot_dimension_numbers<[1], [1], [2], [2], [0, 0, 0, 2, 1, 2], [0], [0]>} : vector<1x8x16xbf16>, vector<1x8x64xbf16>, vector<1x16x64xf32> -> vector<1x16x64xf32>
    %279 = vector.shape_cast %276 : vector<1x8x64xf32> to vector<8x64xf32>
    %280 = arith.truncf %279 : vector<8x64xf32> to vector<8x64xbf16>
    %c0_93 = arith.constant 0 : index
    %c320 = arith.constant 320 : index
    %281 = vector.load %arg26[%c0_93, %c320] : memref<8x512xbf16, #tpu.memory_space<vmem>>, vector<8x64xbf16>
    tpu.vector_store %arg26[%c0_93, %c320], %280 {strides = array<i32>} : memref<8x512xbf16, #tpu.memory_space<vmem>>, vector<8x64xbf16>,
    %282 = vector.shape_cast %278 : vector<1x16x64xf32> to vector<16x64xf32>
    %283 = arith.truncf %282 : vector<16x64xf32> to vector<16x64xbf16>
    %c0_94 = arith.constant 0 : index
    %c320_95 = arith.constant 320 : index
    %284 = vector.load %arg27[%c0_94, %c320_95] : memref<16x512xbf16, #tpu.memory_space<vmem>>, vector<16x64xbf16>
    tpu.vector_store %arg27[%c0_94, %c320_95], %283 {strides = array<i32>} : memref<16x512xbf16, #tpu.memory_space<vmem>>, vector<16x64xbf16>,
    %285 = vector.extract_strided_slice %64 {offsets = [0, 384], sizes = [8, 64], strides = [1, 1]} : vector<8x1024xbf16> to vector<8x64xbf16>
    %286 = vector.shape_cast %285 : vector<8x64xbf16> to vector<1x8x64xbf16>
    %287 = vector.extract_strided_slice %64 {offsets = [0, 896], sizes = [8, 64], strides = [1, 1]} : vector<8x1024xbf16> to vector<8x64xbf16>
    %288 = vector.shape_cast %287 : vector<8x64xbf16> to vector<1x8x64xbf16>
    %289 = vector.extract_strided_slice %68 {offsets = [0, 384], sizes = [16, 64], strides = [1, 1]} : vector<16x1024xbf16> to vector<16x64xbf16>
    %290 = vector.shape_cast %289 : vector<16x64xbf16> to vector<1x16x64xbf16>
    %291 = vector.extract_strided_slice %68 {offsets = [0, 896], sizes = [16, 64], strides = [1, 1]} : vector<16x1024xbf16> to vector<16x64xbf16>
    %292 = vector.shape_cast %291 : vector<16x64xbf16> to vector<1x16x64xbf16>
    "tpu.trace_start"() <{level = 10 : i32, message = "bid,bjd->bij"}> : () -> ()
    %cst_96 = arith.constant dense<0.000000e+00> : vector<1x8x16xf32>
    %293 = tpu.matmul %286, %290, %cst_96 {dimension_numbers = #tpu.dot_dimension_numbers<[2], [2], [1], [1], [0, 0, 0, 1, 1, 1], [0], [0]>} : vector<1x8x64xbf16>, vector<1x16x64xbf16>, vector<1x8x16xf32> -> vector<1x8x16xf32>
    "tpu.trace_stop"() : () -> ()
    %cst_97 = arith.constant dense<0xFF800000> : vector<1x8xf32>
    %294 = vector.multi_reduction <maximumf>, %293, %cst_97 [2] : vector<1x8x16xf32> to vector<1x8xf32>
    %295 = vector.shape_cast %294 : vector<1x8xf32> to vector<1x8x1xf32>
    %cst_98 = arith.constant dense<0xFF800000> : vector<1x1xf32>
    %296 = vector.multi_reduction <maximumf>, %295, %cst_98 [1] : vector<1x8x1xf32> to vector<1x1xf32>
    %297 = vector.shape_cast %296 : vector<1x1xf32> to vector<1x1x1xf32>
    %298 = vector.broadcast %297 : vector<1x1x1xf32> to vector<1x8x16xf32>
    %299 = arith.subf %293, %298 : vector<1x8x16xf32>
    %300 = math.exp %299 : vector<1x8x16xf32>
    %cst_99 = arith.constant dense<0.000000e+00> : vector<1x8xf32>
    %301 = vector.multi_reduction <add>, %300, %cst_99 [2] : vector<1x8x16xf32> to vector<1x8xf32>
    %302 = vector.shape_cast %301 : vector<1x8xf32> to vector<1x8x1xf32>
    %303 = tpu.reciprocal %302 {approx = true} : vector<1x8x1xf32> -> vector<1x8x1xf32>
    %304 = vector.broadcast %303 : vector<1x8x1xf32> to vector<1x8x16xf32>
    %305 = arith.mulf %300, %304 : vector<1x8x16xf32>
    %cst_100 = arith.constant dense<0.000000e+00> : vector<1x16xf32>
    %306 = vector.multi_reduction <add>, %300, %cst_100 [1] : vector<1x8x16xf32> to vector<1x16xf32>
    %307 = vector.shape_cast %306 : vector<1x16xf32> to vector<1x1x16xf32>
    %308 = tpu.reciprocal %307 {approx = true} : vector<1x1x16xf32> -> vector<1x1x16xf32>
    %309 = vector.broadcast %308 : vector<1x1x16xf32> to vector<1x8x16xf32>
    %310 = arith.mulf %300, %309 : vector<1x8x16xf32>
    %311 = arith.truncf %305 : vector<1x8x16xf32> to vector<1x8x16xbf16>
    "tpu.trace_start"() <{level = 10 : i32, message = "bij,bjd->bid"}> : () -> ()
    %cst_101 = arith.constant dense<0.000000e+00> : vector<1x8x64xf32>
    %312 = tpu.matmul %311, %292, %cst_101 {dimension_numbers = #tpu.dot_dimension_numbers<[2], [1], [1], [2], [0, 0, 0, 1, 1, 2], [0], [0]>} : vector<1x8x16xbf16>, vector<1x16x64xbf16>, vector<1x8x64xf32> -> vector<1x8x64xf32>
    "tpu.trace_stop"() : () -> ()
    %313 = arith.truncf %310 : vector<1x8x16xf32> to vector<1x8x16xbf16>
    %cst_102 = arith.constant dense<0.000000e+00> : vector<1x16x64xf32>
    %314 = tpu.matmul %313, %288, %cst_102 {dimension_numbers = #tpu.dot_dimension_numbers<[1], [1], [2], [2], [0, 0, 0, 2, 1, 2], [0], [0]>} : vector<1x8x16xbf16>, vector<1x8x64xbf16>, vector<1x16x64xf32> -> vector<1x16x64xf32>
    %315 = vector.shape_cast %312 : vector<1x8x64xf32> to vector<8x64xf32>
    %316 = arith.truncf %315 : vector<8x64xf32> to vector<8x64xbf16>
    %c0_103 = arith.constant 0 : index
    %c384 = arith.constant 384 : index
    %317 = vector.load %arg26[%c0_103, %c384] : memref<8x512xbf16, #tpu.memory_space<vmem>>, vector<8x64xbf16>
    tpu.vector_store %arg26[%c0_103, %c384], %316 {strides = array<i32>} : memref<8x512xbf16, #tpu.memory_space<vmem>>, vector<8x64xbf16>,
    %318 = vector.shape_cast %314 : vector<1x16x64xf32> to vector<16x64xf32>
    %319 = arith.truncf %318 : vector<16x64xf32> to vector<16x64xbf16>
    %c0_104 = arith.constant 0 : index
    %c384_105 = arith.constant 384 : index
    %320 = vector.load %arg27[%c0_104, %c384_105] : memref<16x512xbf16, #tpu.memory_space<vmem>>, vector<16x64xbf16>
    tpu.vector_store %arg27[%c0_104, %c384_105], %319 {strides = array<i32>} : memref<16x512xbf16, #tpu.memory_space<vmem>>, vector<16x64xbf16>,
    %321 = vector.extract_strided_slice %64 {offsets = [0, 448], sizes = [8, 64], strides = [1, 1]} : vector<8x1024xbf16> to vector<8x64xbf16>
    %322 = vector.shape_cast %321 : vector<8x64xbf16> to vector<1x8x64xbf16>
    %323 = vector.extract_strided_slice %64 {offsets = [0, 960], sizes = [8, 64], strides = [1, 1]} : vector<8x1024xbf16> to vector<8x64xbf16>
    %324 = vector.shape_cast %323 : vector<8x64xbf16> to vector<1x8x64xbf16>
    %325 = vector.extract_strided_slice %68 {offsets = [0, 448], sizes = [16, 64], strides = [1, 1]} : vector<16x1024xbf16> to vector<16x64xbf16>
    %326 = vector.shape_cast %325 : vector<16x64xbf16> to vector<1x16x64xbf16>
    %327 = vector.extract_strided_slice %68 {offsets = [0, 960], sizes = [16, 64], strides = [1, 1]} : vector<16x1024xbf16> to vector<16x64xbf16>
    %328 = vector.shape_cast %327 : vector<16x64xbf16> to vector<1x16x64xbf16>
    "tpu.trace_start"() <{level = 10 : i32, message = "bid,bjd->bij"}> : () -> ()
    %cst_106 = arith.constant dense<0.000000e+00> : vector<1x8x16xf32>
    %329 = tpu.matmul %322, %326, %cst_106 {dimension_numbers = #tpu.dot_dimension_numbers<[2], [2], [1], [1], [0, 0, 0, 1, 1, 1], [0], [0]>} : vector<1x8x64xbf16>, vector<1x16x64xbf16>, vector<1x8x16xf32> -> vector<1x8x16xf32>
    "tpu.trace_stop"() : () -> ()
    %cst_107 = arith.constant dense<0xFF800000> : vector<1x8xf32>
    %330 = vector.multi_reduction <maximumf>, %329, %cst_107 [2] : vector<1x8x16xf32> to vector<1x8xf32>
    %331 = vector.shape_cast %330 : vector<1x8xf32> to vector<1x8x1xf32>
    %cst_108 = arith.constant dense<0xFF800000> : vector<1x1xf32>
    %332 = vector.multi_reduction <maximumf>, %331, %cst_108 [1] : vector<1x8x1xf32> to vector<1x1xf32>
    %333 = vector.shape_cast %332 : vector<1x1xf32> to vector<1x1x1xf32>
    %334 = vector.broadcast %333 : vector<1x1x1xf32> to vector<1x8x16xf32>
    %335 = arith.subf %329, %334 : vector<1x8x16xf32>
    %336 = math.exp %335 : vector<1x8x16xf32>
    %cst_109 = arith.constant dense<0.000000e+00> : vector<1x8xf32>
    %337 = vector.multi_reduction <add>, %336, %cst_109 [2] : vector<1x8x16xf32> to vector<1x8xf32>
    %338 = vector.shape_cast %337 : vector<1x8xf32> to vector<1x8x1xf32>
    %339 = tpu.reciprocal %338 {approx = true} : vector<1x8x1xf32> -> vector<1x8x1xf32>
    %340 = vector.broadcast %339 : vector<1x8x1xf32> to vector<1x8x16xf32>
    %341 = arith.mulf %336, %340 : vector<1x8x16xf32>
    %cst_110 = arith.constant dense<0.000000e+00> : vector<1x16xf32>
    %342 = vector.multi_reduction <add>, %336, %cst_110 [1] : vector<1x8x16xf32> to vector<1x16xf32>
    %343 = vector.shape_cast %342 : vector<1x16xf32> to vector<1x1x16xf32>
    %344 = tpu.reciprocal %343 {approx = true} : vector<1x1x16xf32> -> vector<1x1x16xf32>
    %345 = vector.broadcast %344 : vector<1x1x16xf32> to vector<1x8x16xf32>
    %346 = arith.mulf %336, %345 : vector<1x8x16xf32>
    %347 = arith.truncf %341 : vector<1x8x16xf32> to vector<1x8x16xbf16>
    "tpu.trace_start"() <{level = 10 : i32, message = "bij,bjd->bid"}> : () -> ()
    %cst_111 = arith.constant dense<0.000000e+00> : vector<1x8x64xf32>
    %348 = tpu.matmul %347, %328, %cst_111 {dimension_numbers = #tpu.dot_dimension_numbers<[2], [1], [1], [2], [0, 0, 0, 1, 1, 2], [0], [0]>} : vector<1x8x16xbf16>, vector<1x16x64xbf16>, vector<1x8x64xf32> -> vector<1x8x64xf32>
    "tpu.trace_stop"() : () -> ()
    %349 = arith.truncf %346 : vector<1x8x16xf32> to vector<1x8x16xbf16>
    %cst_112 = arith.constant dense<0.000000e+00> : vector<1x16x64xf32>
    %350 = tpu.matmul %349, %324, %cst_112 {dimension_numbers = #tpu.dot_dimension_numbers<[1], [1], [2], [2], [0, 0, 0, 2, 1, 2], [0], [0]>} : vector<1x8x16xbf16>, vector<1x8x64xbf16>, vector<1x16x64xf32> -> vector<1x16x64xf32>
    %351 = vector.shape_cast %348 : vector<1x8x64xf32> to vector<8x64xf32>
    %352 = arith.truncf %351 : vector<8x64xf32> to vector<8x64xbf16>
    %c0_113 = arith.constant 0 : index
    %c448 = arith.constant 448 : index
    %353 = vector.load %arg26[%c0_113, %c448] : memref<8x512xbf16, #tpu.memory_space<vmem>>, vector<8x64xbf16>
    tpu.vector_store %arg26[%c0_113, %c448], %352 {strides = array<i32>} : memref<8x512xbf16, #tpu.memory_space<vmem>>, vector<8x64xbf16>,
    %354 = vector.shape_cast %350 : vector<1x16x64xf32> to vector<16x64xf32>
    %355 = arith.truncf %354 : vector<16x64xf32> to vector<16x64xbf16>
    %c0_114 = arith.constant 0 : index
    %c448_115 = arith.constant 448 : index
    %356 = vector.load %arg27[%c0_114, %c448_115] : memref<16x512xbf16, #tpu.memory_space<vmem>>, vector<16x64xbf16>
    tpu.vector_store %arg27[%c0_114, %c448_115], %355 {strides = array<i32>} : memref<16x512xbf16, #tpu.memory_space<vmem>>, vector<16x64xbf16>,
    %c0_116 = arith.constant 0 : index
    %c0_117 = arith.constant 0 : index
    %357 = vector.load %arg26[%c0_116, %c0_117] : memref<8x512xbf16, #tpu.memory_space<vmem>>, vector<8x512xbf16>
    %c0_118 = arith.constant 0 : index
    %c0_119 = arith.constant 0 : index
    %c0_120 = arith.constant 0 : index
    %358 = vector.load %arg10[%c0_118, %c0_119, %c0_120] : memref<1x512x32xbf16, #tpu.memory_space<vmem>>, vector<1x512x32xbf16>
    %359 = vector.shape_cast %358 : vector<1x512x32xbf16> to vector<512x32xbf16>
    %cst_121 = arith.constant dense<0.000000e+00> : vector<8x32xf32>
    %360 = tpu.matmul %357, %359, %cst_121 {dimension_numbers = #tpu.dot_dimension_numbers<[1], [0], [0], [1], [0, 0, 1, 1], [], []>} : vector<8x512xbf16>, vector<512x32xbf16>, vector<8x32xf32> -> vector<8x32xf32>
    %361 = arith.addf %4, %360 : vector<8x32xf32>
    %c0_122 = arith.constant 0 : index
    %c0_123 = arith.constant 0 : index
    %c0_124 = arith.constant 0 : index
    %362 = vector.load %arg11[%c0_122, %c0_123, %c0_124] : memref<1x1x32xf32, #tpu.memory_space<vmem>>, vector<1x1x32xf32>
    %363 = vector.shape_cast %362 : vector<1x1x32xf32> to vector<1x32xf32>
    %364 = vector.broadcast %363 : vector<1x32xf32> to vector<8x32xf32>
    %365 = arith.addf %361, %364 : vector<8x32xf32>
    %c0_125 = arith.constant 0 : index
    %c0_126 = arith.constant 0 : index
    %366 = vector.load %arg27[%c0_125, %c0_126] : memref<16x512xbf16, #tpu.memory_space<vmem>>, vector<16x512xbf16>
    %c0_127 = arith.constant 0 : index
    %c0_128 = arith.constant 0 : index
    %c0_129 = arith.constant 0 : index
    %367 = vector.load %arg12[%c0_127, %c0_128, %c0_129] : memref<1x512x48xbf16, #tpu.memory_space<vmem>>, vector<1x512x48xbf16>
    %368 = vector.shape_cast %367 : vector<1x512x48xbf16> to vector<512x48xbf16>
    %cst_130 = arith.constant dense<0.000000e+00> : vector<16x48xf32>
    %369 = tpu.matmul %366, %368, %cst_130 {dimension_numbers = #tpu.dot_dimension_numbers<[1], [0], [0], [1], [0, 0, 1, 1], [], []>} : vector<16x512xbf16>, vector<512x48xbf16>, vector<16x48xf32> -> vector<16x48xf32>
    %370 = arith.addf %6, %369 : vector<16x48xf32>
    %c0_131 = arith.constant 0 : index
    %c0_132 = arith.constant 0 : index
    %c0_133 = arith.constant 0 : index
    %371 = vector.load %arg13[%c0_131, %c0_132, %c0_133] : memref<1x1x48xf32, #tpu.memory_space<vmem>>, vector<1x1x48xf32>
    %372 = vector.shape_cast %371 : vector<1x1x48xf32> to vector<1x48xf32>
    %373 = vector.broadcast %372 : vector<1x48xf32> to vector<16x48xf32>
    %374 = arith.addf %370, %373 : vector<16x48xf32>
    %375 = arith.truncf %365 : vector<8x32xf32> to vector<8x32xbf16>
    %c0_134 = arith.constant 0 : index
    %c0_135 = arith.constant 0 : index
    %c0_136 = arith.constant 0 : index
    %376 = vector.load %arg14[%c0_134, %c0_135, %c0_136] : memref<1x32x64xbf16, #tpu.memory_space<vmem>>, vector<1x32x64xbf16>
    %377 = vector.shape_cast %376 : vector<1x32x64xbf16> to vector<32x64xbf16>
    %cst_137 = arith.constant dense<0.000000e+00> : vector<8x64xf32>
    %378 = tpu.matmul %375, %377, %cst_137 {dimension_numbers = #tpu.dot_dimension_numbers<[1], [0], [0], [1], [0, 0, 1, 1], [], []>} : vector<8x32xbf16>, vector<32x64xbf16>, vector<8x64xf32> -> vector<8x64xf32>
    %c0_138 = arith.constant 0 : index
    %c0_139 = arith.constant 0 : index
    %c0_140 = arith.constant 0 : index
    %379 = vector.load %arg15[%c0_138, %c0_139, %c0_140] : memref<1x1x64xf32, #tpu.memory_space<vmem>>, vector<1x1x64xf32>
    %380 = vector.shape_cast %379 : vector<1x1x64xf32> to vector<1x64xf32>
    %381 = vector.broadcast %380 : vector<1x64xf32> to vector<8x64xf32>
    %382 = arith.addf %378, %381 : vector<8x64xf32>
    %cst_141 = arith.constant 5.000000e-01 : f32
    %383 = vector.broadcast %cst_141 : f32 to vector<8x64xf32>
    %384 = arith.mulf %383, %382 : vector<8x64xf32>
    %cst_142 = arith.constant 2.000000e+00 : f32
    %385 = math.sqrt %cst_142 : f32
    %cst_143 = arith.constant 1.000000e+00 : f32
    %386 = arith.divf %cst_143, %385 : f32
    %387 = vector.broadcast %386 : f32 to vector<8x64xf32>
    %388 = arith.mulf %382, %387 : vector<8x64xf32>
    %389 = math.erf %388 : vector<8x64xf32>
    %cst_144 = arith.constant 1.000000e+00 : f32
    %390 = vector.broadcast %cst_144 : f32 to vector<8x64xf32>
    %391 = arith.addf %390, %389 : vector<8x64xf32>
    %392 = arith.mulf %384, %391 : vector<8x64xf32>
    %393 = arith.truncf %392 : vector<8x64xf32> to vector<8x64xbf16>
    %c0_145 = arith.constant 0 : index
    %c0_146 = arith.constant 0 : index
    %c0_147 = arith.constant 0 : index
    %394 = vector.load %arg16[%c0_145, %c0_146, %c0_147] : memref<1x64x32xbf16, #tpu.memory_space<vmem>>, vector<1x64x32xbf16>
    %395 = vector.shape_cast %394 : vector<1x64x32xbf16> to vector<64x32xbf16>
    %cst_148 = arith.constant dense<0.000000e+00> : vector<8x32xf32>
    %396 = tpu.matmul %393, %395, %cst_148 {dimension_numbers = #tpu.dot_dimension_numbers<[1], [0], [0], [1], [0, 0, 1, 1], [], []>} : vector<8x64xbf16>, vector<64x32xbf16>, vector<8x32xf32> -> vector<8x32xf32>
    %c0_149 = arith.constant 0 : index
    %c0_150 = arith.constant 0 : index
    %c0_151 = arith.constant 0 : index
    %397 = vector.load %arg17[%c0_149, %c0_150, %c0_151] : memref<1x1x32xf32, #tpu.memory_space<vmem>>, vector<1x1x32xf32>
    %398 = vector.shape_cast %397 : vector<1x1x32xf32> to vector<1x32xf32>
    %399 = vector.broadcast %398 : vector<1x32xf32> to vector<8x32xf32>
    %400 = arith.addf %396, %399 : vector<8x32xf32>
    %401 = arith.addf %400, %365 : vector<8x32xf32>
    %402 = arith.truncf %374 : vector<16x48xf32> to vector<16x48xbf16>
    %c0_152 = arith.constant 0 : index
    %c0_153 = arith.constant 0 : index
    %c0_154 = arith.constant 0 : index
    %403 = vector.load %arg18[%c0_152, %c0_153, %c0_154] : memref<1x48x64xbf16, #tpu.memory_space<vmem>>, vector<1x48x64xbf16>
    %404 = vector.shape_cast %403 : vector<1x48x64xbf16> to vector<48x64xbf16>
    %cst_155 = arith.constant dense<0.000000e+00> : vector<16x64xf32>
    %405 = tpu.matmul %402, %404, %cst_155 {dimension_numbers = #tpu.dot_dimension_numbers<[1], [0], [0], [1], [0, 0, 1, 1], [], []>} : vector<16x48xbf16>, vector<48x64xbf16>, vector<16x64xf32> -> vector<16x64xf32>
    %c0_156 = arith.constant 0 : index
    %c0_157 = arith.constant 0 : index
    %c0_158 = arith.constant 0 : index
    %406 = vector.load %arg19[%c0_156, %c0_157, %c0_158] : memref<1x1x64xf32, #tpu.memory_space<vmem>>, vector<1x1x64xf32>
    %407 = vector.shape_cast %406 : vector<1x1x64xf32> to vector<1x64xf32>
    %408 = vector.broadcast %407 : vector<1x64xf32> to vector<16x64xf32>
    %409 = arith.addf %405, %408 : vector<16x64xf32>
    %cst_159 = arith.constant 5.000000e-01 : f32
    %410 = vector.broadcast %cst_159 : f32 to vector<16x64xf32>
    %411 = arith.mulf %410, %409 : vector<16x64xf32>
    %cst_160 = arith.constant 2.000000e+00 : f32
    %412 = math.sqrt %cst_160 : f32
    %cst_161 = arith.constant 1.000000e+00 : f32
    %413 = arith.divf %cst_161, %412 : f32
    %414 = vector.broadcast %413 : f32 to vector<16x64xf32>
    %415 = arith.mulf %409, %414 : vector<16x64xf32>
    %416 = math.erf %415 : vector<16x64xf32>
    %cst_162 = arith.constant 1.000000e+00 : f32
    %417 = vector.broadcast %cst_162 : f32 to vector<16x64xf32>
    %418 = arith.addf %417, %416 : vector<16x64xf32>
    %419 = arith.mulf %411, %418 : vector<16x64xf32>
    %420 = arith.truncf %419 : vector<16x64xf32> to vector<16x64xbf16>
    %c0_163 = arith.constant 0 : index
    %c0_164 = arith.constant 0 : index
    %c0_165 = arith.constant 0 : index
    %421 = vector.load %arg20[%c0_163, %c0_164, %c0_165] : memref<1x64x48xbf16, #tpu.memory_space<vmem>>, vector<1x64x48xbf16>
    %422 = vector.shape_cast %421 : vector<1x64x48xbf16> to vector<64x48xbf16>
    %cst_166 = arith.constant dense<0.000000e+00> : vector<16x48xf32>
    %423 = tpu.matmul %420, %422, %cst_166 {dimension_numbers = #tpu.dot_dimension_numbers<[1], [0], [0], [1], [0, 0, 1, 1], [], []>} : vector<16x64xbf16>, vector<64x48xbf16>, vector<16x48xf32> -> vector<16x48xf32>
    %c0_167 = arith.constant 0 : index
    %c0_168 = arith.constant 0 : index
    %c0_169 = arith.constant 0 : index
    %424 = vector.load %arg21[%c0_167, %c0_168, %c0_169] : memref<1x1x48xf32, #tpu.memory_space<vmem>>, vector<1x1x48xf32>
    %425 = vector.shape_cast %424 : vector<1x1x48xf32> to vector<1x48xf32>
    %426 = vector.broadcast %425 : vector<1x48xf32> to vector<16x48xf32>
    %427 = arith.addf %423, %426 : vector<16x48xf32>
    %428 = arith.addf %427, %374 : vector<16x48xf32>
    %429 = vector.shape_cast %401 : vector<8x32xf32> to vector<1x8x32xf32>
    %c0_170 = arith.constant 0 : index
    %c0_171 = arith.constant 0 : index
    %c0_172 = arith.constant 0 : index
    %430 = vector.load %arg24[%c0_170, %c0_171, %c0_172] : memref<1x8x32xf32, #tpu.memory_space<vmem>>, vector<1x8x32xf32>
    tpu.vector_store %arg24[%c0_170, %c0_171, %c0_172], %429 {strides = array<i32>} : memref<1x8x32xf32, #tpu.memory_space<vmem>>, vector<1x8x32xf32>,
    %431 = vector.shape_cast %428 : vector<16x48xf32> to vector<1x16x48xf32>
    %c0_173 = arith.constant 0 : index
    %c0_174 = arith.constant 0 : index
    %c0_175 = arith.constant 0 : index
    %432 = vector.load %arg25[%c0_173, %c0_174, %c0_175] : memref<1x16x48xf32, #tpu.memory_space<vmem>>, vector<1x16x48xf32>
    tpu.vector_store %arg25[%c0_173, %c0_174, %c0_175], %431 {strides = array<i32>} : memref<1x16x48xf32, #tpu.memory_space<vmem>>, vector<1x16x48xf32>,
    %c1_i32 = arith.constant 1 : i32
    %433 = arith.cmpi eq, %arg1, %c1_i32 : i32
    %434 = arith.extui %433 : i1 to i32
    %c0_i32_176 = arith.constant 0 : i32
    %435 = arith.cmpi ne, %434, %c0_i32_176 : i32
    scf.if %435 {
      %c0_177 = arith.constant 0 : index
      %c0_178 = arith.constant 0 : index
      %c0_179 = arith.constant 0 : index
      %436 = vector.load %arg24[%c0_177, %c0_178, %c0_179] : memref<1x8x32xf32, #tpu.memory_space<vmem>>, vector<1x8x32xf32>
      %c0_180 = arith.constant 0 : index
      %c0_181 = arith.constant 0 : index
      %c0_182 = arith.constant 0 : index
      %437 = vector.load %arg22[%c0_180, %c0_181, %c0_182] : memref<1x8x32xf32, #tpu.memory_space<vmem>>, vector<1x8x32xf32>
      tpu.vector_store %arg22[%c0_180, %c0_181, %c0_182], %436 {strides = array<i32>} : memref<1x8x32xf32, #tpu.memory_space<vmem>>, vector<1x8x32xf32>,
      %c0_183 = arith.constant 0 : index
      %c0_184 = arith.constant 0 : index
      %c0_185 = arith.constant 0 : index
      %438 = vector.load %arg25[%c0_183, %c0_184, %c0_185] : memref<1x16x48xf32, #tpu.memory_space<vmem>>, vector<1x16x48xf32>
      %c0_186 = arith.constant 0 : index
      %c0_187 = arith.constant 0 : index
      %c0_188 = arith.constant 0 : index
      %439 = vector.load %arg23[%c0_186, %c0_187, %c0_188] : memref<1x16x48xf32, #tpu.memory_space<vmem>>, vector<1x16x48xf32>
      tpu.vector_store %arg23[%c0_186, %c0_187, %c0_188], %438 {strides = array<i32>} : memref<1x16x48xf32, #tpu.memory_space<vmem>>, vector<1x16x48xf32>,
    } else {
    }
    return
  }
  func.func @transform_0(%arg0: i32, %arg1: i32) -> (i32, i32, i32) {
    %c0_i32 = arith.constant 0 : i32
    %c0_i32_0 = arith.constant 0 : i32
    %c0_i32_1 = arith.constant 0 : i32
    return %arg0, %c0_i32, %c0_i32_0 : i32, i32, i32
  }
  func.func @transform_1(%arg0: i32, %arg1: i32) -> (i32, i32, i32) {
    %c0_i32 = arith.constant 0 : i32
    %c0_i32_0 = arith.constant 0 : i32
    %c0_i32_1 = arith.constant 0 : i32
    return %arg0, %c0_i32, %c0_i32_0 : i32, i32, i32
  }
  func.func @transform_2(%arg0: i32, %arg1: i32) -> (i32, i32, i32) {
    %c0_i32 = arith.constant 0 : i32
    %c0_i32_0 = arith.constant 0 : i32
    %c0_i32_1 = arith.constant 0 : i32
    return %arg1, %c0_i32, %c0_i32_0 : i32, i32, i32
  }
  func.func @transform_3(%arg0: i32, %arg1: i32) -> (i32, i32, i32) {
    %c0_i32 = arith.constant 0 : i32
    %c0_i32_0 = arith.constant 0 : i32
    %c0_i32_1 = arith.constant 0 : i32
    return %arg1, %c0_i32, %c0_i32_0 : i32, i32, i32
  }
  func.func @transform_4(%arg0: i32, %arg1: i32) -> (i32, i32, i32) {
    %c0_i32 = arith.constant 0 : i32
    %c0_i32_0 = arith.constant 0 : i32
    %c0_i32_1 = arith.constant 0 : i32
    return %arg1, %c0_i32, %c0_i32_0 : i32, i32, i32
  }
  func.func @transform_5(%arg0: i32, %arg1: i32) -> (i32, i32, i32) {
    %c0_i32 = arith.constant 0 : i32
    %c0_i32_0 = arith.constant 0 : i32
    %c0_i32_1 = arith.constant 0 : i32
    return %arg1, %c0_i32, %c0_i32_0 : i32, i32, i32
  }
  func.func @transform_6(%arg0: i32, %arg1: i32) -> (i32, i32, i32) {
    %c0_i32 = arith.constant 0 : i32
    %c0_i32_0 = arith.constant 0 : i32
    %c0_i32_1 = arith.constant 0 : i32
    return %arg1, %c0_i32, %c0_i32_0 : i32, i32, i32
  }
  func.func @transform_7(%arg0: i32, %arg1: i32) -> (i32, i32, i32) {
    %c0_i32 = arith.constant 0 : i32
    %c0_i32_0 = arith.constant 0 : i32
    %c0_i32_1 = arith.constant 0 : i32
    return %arg1, %c0_i32, %c0_i32_0 : i32, i32, i32
  }
  func.func @transform_8(%arg0: i32, %arg1: i32) -> (i32, i32, i32) {
    %c0_i32 = arith.constant 0 : i32
    %c0_i32_0 = arith.constant 0 : i32
    %c0_i32_1 = arith.constant 0 : i32
    return %arg1, %c0_i32, %c0_i32_0 : i32, i32, i32
  }
  func.func @transform_9(%arg0: i32, %arg1: i32) -> (i32, i32, i32) {
    %c0_i32 = arith.constant 0 : i32
    %c0_i32_0 = arith.constant 0 : i32
    %c0_i32_1 = arith.constant 0 : i32
    return %arg1, %c0_i32, %c0_i32_0 : i32, i32, i32
  }
  func.func @transform_10(%arg0: i32, %arg1: i32) -> (i32, i32, i32) {
    %c0_i32 = arith.constant 0 : i32
    %c0_i32_0 = arith.constant 0 : i32
    %c0_i32_1 = arith.constant 0 : i32
    return %arg1, %c0_i32, %c0_i32_0 : i32, i32, i32
  }
  func.func @transform_11(%arg0: i32, %arg1: i32) -> (i32, i32, i32) {
    %c0_i32 = arith.constant 0 : i32
    %c0_i32_0 = arith.constant 0 : i32
    %c0_i32_1 = arith.constant 0 : i32
    return %arg1, %c0_i32, %c0_i32_0 : i32, i32, i32
  }
  func.func @transform_12(%arg0: i32, %arg1: i32) -> (i32, i32, i32) {
    %c0_i32 = arith.constant 0 : i32
    %c0_i32_0 = arith.constant 0 : i32
    %c0_i32_1 = arith.constant 0 : i32
    return %arg1, %c0_i32, %c0_i32_0 : i32, i32, i32
  }
  func.func @transform_13(%arg0: i32, %arg1: i32) -> (i32, i32, i32) {
    %c0_i32 = arith.constant 0 : i32
    %c0_i32_0 = arith.constant 0 : i32
    %c0_i32_1 = arith.constant 0 : i32
    return %arg1, %c0_i32, %c0_i32_0 : i32, i32, i32
  }
  func.func @transform_14(%arg0: i32, %arg1: i32) -> (i32, i32, i32) {
    %c0_i32 = arith.constant 0 : i32
    %c0_i32_0 = arith.constant 0 : i32
    %c0_i32_1 = arith.constant 0 : i32
    return %arg1, %c0_i32, %c0_i32_0 : i32, i32, i32
  }
  func.func @transform_15(%arg0: i32, %arg1: i32) -> (i32, i32, i32) {
    %c0_i32 = arith.constant 0 : i32
    %c0_i32_0 = arith.constant 0 : i32
    %c0_i32_1 = arith.constant 0 : i32
    return %arg1, %c0_i32, %c0_i32_0 : i32, i32, i32
  }
  func.func @transform_16(%arg0: i32, %arg1: i32) -> (i32, i32, i32) {
    %c0_i32 = arith.constant 0 : i32
    %c0_i32_0 = arith.constant 0 : i32
    %c0_i32_1 = arith.constant 0 : i32
    return %arg1, %c0_i32, %c0_i32_0 : i32, i32, i32
  }
  func.func @transform_17(%arg0: i32, %arg1: i32) -> (i32, i32, i32) {
    %c0_i32 = arith.constant 0 : i32
    %c0_i32_0 = arith.constant 0 : i32
    %c0_i32_1 = arith.constant 0 : i32
    return %arg1, %c0_i32, %c0_i32_0 : i32, i32, i32
  }
  func.func @transform_18(%arg0: i32, %arg1: i32) -> (i32, i32, i32) {
    %c0_i32 = arith.constant 0 : i32
    %c0_i32_0 = arith.constant 0 : i32
    %c0_i32_1 = arith.constant 0 : i32
    return %arg1, %c0_i32, %c0_i32_0 : i32, i32, i32
  }
  func.func @transform_19(%arg0: i32, %arg1: i32) -> (i32, i32, i32) {
    %c0_i32 = arith.constant 0 : i32
    %c0_i32_0 = arith.constant 0 : i32
    %c0_i32_1 = arith.constant 0 : i32
    return %arg1, %c0_i32, %c0_i32_0 : i32, i32, i32
  }
  func.func @transform_20(%arg0: i32, %arg1: i32) -> (i32, i32, i32) {
    %c0_i32 = arith.constant 0 : i32
    %c0_i32_0 = arith.constant 0 : i32
    %c0_i32_1 = arith.constant 0 : i32
    return %arg0, %c0_i32, %c0_i32_0 : i32, i32, i32
  }
  func.func @transform_21(%arg0: i32, %arg1: i32) -> (i32, i32, i32) {
    %c0_i32 = arith.constant 0 : i32
    %c0_i32_0 = arith.constant 0 : i32
    %c0_i32_1 = arith.constant 0 : i32
    return %arg0, %c0_i32, %c0_i32_0 : i32, i32, i32
  }
}

</mosaic_0001>

<bundles_post_ra>
// kernel: tpu_custom_call.1
= control target key start
LH: loop header
LB: loop body
LE: loop exit
PB: predicated region body
PF: predicated region fallthrough
CT: control target
= control target key end

     0   :  { %s6536_s0 = inlined_call_operand.vmem [shape: f32[2,8,32], index: 0, kind: input, shape index: {}]   ;;  %s6537_s1 = inlined_call_operand.vmem [shape: f32[2,16,48], index: 1, kind: input, shape index: {}]   ;;  %s6538_s2 = inlined_call_operand.vmem [shape: f32[2,1,32], index: 2, kind: input, shape index: {}]   ;;  %s6539_s3 = inlined_call_operand.vmem [shape: f32[2,1,32], index: 3, kind: input, shape index: {}]   ;;  %s6540_s4 = inlined_call_operand.vmem [shape: f32[2,1,48], index: 4, kind: input, shape index: {}]   ;;  %s6541_s5 = inlined_call_operand.vmem [shape: f32[2,1,48], index: 5, kind: input, shape index: {}]   ;;  %s6542_s6 = inlined_call_operand.vmem [shape: bf16[2,32,1024], index: 6, kind: input, shape index: {}]   ;;  %s6543_s7 = inlined_call_operand.vmem [shape: bf16[2,48,1024], index: 7, kind: input, shape index: {}]   ;;  %s6544_s8 = inlined_call_operand.vmem [shape: bf16[2,512,32], index: 8, kind: input, shape index: {}]   ;;  %s6545_s9 = inlined_call_operand.vmem [shape: f32[2,1,32], index: 9, kind: input, shape index: {}]   ;;  %s6546_s10 = inlined_call_operand.vmem [shape: bf16[2,512,48], index: 10, kind: input, shape index: {}]   ;;  %s6547_s11 = inlined_call_operand.vmem [shape: f32[2,1,48], index: 11, kind: input, shape index: {}]   ;;  %s6548_s12 = inlined_call_operand.vmem [shape: bf16[2,32,64], index: 12, kind: input, shape index: {}]   ;;  %s6549_s13 = inlined_call_operand.vmem [shape: f32[2,1,64], index: 13, kind: input, shape index: {}]   ;;  %s6550_s14 = inlined_call_operand.vmem [shape: bf16[2,64,32], index: 14, kind: input, shape index: {}]   ;;  %s6551_s15 = inlined_call_operand.vmem [shape: f32[2,1,32], index: 15, kind: input, shape index: {}]   ;;  %s6552_s16 = inlined_call_operand.vmem [shape: bf16[2,48,64], index: 16, kind: input, shape index: {}]   ;;  %s6553_s17 = inlined_call_operand.vmem [shape: f32[2,1,64], index: 17, kind: input, shape index: {}]   ;;  %s6554_s18 = inlined_call_operand.vmem [shape: bf16[2,64,48], index: 18, kind: input, shape index: {}]   ;;  %s6555_s19 = inlined_call_operand.vmem [shape: f32[2,1,48], index: 19, kind: input, shape index: {}]   ;;  %s6556_s20 = inlined_call_operand.hbm [shape: f32[2,8,32], index: 20, kind: output, shape index: {0}]   ;;  %s6557_s21 = inlined_call_operand.hbm [shape: f32[2,16,48], index: 21, kind: output, shape index: {1}]  }
   0x1   :  { %6575 = sst [smem:[#allocation27_spill]] %s6536_s0 }
   0x2   :  { %6576 = sst [smem:[#allocation28_spill]] %s6537_s1 }
   0x3   :  { %6577 = sst [smem:[#allocation29_spill]] %s6538_s2 }
   0x4   :  { %6578 = sst [smem:[#allocation30_spill]] %s6539_s3 }
   0x5   :  { %6579 = sst [smem:[#allocation31_spill]] %s6540_s4 }
   0x6   :  { %6580 = sst [smem:[#allocation32_spill]] %s6541_s5 }
   0x7   :  { %6581 = sst [smem:[#allocation33_spill]] %s6542_s6 }
   0x8   :  { %6582 = sst [smem:[#allocation34_spill]] %s6543_s7 }
   0x9   :  { %6583 = sst [smem:[#allocation35_spill]] %s6544_s8 }
   0xa   :  { %6584 = sst [smem:[#allocation36_spill]] %s6546_s10 }
   0xb   :  { %6585 = sst [smem:[#allocation37_spill]] %s6548_s12 }
   0xc   :  { %6586 = sst [smem:[#allocation38_spill]] %s6549_s13 }
   0xd   :  { %6587 = sst [smem:[#allocation39_spill]] %s6550_s14 }
   0xe   :  { %6588 = sst [smem:[#allocation40_spill]] %s6551_s15 }
   0xf   :  { %6589 = sst [smem:[#allocation41_spill]] %s6552_s16 }
  0x10   :  { %6590 = sst [smem:[#allocation42_spill]] %s6555_s19 }
  0x11   :  { %6591 = sst [smem:[#allocation43_spill]] %s6556_s20 }
  0x12   :  { %6592 = sst [smem:[#allocation44_spill]] %s6557_s21 }
  0x13   :  { %27 = vsyncpa [#allocation7], 0 }
  0x14   :  { %29 = vsyncpa [#allocation7 + $0x1], 0 }
  0x15   :  { %30 = vsyncpa [#allocation9], 0 }
  0x16   :  { %32 = vsyncpa [#allocation9 + $0x1], 0  ;;  %s5670_s2 = smov 0   ;;  %s5672_s25 = smov 0  }
  0x17   :  { %s5674_s26 = smov 0   ;;  %s5676_s27 = smov 0  }
  0x18   :  { %s5678_s3 = smov 0   ;;  %s5680_s28 = smov 0  }
  0x19   :  { %s5682_s29 = smov 0   ;;  %s5684_s0 = smov 0  }
  0x1a LB: > { %6593 = sst [smem:[#allocation12_spill]] %s5522_s2  ;;  %s4641_s4 = sadd.s32 4294967295, %s5550_s0   ;;  %s5550_s0 = sphi %s5684_s0, %s38_s0   ;;  %s5546_s29 = sphi %s5682_s29, %s6660_s29   ;;  %s5542_s28 = sphi %s5680_s28, %s6659_s28   ;;  %s5538_s3 = sphi %s5678_s3, %s6658_s3   ;;  %s5534_s27 = sphi %s5676_s27, %s6657_s27   ;;  %s5530_s26 = sphi %s5674_s26, %s6656_s26   ;;  %s5526_s25 = sphi %s5672_s25, %s6655_s25   ;;  %s5522_s2 = sphi %s5670_s2, %s6654_s2  }
  0x1b   : > { %6594 = sst [smem:[#allocation13_spill]] %s5526_s25  ;;  %s4642_s30 = sadd.s32 4294967294, %s5550_s0  }
  0x1c   : > { %6595 = sst [smem:[#allocation14_spill]] %s5530_s26  ;;  %s47_s5 = sadd.s32 1, %s5542_s28 }
  0x1d   : > { %6596 = sst [smem:[#allocation15_spill]] %s5534_s27  ;;  %p48_p0 = scmp.ge.s32.totalorder %s47_s5, 2 }
  0x1e   : > { %6597 = sst [smem:[#allocation16_spill]] %s5538_s3  ;;  %s50_s22 = sadd.s32 1, %s5546_s29 }
  0x1f   : > { %6598 = sst [smem:[#allocation17_spill]] %s5542_s28  ;;  %p587_p1 = scmp.ne.s32.totalorder %s5530_s26, %s5526_s25 }
  0x20   : > { %6599 = sst [smem:[#allocation18_spill]] %s5546_s29  ;;  %p588_p2 = scmp.eq.s32.totalorder %s4641_s4, 3 }
  0x21   : > { %6600 = sst [smem:[#allocation19_spill]] %s5550_s0  ;;  %s6662_s5 = smov (%p48_p0, %s47_s5), 0 }
  0x22   : > { %6601 = sst [smem:[#allocation20_spill]] %s6662_s5  ;;  %s6664_s22 = smov (!%p48_p0, %s50_s22), %s5546_s29 }
  0x23   : > { %p5719_p3 = por %p588_p2, %p587_p1  ;;  %p593_p4 = scmp.ne.s32.totalorder %s5526_s25, %s5522_s2 }
  0x24   : > { %p52_p5 = scmp.ge.s32.totalorder %s6664_s22, 2  ;;  %p594_p6 = scmp.eq.s32.totalorder %s4642_s30, 3 }
  0x25   : > { %s6602_s23 = scalar_select %p5719_p3, 1, 0 }
  0x26   : > { %p4645_p7 = scmp.ge.s32.totalorder %s5550_s0, 1  ;;  %p777_p8 = scmp.lt.s32.totalorder %s5550_s0, 5 }
  0x27   : > { %6603 = sst [smem:[#allocation21_spill]] %s6602_s23  ;;  %s6666_s22 = smov (%p52_p5, %s6664_s22), 0 }
  0x28   : > { %6604 = sst [smem:[#allocation22_spill]] %s6666_s22  ;;  %p5729_p9 = por %p594_p6, %p593_p4 }
  0x29   : > { %p778_p10 = pnand %p4645_p7, %p777_p8  ;;  %s574_s24 = ssub.s32 %s5546_s29, %s6666_s22 }
  0x2a   : > { %s6605_s1 = scalar_select %p5729_p9, 1, 0 }
  0x2b   : > { %s577_s4 = sadd.s32 1, %s5530_s26  ;;  %p575_p11 = scmp.eq.s32.totalorder %s574_s24, 0 }
  0x2c   : > { %6606 = sst [smem:[#allocation23_spill]] %s6605_s1  ;;  %781 = sbr.rel (%p778_p10) target bundleno = 6147 (0x1803), region = 100 }
  0x2d   : > { %s5737_s5 = scalar_select %p575_p11, %s5530_s26, %s577_s4  }
  0x2f   : > { %6607 = sst [smem:[#allocation24_spill]] %s5737_s5 }
  0x33   : > { %s5740_s30 = sand.u32 1, %s5526_s25   ;;  %p916_p12 = scmp.lt.s32.totalorder %s5538_s3, 1 }
  0x34   : > { %p925_p13 = scmp.lt.s32.totalorder %s5534_s27, 1  ;;  %s6608_s5 = sld [smem:[#allocation27_spill]] }
  0x35   : > { %s917_s1 = scalar_select %p916_p12, %s5538_s3, 1 }
  0x36   : > { %s6610_s20 = sld [smem:[#allocation28_spill]]  ;;  %s6616_s6 = sld [smem:[#allocation33_spill]] }
  0x37   : > { %s4648_s22 = sshll.u32 %s917_s1, 3  ;;  %s4845_s29 = sshll.u32 %s917_s1, 4 }
  0x38   : > { %s5758_s25 = scalar_select %p925_p13, %s5534_s27, 1 }
  0x39   : > { %s6617_s7 = sld [smem:[#allocation34_spill]]  ;;  %s6618_s8 = sld [smem:[#allocation35_spill]] }
  0x3a   : > { %s5750_s26 = scalar_lea.vmem %s6608_s5, %s4648_s22  ;;  %s5196_s27 = smul.u32 192, %s5758_s25 }
  0x3b   : > { %6609 = sst [smem:[#allocation25_spill]] %s5750_s26  ;;  %s4846_s26 = sshll.u32 %s5758_s25, 7 }
  0x3c   : > { %s5755_s23 = scalar_lea.vmem %s6610_s20, %s4845_s29  ;;  %s5781_s5 = scalar_lea.vmem %s6616_s6, %s4846_s26 }
  0x3d   : > { %6611 = sst [smem:[#allocation26_spill]] %s5755_s23  ;;  %s4847_s21 = sshll.u32 %s5758_s25, 8 }
  0x3e   : > { %s6619_s10 = sld [smem:[#allocation36_spill]]  ;;  %s4849_s19 = sshll.u32 %s5758_s25, 4 }
  0x3f   : > { %s5787_s22 = scalar_lea.vmem %s6617_s7, %s5196_s27  ;;  %s5792_s3 = scalar_lea.vmem %s6618_s8, %s4847_s21 }
  0x40   : > { %s6620_s12 = sld [smem:[#allocation37_spill]]  ;;  %s4850_s4 = sshll.u32 %s5758_s25, 5 }
  0x41   : > { %s6623_s14 = sld [smem:[#allocation39_spill]]  ;;  %s5197_s29 = smul.u32 24, %s5758_s25 }
  0x42   : > { %s986_s0 = scalar_lea.vmem %s6553_s17, %s5758_s25  ;;  %s5835_s6 = scalar_lea.vmem %s6554_s18, %s4850_s4 }
  0x43   : > { %s6625_s26 = sld [smem:[#allocation42_spill]]  ;;  %s6627_s13 = sshll.u32 %s5740_s30, 4 }
  0x44   : > { %s5801_s23 = scalar_lea.vmem %s6619_s10, %s4847_s21  ;;  %s5852_s10 = scalar_lea.vmem [#allocation8], %s6627_s13 }
  0x45   : > { %s6628_s27 = sld [smem:[#allocation15_spill]] }
  0x46   : > { %s5811_s24 = scalar_lea.vmem %s6620_s12, %s4849_s19  ;;  %s6624_s12 = sld [smem:[#allocation41_spill]] }
  0x47   : > { %s5825_s20 = scalar_lea.vmem %s6623_s14, %s4850_s4  ;;  %s6626_s14 = sshll.u32 %s5740_s30, 3 }
  0x48   : > { %s5848_s15 = scalar_lea.vmem [#allocation6], %s6626_s14 }
  0x49   : > { %s994_s2 = scalar_lea.vmem %s6625_s26, %s5758_s25 }
  0x4b   : > { %p4665_p0 = scmp.ne.s32.totalorder %s6628_s27, 0 }
  0x4c   : > { %s5840_s8 = scalar_lea.vmem %s6624_s12, %s5197_s29  ;;  %s6629_s4 = sld [smem:[#allocation25_spill]] (!%p4665_p0)  ;;  %vm1001_vm0 = vcmask (!%p4665_p0), 261120   ;;  %vm1005_vm1 = vcmask (!%p4665_p0), 392192  }
  0x4d   : > { %999 = sbr.rel (%p4665_p0) target bundleno = 85 (0x55), region = 104  ;;  %s6630_s19 = sld [smem:[#allocation26_spill]] (!%p4665_p0) }
  0x52   : > { %v1000_v0 = vld [vmem:[%s6629_s4] sm:$0xff] (!%p4665_p0) }
  0x53   : > { %v1003_v1 = vld [vmem:[%s6630_s19] sm:$0xff] (!%p4665_p0)  ;;  %v1004_v2 = vld [vmem:[%s6630_s19 + $0x8] sm:$0xff] (!%p4665_p0)  ;;  %1002 = vst.msk [vmem:[#allocation2] sm:$0xff] (!%p4665_p0), %vm1001_vm0, %v1000_v0 }
  0x54   : > { %1006 = vst.msk [vmem:[#allocation3] sm:$0xff] %vm1005_vm1, %v1003_v1  ;;  %1007 = vst.msk [vmem:[#allocation3 + $0x8] sm:$0xff] %vm1005_vm1, %v1004_v2 }
  0x55 PF: > { %vm1013_vm2 = vcmask 261120   ;;  %vm1045_vm3 = vcmask 392192   ;;  %v1090_v24 = vld [vmem:[%s5781_s5] sm:$0xff]  ;;  %v1093_v26 = vld [vmem:[%s5781_s5 + $0x18] sm:$0xff]  ;;  %v1091_v40 = vld [vmem:[%s5781_s5 + $0x8] sm:$0xff]  ;;  %v5552_v48 = vmov 0  }
  0x56   : > { %v1094_v25 = vld [vmem:[%s5781_s5 + $0x20] sm:$0xff]  ;;  %v1097_v28 = vld [vmem:[%s5781_s5 + $0x38] sm:$0xff]  ;;  %v1095_v41 = vld [vmem:[%s5781_s5 + $0x28] sm:$0xff]  ;;  %1221 = vmatprep.mubr.bf16.mxu0 %v5552_v48  ;;  %1344 = vmatprep.mubr.bf16.mxu1 %v5552_v48  ;;  %s6631_s14 = sld [smem:[#allocation29_spill]]  ;;  %s6633_s1 = sld [smem:[#allocation30_spill]]  ;;  %vm5554_vm4 = vmmov 0  }
  0x57   : > { %v4671_v27 = vcombine.high %v1090_v24, %v1094_v25  ;;  %v4677_v29 = vcombine.high %v1093_v26, %v1097_v28  ;;  %v4670_v30 = vcombine.low %v1090_v24, %v1094_v25  ;;  %v4676_v31 = vcombine.low %v1093_v26, %v1097_v28  ;;  %v1098_v32 = vld [vmem:[%s5781_s5 + $0x40] sm:$0xff]  ;;  %v1101_v34 = vld [vmem:[%s5781_s5 + $0x58] sm:$0xff]  ;;  %v1362_v42 = vld [vmem:[%s5787_s22 + $0x8] sm:$0xff]  ;;  %s6635_s27 = sld [smem:[#allocation31_spill]]  ;;  %s6637_s13 = sld [smem:[#allocation32_spill]] }
  0x58   : > { %v1102_v33 = vld [vmem:[%s5781_s5 + $0x60] sm:$0xff]  ;;  %v1105_v36 = vld [vmem:[%s5781_s5 + $0x78] sm:$0xff]  ;;  %v4673_v43 = vcombine.high %v1091_v40, %v1095_v41  ;;  %v1366_v44 = vld [vmem:[%s5787_s22 + $0x28] sm:$0xff]  ;;  %v4672_v45 = vcombine.low %v1091_v40, %v1095_v41  ;;  %vm1688_vm5 = vcmask 523264   ;;  %vm1826_vm6 = vcmask 1043456   ;;  %s6643_s26 = sld [smem:[#allocation40_spill]] }
  0x59   : > { %1189 = vmatprep.subr.bf16.mxu0 %v4671_v27  ;;  %1312 = vmatprep.subr.bf16.mxu1 %v4677_v29  ;;  %v4679_v35 = vcombine.high %v1098_v32, %v1102_v33  ;;  %v4685_v37 = vcombine.high %v1101_v34, %v1105_v36  ;;  %v4678_v38 = vcombine.low %v1098_v32, %v1102_v33  ;;  %v1099_v63 = vld [vmem:[%s5781_s5 + $0x48] sm:$0xff]  ;;  %v1364_v25 = vld [vmem:[%s5787_s22 + $0x18] sm:$0xff]  ;;  %v1361_v33 = vld [vmem:[%s5787_s22] sm:$0xff]  ;;  %vm1735_vm7 = vcmask 130048  }
  0x5a   : > { %1190 = vmatpush1.bf16.msra.mxu0 %v4670_v30  ;;  %1313 = vmatpush1.bf16.msra.mxu1 %v4676_v31  ;;  %v4684_v39 = vcombine.low %v1101_v34, %v1105_v36  ;;  %v4692_v46 = vcombine.low %v1362_v42, %v1366_v44  ;;  %v4693_v47 = vcombine.high %v1362_v42, %v1366_v44  ;;  %v1103_v0 = vld [vmem:[%s5781_s5 + $0x68] sm:$0xff]  ;;  %v1368_v26 = vld [vmem:[%s5787_s22 + $0x38] sm:$0xff]  ;;  %v1365_v34 = vld [vmem:[%s5787_s22 + $0x20] sm:$0xff]  ;;  %vm1872_vm8 = vcmask 519168  }
  0x5b   : > { %v1008_v3 = vld [vmem:[#allocation2] sm:$0xff]  ;;  %v1010_v4 = vld [vmem:[#allocation3 + $0x8] sm:$0xff]  ;;  %v1009_v5 = vld [vmem:[#allocation3] sm:$0xff]  ;;  %1191 = vmatprep.subr.bf16.mxu0 %v4679_v35  ;;  %1314 = vmatprep.subr.bf16.mxu1 %v4685_v37  ;;  %v4697_v32 = vcombine.high %v1364_v25, %v1368_v26  ;;  %v4691_v40 = vcombine.high %v1361_v33, %v1365_v34  ;;  %vm1822_vm9 = vcmask 64512   ;;  %vm2075_vm10 = vcmask 1043968  }
  0x5c   : > { %v1014_v6 = vsel %vm1013_vm2, %v1008_v3, 0.0  ;;  %v1049_v7 = vsel %vm1045_vm3, %v1010_v4, 0.0  ;;  %v1046_v8 = vsel %vm1045_vm3, %v1009_v5, 0.0  ;;  %s6632_s28 = scalar_lea.vmem %s6631_s14, %s5758_s25  ;;  %s6634_s7 = scalar_lea.vmem %s6633_s1, %s5758_s25  ;;  %v1370_v2 = vld [vmem:[%s5787_s22 + $0x48] sm:$0xff]  ;;  %v1372_v35 = vld [vmem:[%s5787_s22 + $0x58] sm:$0xff]  ;;  %v1369_v42 = vld [vmem:[%s5787_s22 + $0x40] sm:$0xff] }
  0x5d   : > { %1015 = vadd.xlane.f32.xlu0 %v1014_v6  ;;  %1050 = vadd.xlane.f32.xlu1 %v1049_v7  ;;  %v4666_v59 = vld [vmem:[%s6632_s28] ss:$0 sm:$0xff]  ;;  %v4681_v6 = vcombine.high %v1099_v63, %v1103_v0  ;;  %s6636_s4 = scalar_lea.vmem %s6635_s27, %s5758_s25  ;;  %s6638_s14 = scalar_lea.vmem %s6637_s13, %s5758_s25  ;;  %v1376_v36 = vld [vmem:[%s5787_s22 + $0x78] sm:$0xff]  ;;  %vm2082_vm11 = vcmask 1048064  }
  0x5e   : > { %1192 = vmatpush1.bf16.msra.mxu0 %v4678_v38  ;;  %1315 = vmatpush1.bf16.msra.mxu1 %v4684_v39  ;;  %v4667_v61 = vld [vmem:[%s6634_s7] ss:$0 sm:$0xff]  ;;  %v4696_v38 = vcombine.low %v1364_v25, %v1368_v26  ;;  %v4705_v41 = vcombine.high %v1372_v35, %v1376_v36  ;;  %v1380_v44 = vld [vmem:[%s5787_s22 + $0x98] sm:$0xff]  ;;  %s6640_s28 = scalar_lea.vmem %s6547_s11, %s5758_s25  ;;  %s6641_s1 = sld [smem:[#allocation38_spill]] }
  0x5f   : > { %1230 = vmatprep.subr.bf16.mxu0 %v4673_v43  ;;  %1551 = vmatprep.subr.bf16.mxu1 %v4693_v47  ;;  %v4669_v24 = vld [vmem:[%s6638_s14] ss:$0 sm:$0xff]  ;;  %v4704_v47 = vcombine.low %v1372_v35, %v1376_v36  ;;  %s6644_s27 = scalar_lea.vmem %s6643_s26, %s5758_s25  ;;  %s6646_s13 = sld [smem:[#allocation15_spill]] }
  0x60   : > { %v1373_v43 = vld [vmem:[%s5787_s22 + $0x60] sm:$0xff] }
  0x61   : > { %1047 = vadd.xlane.f32.xlu0 %v1046_v8 }
  0x64   : > { %s6642_s7 = scalar_lea.vmem %s6641_s1, %s5758_s25 }
  0x65   : > { %p4837_p1 = scmp.ne.s32.totalorder %s6646_s13, 1 }
  0xea   : > { %v1016_v9 = vpop.xlane.xlu0 %1015  ;;  %v1051_v10 = vpop.xlane.xlu1 %1050 }
  0xeb   : > { %v1018_v11 = vmul.f32 0.03125, %v1016_v9  ;;  %v1054_v12 = vmul.f32 0.020833334, %v1051_v10 }
  0xed   : > { %v5861_v13 = vsub.f32 %v1008_v3, %v1018_v11  ;;  %v5863_v14 = vsub.f32 %v1010_v4, %v1054_v12  ;;  %v1374_v3 = vld [vmem:[%s5787_s22 + $0x68] sm:$0xff]  ;;  %v1092_v11 = vld [vmem:[%s5781_s5 + $0x10] sm:$0xff] }
  0xee   : > { %v1048_v15 = vpop.xlane.xlu0 %1047  ;;  %v4701_v10 = vcombine.high %v1370_v2, %v1374_v3  ;;  %v1096_v12 = vld [vmem:[%s5781_s5 + $0x30] sm:$0xff] }
  0xef   : > { %v1053_v16 = vmul.f32 0.020833334, %v1048_v15  ;;  %v1020_v17 = vmul.f32 %v5861_v13, %v5861_v13  ;;  %v1058_v18 = vmul.f32 %v5863_v14, %v5863_v14  ;;  %v1378_v15 = vld [vmem:[%s5787_s22 + $0x88] sm:$0xff]  ;;  %v4674_v27 = vcombine.low %v1092_v11, %v1096_v12 }
  0xf1   : > { %v5869_v19 = vsub.f32 %v1009_v5, %v1053_v16  ;;  %v1021_v20 = vsel %vm1013_vm2, %v1020_v17, 0.0  ;;  %v1062_v21 = vsel %vm1045_vm3, %v1058_v18, 0.0  ;;  %v1382_v16 = vld [vmem:[%s5787_s22 + $0xa8] sm:$0xff]  ;;  %v4700_v17 = vcombine.low %v1370_v2, %v1374_v3 }
  0xf2   : > { %1022 = vadd.xlane.f32.xlu1 %v1021_v20  ;;  %v4675_v18 = vcombine.high %v1092_v11, %v1096_v12  ;;  %v4708_v28 = vcombine.low %v1378_v15, %v1382_v16 }
  0xf3   : > { %v1057_v22 = vmul.f32 %v5869_v19, %v5869_v19 }
  0xf5   : > { %v1059_v23 = vsel %vm1045_vm3, %v1057_v22, 0.0  ;;  %v1100_v22 = vld [vmem:[%s5781_s5 + $0x50] sm:$0xff] }
  0xf6   : > { %1063 = vadd.xlane.f32.xlu1 %v1062_v21  ;;  %1060 = vadd.xlane.f32.xlu0 %v1059_v23  ;;  %v4709_v21 = vcombine.high %v1378_v15, %v1382_v16  ;;  %v1104_v23 = vld [vmem:[%s5781_s5 + $0x70] sm:$0xff]  ;;  %s5555_s5 = smov 64  }
  0xf7   : > { %v4683_v29 = vcombine.high %v1100_v22, %v1104_v23  ;;  %v4682_v37 = vcombine.low %v1100_v22, %v1104_v23 }
 0x17f   : > { %v1023_v49 = vpop.xlane.xlu1 %1022 }
 0x180   : > { %v1024_v50 = vmul.f32 0.03125, %v1023_v49  ;;  %v4699_v49 = vcombine.high %v1369_v42, %v1373_v43 }
 0x182   : > { %v1025_v51 = vadd.f32 1e-05, %v1024_v50 }
 0x183   : > { %v1064_v52 = vpop.xlane.xlu1 %1063  ;;  %v1061_v53 = vpop.xlane.xlu0 %1060 }
 0x184   : > { %5361 = vrsqrt.f32 %v1025_v51  ;;  %v1066_v54 = vmul.f32 0.020833334, %v1064_v52  ;;  %v1065_v55 = vmul.f32 0.020833334, %v1061_v53  ;;  %v1377_v51 = vld [vmem:[%s5787_s22 + $0x80] sm:$0xff]  ;;  %v4698_v53 = vcombine.low %v1369_v42, %v1373_v43 }
 0x185   : > { %v1381_v52 = vld [vmem:[%s5787_s22 + $0xa0] sm:$0xff] }
 0x186   : > { %v1068_v56 = vadd.f32 1e-05, %v1066_v54  ;;  %v1067_v57 = vadd.f32 1e-05, %v1065_v55  ;;  %v4707_v55 = vcombine.high %v1377_v51, %v1381_v52 }
 0x188   : > { %5363 = vrsqrt.f32 %v1068_v56  ;;  %v1363_v56 = vld [vmem:[%s5787_s22 + $0x10] sm:$0xff] }
 0x189   : > { %5365 = vrsqrt.f32 %v1067_v57  ;;  %v1367_v57 = vld [vmem:[%s5787_s22 + $0x30] sm:$0xff] }
 0x18e   : > { %v5362_v58 = vpop.eup %5361 }
 0x18f   : > { %v1027_v60 = vmul.f32 %v5362_v58, %v5861_v13  ;;  %v4668_v13 = vld [vmem:[%s6636_s4] ss:$0 sm:$0xff]  ;;  %v4706_v58 = vcombine.low %v1377_v51, %v1381_v52 }
 0x191   : > { %v1034_v62 = vmul.f32 %v4666_v59, %v1027_v60  ;;  %v4695_v59 = vcombine.high %v1363_v56, %v1367_v57  ;;  %v1371_v60 = vld [vmem:[%s5787_s22 + $0x50] sm:$0xff] }
 0x192   : > { %v5364_v1 = vpop.eup %5363 }
 0x193   : > { %v5366_v4 = vpop.eup %5365  ;;  %v1041_v5 = vadd.f32 %v4667_v61, %v1034_v62  ;;  %v1072_v7 = vmul.f32 %v5364_v1, %v5863_v14  ;;  %v4680_v14 = vcombine.low %v1099_v63, %v1103_v0  ;;  %v1375_v61 = vld [vmem:[%s5787_s22 + $0x70] sm:$0xff]  ;;  %v4694_v62 = vcombine.low %v1363_v56, %v1367_v57 }
 0x194   : > { %v1071_v8 = vmul.f32 %v5366_v4, %v5869_v19  ;;  %v4703_v63 = vcombine.high %v1371_v60, %v1375_v61  ;;  %v1379_v0 = vld [vmem:[%s5787_s22 + $0x90] sm:$0xff]  ;;  %v4702_v2 = vcombine.low %v1371_v60, %v1375_v61 }
 0x195   : > { %v5907_v9 = vpack.c.bf16 %v1041_v5, %v1041_v5  ;;  %v1080_v19 = vmul.f32 %v4668_v13, %v1072_v7  ;;  %v1383_v1 = vld [vmem:[%s5787_s22 + $0xb0] sm:$0xff]  ;;  %v5553_v5 = vmov 0.0  }
 0x196   : > { %v1079_v20 = vmul.f32 %v4668_v13, %v1071_v8  ;;  %v4711_v3 = vcombine.high %v1379_v0, %v1383_v1  ;;  %v4710_v4 = vcombine.low %v1379_v0, %v1383_v1 }
 0x197   : > { %4686 = vmatmul.mubr.msk.bf16.vlgmr.msra.gmra.mrb[0].mxu0 %vm1013_vm2, %v5907_v9  ;;  %4689 = vmatmul.mubr.msk.bf16.vlgmr.msra.gmra.mrb[0].mxu1 %vm1013_vm2, %v5907_v9  ;;  %v1088_v31 = vadd.f32 %v4669_v24, %v1080_v19 }
 0x198   : > { %1231 = vmatpush1.bf16.msra.mxu0 %v4672_v45  ;;  %1552 = vmatpush1.bf16.msra.mxu1 %v4692_v46  ;;  %v1087_v30 = vadd.f32 %v4669_v24, %v1079_v20  ;;  %v1384_v45 = vld [vmem:[%s5787_s22 + $0xb8] sm:$0xff]  ;;  %v4690_v46 = vcombine.low %v1361_v33, %v1365_v34 }
 0x199   : > { %1232 = vmatprep.subr.bf16.mxu0 %v4681_v6  ;;  %1553 = vmatprep.subr.bf16.mxu1 %v4701_v10  ;;  %v4713_v50 = vcombine.high %v1380_v44, %v1384_v45  ;;  %v4712_v54 = vcombine.low %v1380_v44, %v1384_v45 }
 0x19a   : > { %1262 = vmatprep.mubr.bf16.mxu0 %v5552_v48  ;;  %1583 = vmatprep.mubr.bf16.mxu1 %v5552_v48  ;;  %v1089_v39 = vpack.c.bf16 %v1088_v31, %v1087_v30 }
 0x19c   : > { %1233 = vmatpush1.bf16.msra.mxu0 %v4680_v14  ;;  %1554 = vmatpush1.bf16.msra.mxu1 %v4700_v17 }
 0x19d   : > { %1271 = vmatprep.subr.bf16.mxu0 %v4675_v18  ;;  %1555 = vmatprep.subr.bf16.mxu1 %v4709_v21 }
 0x19f   : > { %4687 = vmatmul.mubr.msk.bf16.vlgmr.msra.gmra.mrb[4].mxu0 %vm1013_vm2, %v5907_v9 }
 0x1a0   : > { %1272 = vmatpush1.bf16.msra.mxu0 %v4674_v27  ;;  %1556 = vmatpush1.bf16.msra.mxu1 %v4708_v28 }
 0x1a1   : > { %1273 = vmatprep.subr.bf16.mxu0 %v4683_v29  ;;  %1637 = vmatprep.subr.bf16.mxu1 %v4697_v32 }
 0x1a2   : > { %1303 = vmatprep.mubr.bf16.mxu0 %v5552_v48 }
 0x1a3   : > { %4715 = vmatmul.mubr.msk.bf16.vlgmr.msra.gmra.mrb[4].mxu1 %vm1045_vm3, %v1089_v39 }
 0x1a4   : > { %1274 = vmatpush1.bf16.msra.mxu0 %v4682_v37  ;;  %1638 = vmatpush1.bf16.msra.mxu1 %v4696_v38 }
 0x1a5   : > { %1508 = vmatprep.subr.bf16.mxu0 %v4691_v40  ;;  %1639 = vmatprep.subr.bf16.mxu1 %v4705_v41 }
 0x1a6   : > { %1669 = vmatprep.mubr.bf16.mxu1 %v5552_v48 }
 0x1a7   : > { %4688 = vmatmul.mubr.msk.bf16.vlgmr.msra.gmra.mrb[8].mxu0 %vm1013_vm2, %v5907_v9 }
 0x1a8   : > { %1509 = vmatpush1.bf16.msra.mxu0 %v4690_v46  ;;  %1640 = vmatpush1.bf16.msra.mxu1 %v4704_v47 }
 0x1a9   : > { %1510 = vmatprep.subr.bf16.mxu0 %v4699_v49  ;;  %1641 = vmatprep.subr.bf16.mxu1 %v4713_v50 }
 0x1aa   : > { %1540 = vmatprep.mubr.bf16.mxu0 %v5552_v48 }
 0x1ac   : > { %1511 = vmatpush1.bf16.msra.mxu0 %v4698_v53  ;;  %1642 = vmatpush1.bf16.msra.mxu1 %v4712_v54 }
 0x1ad   : > { %1512 = vmatprep.subr.bf16.mxu0 %v4707_v55  ;;  %5016 = vmatprep.subr.bf16.mxu1 %v5553_v5 }
 0x1af   : > { %4717 = vmatmul.mubr.msk.bf16.vlgmr.msra.gmra.mrb[8].mxu1 %vm1045_vm3, %v1089_v39 }
 0x1b0   : > { %1513 = vmatpush1.bf16.msra.mxu0 %v4706_v58  ;;  %5018 = vmatprep.mubr.msk.bf16.mxu1 %vm5554_vm4, %v5553_v5 }
 0x1b1   : > { %1594 = vmatprep.subr.bf16.mxu0 %v4695_v59 }
 0x1b3   : > { %4714 = vmatmul.mubr.msk.bf16.vlgmr.msra.gmra.mrb[12].mxu0 %vm1045_vm3, %v1089_v39 }
 0x1b4   : > { %1595 = vmatpush1.bf16.msra.mxu0 %v4694_v62  ;;  %1626 = vmatprep.mubr.bf16.mxu0 %v5552_v48 }
 0x1b5   : > { %1596 = vmatprep.subr.bf16.mxu0 %v4703_v63 }
 0x1b8   : > { %1597 = vmatpush1.bf16.msra.mxu0 %v4702_v2 }
 0x1b9   : > { %1598 = vmatprep.subr.bf16.mxu0 %v4711_v3 }
 0x1bc   : > { %1599 = vmatpush1.bf16.msra.mxu0 %v4710_v4 }
 0x1bd   : > { %5010 = vmatprep.subr.bf16.mxu0 %v5553_v5 }
 0x1bf   : > { %4716 = vmatmul.mubr.msk.bf16.vlgmr.msra.gmra.mrb[16].mxu0 %vm1045_vm3, %v1089_v39 }
 0x1c0   : > { %5012 = vmatprep.mubr.msk.bf16.mxu0 %vm5554_vm4, %v5553_v5 }
 0x26a   : > { %v1223_v48 = vpop.f32.mrb[0].mxu0  ;;  %v5967_v6 = vpop.f32.mrb[0].mxu1 }
 0x26b   : > { %v5969_v7 = vpop.f32.mrb[1].mxu0  ;;  %v5971_v8 = vpop.f32.mrb[1].mxu1  ;;  %v1353_v41 = vpack.c.bf16 %v1223_v48, %v1223_v48 }
 0x26c   : > { %v1227_v9 = vpop.f32.mrb[2].mxu0  ;;  %v1350_v10 = vpop.f32.mrb[2].mxu1 }
 0x26d   : > { %v1228_v11 = vpop.f32.mrb[3].mxu0  ;;  %v1351_v12 = vpop.f32.mrb[3].mxu1 }
 0x272   : > { %v5973_v13 = vpop.f32.mrb[4].mxu0 }
 0x273   : > { %v5975_v15 = vpop.f32.mrb[5].mxu0 }
 0x274   : > { %v1268_v16 = vpop.f32.mrb[6].mxu0 }
 0x275   : > { %v1269_v14 = vpop.f32.mrb[7].mxu0 }
 0x276   : > { %v1585_v17 = vpop.f32.mrb[4].mxu1 }
 0x277   : > { %v1587_v18 = vpop.f32.mrb[5].mxu1 }
 0x278   : > { %v1589_v19 = vpop.f32.mrb[6].mxu1 }
 0x279   : > { %v5977_v20 = vpack.c.bf16 %v1589_v19, %v1585_v17  ;;  %v1591_v21 = vpop.f32.mrb[7].mxu1 }
 0x27a   : > { %v5979_v22 = vpack.c.bf16 %v1591_v21, %v1587_v18  ;;  %v1305_v23 = vpop.f32.mrb[8].mxu0 }
 0x27b   : > { %v5981_v24 = vpop.f32.mrb[9].mxu0  ;;  %v5991_v40 = vpack.c.bf16 %v1305_v23, %v1305_v23 }
 0x27c   : > { %v1309_v25 = vpop.f32.mrb[10].mxu0 }
 0x27d   : > { %v1310_v26 = vpop.f32.mrb[11].mxu0  ;;  %v1828_v43 = vsel %vm1826_vm6, %v5991_v40, 0 }
 0x282   : > { %v1671_v27 = vpop.f32.mrb[8].mxu1 }
 0x283   : > { %v1673_v28 = vpop.f32.mrb[9].mxu1 }
 0x284   : > { %v1675_v29 = vpop.f32.mrb[10].mxu1 }
 0x285   : > { %v5983_v30 = vpack.c.bf16 %v1675_v29, %v1671_v27  ;;  %v1677_v31 = vpop.f32.mrb[11].mxu1 }
 0x286   : > { %v5985_v32 = vpack.c.bf16 %v1677_v31, %v1673_v28  ;;  %v1542_v33 = vpop.f32.mrb[12].mxu0 }
 0x287   : > { %v1544_v34 = vpop.f32.mrb[13].mxu0 }
 0x288   : > { %v1546_v35 = vpop.f32.mrb[14].mxu0 }
 0x289   : > { %v1680_v36 = vpack.c.bf16 %v1546_v35, %v1542_v33  ;;  %v1548_v37 = vpop.f32.mrb[15].mxu0 }
 0x28a   : > { %v5987_v38 = vpack.c.bf16 %v1548_v37, %v1544_v34 }
 0x28b   : > { %v1693_v39 = vsel %vm1688_vm5, %v1680_v36, 0 }
 0x28c   : > { %5011 = vmatpush3.bf16.xpose.msra.mxu0 %v1693_v39 }
 0x28d   : > { %5022 = vmatprep.subr.bf16.mxu0 %v5553_v5 }
 0x292   : > { %v1628_v42 = vpop.f32.mrb[16].mxu0 }
 0x293   : > { %v1630_v44 = vpop.f32.mrb[17].mxu0  ;;  %5013 = vmatmul.mubr.msk.bf16.vlgmr.msra.gmra.mrb[20].mxu0 %vm1688_vm5, %v1353_v41 }
 0x294   : > { %v1632_v45 = vpop.f32.mrb[18].mxu0  ;;  %5023 = vmatpush3.bf16.msra.mxu0 %v1828_v43  ;;  %5024 = vmatprep.mubr.msk.bf16.mxu0 %vm5554_vm4, %v5553_v5 }
 0x295   : > { %v5998_v46 = vpack.c.bf16 %v1632_v45, %v1628_v42  ;;  %v1634_v47 = vpop.f32.mrb[19].mxu0  ;;  %5034 = vmatprep.subr.bf16.mxu0 %v5553_v5 }
 0x296   : > { %v6001_v49 = vpack.c.bf16 %v1634_v47, %v1630_v44 }
 0x297   : > { %5017 = vmatpush3.bf16.msra.mxu1 %v5998_v46 }
 0x298   : > { %5028 = vmatprep.subr.bf16.mxu1 %v5553_v5 }
 0x366   : > { %v1729_v50 = vpop.f32.mrb[20].mxu0 }
 0x367   : > { %v5014_v51 = vpop.f32.mrb[21].mxu0  ;;  %v1736_v52 = vsel %vm1735_vm7, %v1729_v50, -inf }
 0x368   : > { %1737 = vmax.xlane.f32.xlu0 %v1736_v52  ;;  %v1732_v53 = vpop.f32.mrb[22].mxu0 }
 0x369   : > { %v5015_v54 = vpop.f32.mrb[23].mxu0 }
 0x37e   : > { %1880 = vrot.lane.b32.xlu0 %v1680_v36, %s5555_s5 }
 0x3f5   : > { %v1738_v55 = vpop.xlane.xlu0 %1737 }
 0x3f6   : > { %v1739_v56 = vrot.slane %v1738_v55, 4 }
 0x3f8   : > { %v1740_v57 = vmax.f32 %v1738_v55, %v1739_v56 }
 0x3f9   : > { %v1881_v48 = vpop.permute.xlu0 %1880 }
 0x3fa   : > { %v1741_v58 = vrot.slane %v1740_v57, 2  ;;  %v1886_v10 = vsel %vm1688_vm5, %v1881_v48, 0 }
 0x3fc   : > { %v1742_v59 = vmax.f32 %v1740_v57, %v1741_v58 }
 0x3fe   : > { %v1743_v60 = vrot.slane %v1742_v59, 1 }
 0x400   : > { %v1744_v61 = vmax.f32 %v1742_v59, %v1743_v60  ;;  %v2088_v60 = vsel %vm1688_vm5, %v5987_v38, 0 }
 0x402   : > { %v1745_v62 = vsub.f32 %v1729_v50, %v1744_v61  ;;  %v1354_v61 = vpack.c.bf16 %v5969_v7, %v5969_v7 }
 0x404   : > { %v1746_v63 = vmul.f32 1.442695, %v1745_v62 }
 0x406   : > { %5367 = vpow2.f32 %v1746_v63 }
 0x410   : > { %v5368_v0 = vpop.eup %5367 }
 0x411   : > { %v1748_v1 = vsel %vm1735_vm7, %v5368_v0, 0.0 }
 0x412   : > { %1749 = vadd.xlane.f32.xlu1 %v1748_v1  ;;  %v1753_v27 = vrot.slane %v1748_v1, 4 }
 0x414   : > { %v1754_v28 = vadd.f32 %v1753_v27, %v1748_v1 }
 0x416   : > { %v1755_v29 = vrot.slane %v1754_v28, 2 }
 0x418   : > { %v1756_v31 = vadd.f32 %v1755_v29, %v1754_v28 }
 0x41a   : > { %v1757_v33 = vrot.slane %v1756_v31, 1 }
 0x41c   : > { %v1758_v34 = vadd.f32 %v1757_v33, %v1756_v31 }
 0x423   : > { %1877 = vrot.lane.b32.xlu1 %v1353_v41, %s5555_s5 }
 0x49f   : > { %v1750_v2 = vpop.xlane.xlu1 %1749 }
 0x4a0   : > { %5369 = vrcp.f32 %v1750_v2 }
 0x4a1   : > { %5371 = vrcp.f32 %v1758_v34 }
 0x4a3   : > { %v1878_v11 = vpop.permute.xlu1 %1877 }
 0x4aa   : > { %v5370_v3 = vpop.eup %5369 }
 0x4ab   : > { %v1752_v4 = vmul.f32 %v5370_v3, %v5368_v0  ;;  %v5372_v35 = vpop.eup %5371 }
 0x4ac   : > { %v1760_v36 = vmul.f32 %v5372_v35, %v5368_v0 }
 0x4ad   : > { %v1761_v9 = vpack.c.bf16 %v1752_v4, %v1752_v4 }
 0x4ae   : > { %v1805_v37 = vpack.c.bf16 %v1760_v36, %v1760_v36 }
 0x4af   : > { %5019 = vmatmul.mubr.msk.bf16.vlgmr.msra.gmra.mrb[12].mxu1 %vm1735_vm7, %v1761_v9 }
 0x4b0   : > { %5029 = vmatpush3.bf16.xpose.msra.mxu1 %v1886_v10  ;;  %5030 = vmatprep.mubr.msk.bf16.mxu1 %vm5554_vm4, %v5553_v5 }
 0x4b1   : > { %5040 = vmatprep.subr.bf16.mxu1 %v5553_v5 }
 0x4b7   : > { %5031 = vmatmul.mubr.msk.bf16.vlgmr.msra.gmra.mrb[16].mxu1 %vm1688_vm5, %v1878_v11 }
 0x4b8   : > { %5042 = vmatprep.mubr.msk.bf16.mxu1 %vm5554_vm4, %v5553_v5 }
 0x582   : > { %v1799_v12 = vpop.f32.mrb[12].mxu1 }
 0x583   : > { %v1871_v16 = vpack.c.bf16 %v1799_v12, %v1799_v12  ;;  %v5020_v14 = vpop.f32.mrb[13].mxu1 }
 0x584   : > { %v1802_v17 = vpop.f32.mrb[14].mxu1 }
 0x585   : > { %1873 = vst.msk [vmem:[#allocation4] sm:$0xf] %vm1872_vm8, %v1871_v16  ;;  %v5021_v18 = vpop.f32.mrb[15].mxu1 }
 0x58a   : > { %v1922_v19 = vpop.f32.mrb[16].mxu1 }
 0x58b   : > { %v5032_v21 = vpop.f32.mrb[17].mxu1  ;;  %v1928_v23 = vsel %vm1735_vm7, %v1922_v19, -inf }
 0x58c   : > { %1929 = vmax.xlane.f32.xlu1 %v1928_v23  ;;  %v1925_v25 = vpop.f32.mrb[18].mxu1 }
 0x58d   : > { %v5033_v26 = vpop.f32.mrb[19].mxu1 }
 0x5b9   : > { %1806 = vxpose.xlu1.c.b16.start.end [1/1] (short) (narrow) %v1805_v37, 16 }
 0x5bd   : > { %2271 = vrot.lane.b32.xlu1 %v5987_v38, %s5555_s5 }
 0x619   : > { %v1930_v39 = vpop.xlane.xlu1 %1929 }
 0x61a   : > { %v1931_v41 = vrot.slane %v1930_v39, 4 }
 0x61c   : > { %v1932_v42 = vmax.f32 %v1930_v39, %v1931_v41 }
 0x61e   : > { %v1933_v43 = vrot.slane %v1932_v42, 2 }
 0x61f   : > { %v1814_v54 = vpop.trf.xlu1 }
 0x620   : > { %v1934_v44 = vmax.f32 %v1932_v42, %v1933_v43  ;;  %5025 = vmatmul.mubr.msk.bf16.vlgmr.msra.gmra.mrb[24].mxu0 %vm1822_vm9, %v1814_v54 }
 0x621   : > { %5036 = vmatprep.mubr.msk.bf16.mxu0 %vm5554_vm4, %v5553_v5 }
 0x622   : > { %v1935_v45 = vrot.slane %v1934_v44, 1 }
 0x624   : > { %v1936_v47 = vmax.f32 %v1934_v44, %v1935_v45 }
 0x626   : > { %v1937_v50 = vsub.f32 %v1922_v19, %v1936_v47 }
 0x628   : > { %v1938_v51 = vmul.f32 1.442695, %v1937_v50 }
 0x62a   : > { %5373 = vpow2.f32 %v1938_v51 }
 0x62f   : > { %v2272_v43 = vpop.permute.xlu1 %2271 }
 0x634   : > { %v6021_v52 = vpop.eup %5373 }
 0x635   : > { %v6025_v53 = vsel %vm1735_vm7, %v6021_v52, 0.0 }
 0x636   : > { %1941 = vadd.xlane.f32.xlu0 %v6025_v53  ;;  %v1945_v31 = vrot.slane %v6025_v53, 4 }
 0x638   : > { %v1946_v33 = vadd.f32 %v1945_v31, %v6025_v53 }
 0x63a   : > { %v1947_v34 = vrot.slane %v1946_v33, 2 }
 0x63c   : > { %v1948_v35 = vadd.f32 %v1947_v34, %v1946_v33  ;;  %v1355_v33 = vpack.c.bf16 %v5973_v13, %v5973_v13  ;;  %v2477_v13 = vsel %vm1688_vm5, %v5977_v20, 0 }
 0x63e   : > { %v1949_v36 = vrot.slane %v1948_v35, 1 }
 0x640   : > { %v1950_v37 = vadd.f32 %v1949_v36, %v1948_v35 }
 0x64c   : > { %1955 = vrot.lane.b32.xlu0 %v5998_v46, %s5555_s5  ;;  %v6043_v46 = vpack.c.bf16 %v5981_v24, %v5981_v24 }
 0x64e   : > { %v2220_v62 = vsel %vm1826_vm6, %v6043_v46, 0 }
 0x6c3   : > { %v1942_v55 = vpop.xlane.xlu0 %1941 }
 0x6c4   : > { %5375 = vrcp.f32 %v1942_v55 }
 0x6c7   : > { %v1956_v56 = vpop.permute.xlu0 %1955 }
 0x6c8   : > { %5035 = vmatpush3.bf16.msra.mxu0 %v1956_v56 }
 0x6c9   : > { %5046 = vmatprep.subr.bf16.mxu0 %v5553_v5 }
 0x6ce   : > { %v5376_v57 = vpop.eup %5375 }
 0x6cf   : > { %v1944_v58 = vmul.f32 %v5376_v57, %v6021_v52 }
 0x6d1   : > { %v1953_v59 = vpack.c.bf16 %v1944_v58, %v1944_v58 }
 0x6d3   : > { %5037 = vmatmul.mubr.msk.bf16.vlgmr.msra.gmra.mrb[28].mxu0 %vm1735_vm7, %v1953_v59 }
 0x6d4   : > { %5047 = vmatpush3.bf16.xpose.msra.mxu0 %v2088_v60  ;;  %5048 = vmatprep.mubr.msk.bf16.mxu0 %vm5554_vm4, %v5553_v5 }
 0x6d5   : > { %5058 = vmatprep.subr.bf16.mxu0 %v5553_v5 }
 0x6db   : > { %5049 = vmatmul.mubr.msk.bf16.vlgmr.msra.gmra.mrb[32].mxu0 %vm1688_vm5, %v1354_v61 }
 0x6dc   : > { %5059 = vmatpush3.bf16.msra.mxu0 %v2220_v62  ;;  %5060 = vmatprep.mubr.msk.bf16.mxu0 %vm5554_vm4, %v5553_v5 }
 0x6dd   : > { %5070 = vmatprep.subr.bf16.mxu0 %v5553_v5 }
 0x6f3   : > { %v1864_v38 = vpop.f32.mrb[24].mxu0 }
 0x6f4   : > { %v5026_v63 = vpop.f32.mrb[25].mxu0 }
 0x6f5   : > { %v1867_v0 = vpop.f32.mrb[26].mxu0 }
 0x6f6   : > { %v1874_v1 = vpack.c.bf16 %v1867_v0, %v1864_v38  ;;  %v5027_v24 = vpop.f32.mrb[27].mxu0 }
 0x6f8   : > { %1875 = vst.msk [vmem:[#allocation5] sm:$0xff] %vm1688_vm5, %v1874_v1 }
 0x7a6   : > { %v6054_v2 = vpop.f32.mrb[28].mxu0 }
 0x7a7   : > { %v5038_v7 = vpop.f32.mrb[29].mxu0 }
 0x7a8   : > { %v1998_v3 = vpop.f32.mrb[30].mxu0 }
 0x7a9   : > { %v5039_v4 = vpop.f32.mrb[31].mxu0 }
 0x7ae   : > { %v2124_v48 = vpop.f32.mrb[32].mxu0 }
 0x7af   : > { %v5050_v9 = vpop.f32.mrb[33].mxu0  ;;  %v2130_v10 = vsel %vm1735_vm7, %v2124_v48, -inf }
 0x7b0   : > { %2131 = vmax.xlane.f32.xlu0 %v2130_v10  ;;  %v2127_v11 = vpop.f32.mrb[34].mxu0 }
 0x7b1   : > { %v5051_v12 = vpop.f32.mrb[35].mxu0 }
 0x7c6   : > { %2019 = vrot.lane.b32.xlu0 %v5991_v40, %s5555_s5 }
 0x7ca   : > { %2268 = vrot.lane.b32.xlu0 %v1354_v61, %s5555_s5 }
 0x83d   : > { %v2132_v16 = vpop.xlane.xlu0 %2131 }
 0x83e   : > { %v2133_v14 = vrot.slane %v2132_v16, 4 }
 0x840   : > { %v2134_v17 = vmax.f32 %v2132_v16, %v2133_v14 }
 0x841   : > { %v2020_v18 = vpop.permute.xlu0 %2019 }
 0x842   : > { %v2135_v19 = vrot.slane %v2134_v17, 2  ;;  %v2025_v21 = vsel %vm1826_vm6, %v2020_v18, 0 }
 0x843   : > { %5041 = vmatpush3.bf16.msra.mxu1 %v2025_v21 }
 0x844   : > { %v2136_v23 = vmax.f32 %v2134_v17, %v2135_v19  ;;  %5052 = vmatprep.subr.bf16.mxu1 %v5553_v5 }
 0x846   : > { %v2137_v25 = vrot.slane %v2136_v23, 1 }
 0x848   : > { %v2138_v26 = vmax.f32 %v2136_v23, %v2137_v25 }
 0x84a   : > { %v2139_v27 = vsub.f32 %v2124_v48, %v2138_v26 }
 0x84c   : > { %v2140_v28 = vmul.f32 1.442695, %v2139_v27 }
 0x84e   : > { %5377 = vpow2.f32 %v2140_v28 }
 0x84f   : > { %5379 = vrcp.f32 %v1950_v37 }
 0x858   : > { %v6062_v29 = vpop.eup %5377 }
 0x859   : > { %v6066_v40 = vsel %vm1735_vm7, %v6062_v29, 0.0  ;;  %v5380_v39 = vpop.eup %5379 }
 0x85a   : > { %2143 = vadd.xlane.f32.xlu1 %v6066_v40  ;;  %v1952_v41 = vmul.f32 %v5380_v39, %v6021_v52  ;;  %v2277_v52 = vsel %vm1688_vm5, %v2272_v43, 0  ;;  %v2147_v18 = vrot.slane %v6066_v40, 4  ;;  %v6124_v39 = vpack.c.bf16 %v5967_v6, %v5967_v6 }
 0x85c   : > { %v2001_v42 = vpack.c.bf16 %v1952_v41, %v1952_v41  ;;  %v2148_v19 = vadd.f32 %v2147_v18, %v6066_v40  ;;  %v2609_v41 = vsel %vm1826_vm6, %v6124_v39, 0 }
 0x85e   : > { %v2149_v21 = vrot.slane %v2148_v19, 2 }
 0x860   : > { %v2150_v23 = vadd.f32 %v2149_v21, %v2148_v19 }
 0x862   : > { %v2151_v25 = vrot.slane %v2150_v23, 1 }
 0x864   : > { %v2152_v26 = vadd.f32 %v2151_v25, %v2150_v23 }
 0x887   : > { %2002 = vxpose.xlu1.c.b16.start.end [1/1] (short) (narrow) %v2001_v42, 16 }
 0x88b   : > { %2346 = vrot.lane.b32.xlu1 %v6001_v49, %s5555_s5 }
 0x8e7   : > { %v2144_v44 = vpop.xlane.xlu1 %2143 }
 0x8e8   : > { %5381 = vrcp.f32 %v2144_v44 }
 0x8ed   : > { %v2010_v45 = vpop.trf.xlu1 }
 0x8ee   : > { %5043 = vmatmul.mubr.msk.bf16.vlgmr.msra.gmra.mrb[20].mxu1 %vm1822_vm9, %v2010_v45 }
 0x8ef   : > { %5053 = vmatpush3.bf16.msra.mxu1 %v6001_v49  ;;  %5054 = vmatprep.mubr.msk.bf16.mxu1 %vm5554_vm4, %v5553_v5  ;;  %v2269_v49 = vpop.permute.xlu0 %2268 }
 0x8f0   : > { %5064 = vmatprep.subr.bf16.mxu1 %v5553_v5 }
 0x8f2   : > { %v5382_v47 = vpop.eup %5381 }
 0x8f3   : > { %v2146_v50 = vmul.f32 %v5382_v47, %v6062_v29 }
 0x8f5   : > { %v2155_v51 = vpack.c.bf16 %v2146_v50, %v2146_v50 }
 0x8f7   : > { %5055 = vmatmul.mubr.msk.bf16.vlgmr.msra.gmra.mrb[24].mxu1 %vm1735_vm7, %v2155_v51 }
 0x8f8   : > { %5065 = vmatpush3.bf16.xpose.msra.mxu1 %v2277_v52  ;;  %5066 = vmatprep.mubr.msk.bf16.mxu1 %vm5554_vm4, %v5553_v5 }
 0x8f9   : > { %5076 = vmatprep.subr.bf16.mxu1 %v5553_v5 }
 0x8fd   : > { %v2347_v35 = vpop.permute.xlu1 %2346 }
 0x8ff   : > { %5067 = vmatmul.mubr.msk.bf16.vlgmr.msra.gmra.mrb[28].mxu1 %vm1688_vm5, %v2269_v49 }
 0x900   : > { %5078 = vmatprep.mubr.msk.bf16.mxu1 %vm5554_vm4, %v5553_v5 }
 0x9c1   : > { %v6088_v53 = vpop.f32.mrb[20].mxu1 }
 0x9c2   : > { %v5044_v54 = vpop.f32.mrb[21].mxu1 }
 0x9c3   : > { %v6090_v55 = vpop.f32.mrb[22].mxu1 }
 0x9c4   : > { %v2077_v56 = vpack.c.bf16 %v6090_v55, %v6088_v53  ;;  %v5045_v57 = vpop.f32.mrb[23].mxu1 }
 0x9ca   : > { %v2193_v58 = vpop.f32.mrb[24].mxu1 }
 0x9cb   : > { %v2263_v59 = vpack.c.bf16 %v2193_v58, %v2193_v58  ;;  %v5056_v60 = vpop.f32.mrb[25].mxu1 }
 0x9cc   : > { %v2196_v61 = vpop.f32.mrb[26].mxu1 }
 0x9cd   : > { %2264 = vst.msk [vmem:[#allocation4 + $0x4] sm:$0xf] %vm1872_vm8, %v2263_v59  ;;  %v5057_v62 = vpop.f32.mrb[27].mxu1 }
 0x9d2   : > { %v2313_v38 = vpop.f32.mrb[28].mxu1 }
 0x9d3   : > { %v5068_v63 = vpop.f32.mrb[29].mxu1  ;;  %v2319_v0 = vsel %vm1735_vm7, %v2313_v38, -inf }
 0x9d4   : > { %2320 = vmax.xlane.f32.xlu0 %v2319_v0  ;;  %v2316_v1 = vpop.f32.mrb[30].mxu1 }
 0x9d5   : > { %v5069_v24 = vpop.f32.mrb[31].mxu1 }
 0xa61   : > { %v2321_v7 = vpop.xlane.xlu0 %2320 }
 0xa62   : > { %v2322_v3 = vrot.slane %v2321_v7, 4 }
 0xa64   : > { %v2323_v4 = vmax.f32 %v2321_v7, %v2322_v3 }
 0xa66   : > { %v2324_v48 = vrot.slane %v2323_v4, 2 }
 0xa68   : > { %v2325_v9 = vmax.f32 %v2323_v4, %v2324_v48 }
 0xa6a   : > { %v2326_v10 = vrot.slane %v2325_v9, 1 }
 0xa6c   : > { %v2327_v11 = vmax.f32 %v2325_v9, %v2326_v10 }
 0xa6e   : > { %v2328_v12 = vsub.f32 %v2313_v38, %v2327_v11 }
 0xa70   : > { %v2329_v16 = vmul.f32 1.442695, %v2328_v12 }
 0xa72   : > { %5383 = vpow2.f32 %v2329_v16 }
 0xa73   : > { %5385 = vrcp.f32 %v2152_v26 }
 0xa7c   : > { %v6096_v14 = vpop.eup %5383 }
 0xa7d   : > { %v6100_v17 = vsel %vm1735_vm7, %v6096_v14, 0.0  ;;  %v5386_v27 = vpop.eup %5385 }
 0xa7e   : > { %2332 = vadd.xlane.f32.xlu0 %v6100_v17  ;;  %v2154_v28 = vmul.f32 %v5386_v27, %v6062_v29  ;;  %v2336_v48 = vrot.slane %v6100_v17, 4 }
 0xa80   : > { %v2199_v31 = vpack.c.bf16 %v2154_v28, %v2154_v28  ;;  %v2337_v9 = vadd.f32 %v2336_v48, %v6100_v17 }
 0xa82   : > { %v2338_v10 = vrot.slane %v2337_v9, 2 }
 0xa84   : > { %v2339_v11 = vadd.f32 %v2338_v10, %v2337_v9 }
 0xa86   : > { %v2340_v12 = vrot.slane %v2339_v11, 1 }
 0xa88   : > { %v2341_v16 = vadd.f32 %v2340_v12, %v2339_v11  ;;  %v1356_v12 = vpack.c.bf16 %v5975_v15, %v5975_v15 }
 0xaab   : > { %2200 = vxpose.xlu0.c.b16.start.end [1/1] (short) (narrow) %v2199_v31, 16 }
 0xab4   : > { %2660 = vrot.lane.b32.xlu0 %v5977_v20, %s5555_s5 }
 0xab8   : > { %2657 = vrot.lane.b32.xlu0 %v1355_v33, %s5555_s5 }
 0xb0b   : > { %v2333_v34 = vpop.xlane.xlu0 %2332 }
 0xb0c   : > { %5387 = vrcp.f32 %v2333_v34 }
 0xb11   : > { %v2208_v40 = vpop.trf.xlu0 }
 0xb12   : > { %5061 = vmatmul.mubr.msk.bf16.vlgmr.msra.gmra.mrb[36].mxu0 %vm1822_vm9, %v2208_v40 }
 0xb13   : > { %5071 = vmatpush3.bf16.msra.mxu0 %v2347_v35  ;;  %5072 = vmatprep.mubr.msk.bf16.mxu0 %vm5554_vm4, %v5553_v5 }
 0xb14   : > { %5082 = vmatprep.subr.bf16.mxu0 %v5553_v5 }
 0xb16   : > { %v5388_v29 = vpop.eup %5387 }
 0xb17   : > { %v2335_v36 = vmul.f32 %v5388_v29, %v6096_v14 }
 0xb19   : > { %v2344_v37 = vpack.c.bf16 %v2335_v36, %v2335_v36 }
 0xb1b   : > { %5073 = vmatmul.mubr.msk.bf16.vlgmr.msra.gmra.mrb[40].mxu0 %vm1735_vm7, %v2344_v37 }
 0xb1c   : > { %5083 = vmatpush3.bf16.xpose.msra.mxu0 %v2477_v13  ;;  %5084 = vmatprep.mubr.msk.bf16.mxu0 %vm5554_vm4, %v5553_v5 }
 0xb1d   : > { %5094 = vmatprep.subr.bf16.mxu0 %v5553_v5 }
 0xb23   : > { %5085 = vmatmul.mubr.msk.bf16.vlgmr.msra.gmra.mrb[44].mxu0 %vm1688_vm5, %v1355_v33 }
 0xb24   : > { %5095 = vmatpush3.bf16.msra.mxu0 %v2609_v41  ;;  %5096 = vmatprep.mubr.msk.bf16.mxu0 %vm5554_vm4, %v5553_v5 }
 0xb25   : > { %5106 = vmatprep.subr.bf16.mxu0 %v5553_v5 }
 0xb26   : > { %v2661_v26 = vpop.permute.xlu0 %2660 }
 0xb27   : > { %v2666_v28 = vsel %vm1688_vm5, %v2661_v26, 0 }
 0xbe5   : > { %v2256_v20 = vpop.f32.mrb[36].mxu0 }
 0xbe6   : > { %v5062_v42 = vpop.f32.mrb[37].mxu0 }
 0xbe7   : > { %v2259_v43 = vpop.f32.mrb[38].mxu0 }
 0xbe8   : > { %v2265_v44 = vpack.c.bf16 %v2259_v43, %v2256_v20  ;;  %v5063_v45 = vpop.f32.mrb[39].mxu0 }
 0xbea   : > { %2266 = vst.msk [vmem:[#allocation5 + $0x8] sm:$0xff] %vm1688_vm5, %v2265_v44 }
 0xbee   : > { %v6133_v6 = vpop.f32.mrb[40].mxu0 }
 0xbef   : > { %v5074_v47 = vpop.f32.mrb[41].mxu0 }
 0xbf0   : > { %v2389_v50 = vpop.f32.mrb[42].mxu0 }
 0xbf1   : > { %v5075_v51 = vpop.f32.mrb[43].mxu0 }
 0xbf6   : > { %v2513_v52 = vpop.f32.mrb[44].mxu0 }
 0xbf7   : > { %v5086_v49 = vpop.f32.mrb[45].mxu0  ;;  %v2519_v54 = vsel %vm1735_vm7, %v2513_v52, -inf }
 0xbf8   : > { %2520 = vmax.xlane.f32.xlu1 %v2519_v54  ;;  %v2516_v57 = vpop.f32.mrb[46].mxu0 }
 0xbf9   : > { %v5087_v58 = vpop.f32.mrb[47].mxu0 }
 0xc09   : > { %2410 = vrot.lane.b32.xlu1 %v6043_v46, %s5555_s5 }
 0xc85   : > { %v2521_v59 = vpop.xlane.xlu1 %2520 }
 0xc86   : > { %v2522_v60 = vrot.slane %v2521_v59, 4 }
 0xc88   : > { %v2523_v61 = vmax.f32 %v2521_v59, %v2522_v60 }
 0xc89   : > { %v2411_v62 = vpop.permute.xlu1 %2410 }
 0xc8a   : > { %v2524_v38 = vrot.slane %v2523_v61, 2  ;;  %v2416_v63 = vsel %vm1826_vm6, %v2411_v62, 0 }
 0xc8b   : > { %5077 = vmatpush3.bf16.msra.mxu1 %v2416_v63 }
 0xc8c   : > { %v2525_v0 = vmax.f32 %v2523_v61, %v2524_v38  ;;  %5088 = vmatprep.subr.bf16.mxu1 %v5553_v5 }
 0xc8e   : > { %v2526_v1 = vrot.slane %v2525_v0, 1 }
 0xc90   : > { %v2527_v24 = vmax.f32 %v2525_v0, %v2526_v1 }
 0xc92   : > { %v2528_v7 = vsub.f32 %v2513_v52, %v2527_v24 }
 0xc94   : > { %v2529_v3 = vmul.f32 1.442695, %v2528_v7 }
 0xc96   : > { %5389 = vpow2.f32 %v2529_v3 }
 0xc97   : > { %5391 = vrcp.f32 %v2341_v16 }
 0xca0   : > { %v6140_v4 = vpop.eup %5389 }
 0xca1   : > { %v6144_v46 = vsel %vm1735_vm7, %v6140_v4, 0.0  ;;  %v5392_v18 = vpop.eup %5391 }
 0xca2   : > { %2532 = vadd.xlane.f32.xlu1 %v6144_v46  ;;  %v2343_v19 = vmul.f32 %v5392_v18, %v6096_v14  ;;  %v2536_v62 = vrot.slane %v6144_v46, 4 }
 0xca4   : > { %v2392_v21 = vpack.c.bf16 %v2343_v19, %v2343_v19  ;;  %v2537_v38 = vadd.f32 %v2536_v62, %v6144_v46 }
 0xca6   : > { %v2538_v63 = vrot.slane %v2537_v38, 2 }
 0xca8   : > { %v2539_v0 = vadd.f32 %v2538_v63, %v2537_v38 }
 0xcaa   : > { %v2540_v1 = vrot.slane %v2539_v0, 1 }
 0xcac   : > { %v2541_v24 = vadd.f32 %v2540_v1, %v2539_v0 }
 0xccf   : > { %2393 = vxpose.xlu1.c.b16.start.end [1/1] (short) (narrow) %v2392_v21, 16 }
 0xcd3   : > { %2735 = vrot.lane.b32.xlu1 %v5983_v30, %s5555_s5 }
 0xd2f   : > { %v2533_v23 = vpop.xlane.xlu1 %2532 }
 0xd30   : > { %5393 = vrcp.f32 %v2533_v23 }
 0xd35   : > { %v2401_v25 = vpop.trf.xlu1 }
 0xd36   : > { %5079 = vmatmul.mubr.msk.bf16.vlgmr.msra.gmra.mrb[32].mxu1 %vm1822_vm9, %v2401_v25 }
 0xd37   : > { %5089 = vmatpush3.bf16.msra.mxu1 %v5983_v30  ;;  %5090 = vmatprep.mubr.msk.bf16.mxu1 %vm5554_vm4, %v5553_v5  ;;  %v2658_v30 = vpop.permute.xlu0 %2657 }
 0xd38   : > { %5100 = vmatprep.subr.bf16.mxu1 %v5553_v5 }
 0xd3a   : > { %v5394_v17 = vpop.eup %5393 }
 0xd3b   : > { %v2535_v14 = vmul.f32 %v5394_v17, %v6140_v4 }
 0xd3d   : > { %v2544_v27 = vpack.c.bf16 %v2535_v14, %v2535_v14 }
 0xd3f   : > { %5091 = vmatmul.mubr.msk.bf16.vlgmr.msra.gmra.mrb[36].mxu1 %vm1735_vm7, %v2544_v27  ;;  %v2866_v27 = vsel %vm1688_vm5, %v5979_v22, 0 }
 0xd40   : > { %5101 = vmatpush3.bf16.xpose.msra.mxu1 %v2666_v28  ;;  %5102 = vmatprep.mubr.msk.bf16.mxu1 %vm5554_vm4, %v5553_v5  ;;  %v6195_v28 = vpack.c.bf16 %v5971_v8, %v5971_v8 }
 0xd41   : > { %5112 = vmatprep.subr.bf16.mxu1 %v5553_v5 }
 0xd45   : > { %v2736_v17 = vpop.permute.xlu1 %2735 }
 0xd47   : > { %5103 = vmatmul.mubr.msk.bf16.vlgmr.msra.gmra.mrb[40].mxu1 %vm1688_vm5, %v2658_v30  ;;  %v2998_v30 = vsel %vm1826_vm6, %v6195_v28, 0 }
 0xd48   : > { %5114 = vmatprep.mubr.msk.bf16.mxu1 %vm5554_vm4, %v5553_v5 }
 0xe09   : > { %v6166_v31 = vpop.f32.mrb[32].mxu1 }
 0xe0a   : > { %v5080_v33 = vpop.f32.mrb[33].mxu1 }
 0xe0b   : > { %v6168_v34 = vpop.f32.mrb[34].mxu1 }
 0xe0c   : > { %v2467_v40 = vpack.c.bf16 %v6168_v34, %v6166_v31  ;;  %v5081_v35 = vpop.f32.mrb[35].mxu1  ;;  %v5280_v31 = vld [vmem:[%s5792_s3 + $0x40] sm:$0xff]  }
 0xe12   : > { %v2582_v29 = vpop.f32.mrb[36].mxu1 }
 0xe13   : > { %v2652_v36 = vpack.c.bf16 %v2582_v29, %v2582_v29  ;;  %v5092_v37 = vpop.f32.mrb[37].mxu1 }
 0xe14   : > { %v2585_v13 = vpop.f32.mrb[38].mxu1 }
 0xe15   : > { %2653 = vst.msk [vmem:[#allocation4 + $0x8] sm:$0xf] %vm1872_vm8, %v2652_v36  ;;  %v5093_v41 = vpop.f32.mrb[39].mxu1 }
 0xe1a   : > { %v2702_v20 = vpop.f32.mrb[40].mxu1 }
 0xe1b   : > { %v5104_v42 = vpop.f32.mrb[41].mxu1  ;;  %v2708_v43 = vsel %vm1735_vm7, %v2702_v20, -inf }
 0xe1c   : > { %2709 = vmax.xlane.f32.xlu0 %v2708_v43  ;;  %v2705_v44 = vpop.f32.mrb[42].mxu1 }
 0xe1d   : > { %v5105_v45 = vpop.f32.mrb[43].mxu1 }
 0xea9   : > { %v2710_v47 = vpop.xlane.xlu0 %2709 }
 0xeaa   : > { %v2711_v50 = vrot.slane %v2710_v47, 4 }
 0xeac   : > { %v2712_v51 = vmax.f32 %v2710_v47, %v2711_v50 }
 0xeae   : > { %v2713_v52 = vrot.slane %v2712_v51, 2 }
 0xeb0   : > { %v2714_v49 = vmax.f32 %v2712_v51, %v2713_v52 }
 0xeb2   : > { %v2715_v54 = vrot.slane %v2714_v49, 1 }
 0xeb4   : > { %v2716_v57 = vmax.f32 %v2714_v49, %v2715_v54 }
 0xeb6   : > { %v2717_v58 = vsub.f32 %v2702_v20, %v2716_v57 }
 0xeb8   : > { %v2718_v59 = vmul.f32 1.442695, %v2717_v58 }
 0xeba   : > { %5395 = vpow2.f32 %v2718_v59 }
 0xebb   : > { %5397 = vrcp.f32 %v2541_v24 }
 0xec4   : > { %v5396_v60 = vpop.eup %5395 }
 0xec5   : > { %v2720_v61 = vsel %vm1735_vm7, %v5396_v60, 0.0  ;;  %v5398_v7 = vpop.eup %5397 }
 0xec6   : > { %2721 = vadd.xlane.f32.xlu0 %v2720_v61  ;;  %v2543_v3 = vmul.f32 %v5398_v7, %v6140_v4  ;;  %v2725_v9 = vrot.slane %v2720_v61, 4 }
 0xec8   : > { %v2588_v48 = vpack.c.bf16 %v2543_v3, %v2543_v3  ;;  %v2726_v10 = vadd.f32 %v2725_v9, %v2720_v61 }
 0xeca   : > { %v2727_v11 = vrot.slane %v2726_v10, 2 }
 0xecc   : > { %v2728_v46 = vadd.f32 %v2727_v11, %v2726_v10 }
 0xece   : > { %v2729_v16 = vrot.slane %v2728_v46, 1 }
 0xed0   : > { %v2730_v18 = vadd.f32 %v2729_v16, %v2728_v46 }
 0xed2   : > { %5399 = vrcp.f32 %v2730_v18 }
 0xedc   : > { %v5400_v19 = vpop.eup %5399 }
 0xedd   : > { %v2732_v21 = vmul.f32 %v5400_v19, %v5396_v60 }
 0xedf   : > { %v2781_v4 = vpack.c.bf16 %v2732_v21, %v2732_v21 }
 0xef3   : > { %2589 = vxpose.xlu0.c.b16.start.end [1/1] (short) (narrow) %v2588_v48, 16 }
 0xefc   : > { %3049 = vrot.lane.b32.xlu0 %v5979_v22, %s5555_s5 }
 0xf00   : > { %3046 = vrot.lane.b32.xlu0 %v1356_v12, %s5555_s5 }
 0xf1e   : > { %2782 = vxpose.xlu0.c.b16.start.end [1/1] (short) (narrow) %v2781_v4, 16 }
 0xf53   : > { %v2722_v23 = vpop.xlane.xlu0 %2721 }
 0xf54   : > { %5401 = vrcp.f32 %v2722_v23 }
 0xf59   : > { %v2597_v25 = vpop.trf.xlu0 }
 0xf5a   : > { %5097 = vmatmul.mubr.msk.bf16.vlgmr.msra.gmra.mrb[48].mxu0 %vm1822_vm9, %v2597_v25 }
 0xf5b   : > { %5107 = vmatpush3.bf16.msra.mxu0 %v2736_v17  ;;  %5108 = vmatprep.mubr.msk.bf16.mxu0 %vm5554_vm4, %v5553_v5 }
 0xf5c   : > { %5118 = vmatprep.subr.bf16.mxu0 %v5553_v5 }
 0xf5e   : > { %v5402_v15 = vpop.eup %5401 }
 0xf5f   : > { %v2724_v14 = vmul.f32 %v5402_v15, %v5396_v60 }
 0xf61   : > { %v2733_v26 = vpack.c.bf16 %v2724_v14, %v2724_v14 }
 0xf63   : > { %5109 = vmatmul.mubr.msk.bf16.vlgmr.msra.gmra.mrb[52].mxu0 %vm1735_vm7, %v2733_v26 }
 0xf64   : > { %5119 = vmatpush3.bf16.xpose.msra.mxu0 %v2866_v27  ;;  %5120 = vmatprep.mubr.msk.bf16.mxu0 %vm5554_vm4, %v5553_v5 }
 0xf65   : > { %5130 = vmatprep.subr.bf16.mxu0 %v5553_v5 }
 0xf6b   : > { %5121 = vmatmul.mubr.msk.bf16.vlgmr.msra.gmra.mrb[56].mxu0 %vm1688_vm5, %v1356_v12 }
 0xf6c   : > { %5131 = vmatpush3.bf16.msra.mxu0 %v2998_v30  ;;  %5132 = vmatprep.mubr.msk.bf16.mxu0 %vm5554_vm4, %v5553_v5 }
 0xf6d   : > { %5142 = vmatprep.subr.bf16.mxu0 %v5553_v5 }
 0xf6e   : > { %v3050_v62 = vpop.permute.xlu0 %3049 }
 0xf6f   : > { %v3055_v48 = vsel %vm1688_vm5, %v3050_v62, 0 }
 0xf72   : > { %v3047_v63 = vpop.permute.xlu0 %3046 }
 0xf84   : > { %v2790_v24 = vpop.trf.xlu0 }
0x102d   : > { %v2645_v22 = vpop.f32.mrb[48].mxu0 }
0x102e   : > { %v5098_v33 = vpop.f32.mrb[49].mxu0 }
0x102f   : > { %v2648_v35 = vpop.f32.mrb[50].mxu0 }
0x1030   : > { %v2654_v29 = vpack.c.bf16 %v2648_v35, %v2645_v22  ;;  %v5099_v36 = vpop.f32.mrb[51].mxu0 }
0x1032   : > { %2655 = vst.msk [vmem:[#allocation5 + $0x10] sm:$0xff] %vm1688_vm5, %v2654_v29 }
0x1036   : > { %v6204_v8 = vpop.f32.mrb[52].mxu0 }
0x1037   : > { %v5110_v37 = vpop.f32.mrb[53].mxu0 }
0x1038   : > { %v2778_v13 = vpop.f32.mrb[54].mxu0 }
0x1039   : > { %v5111_v41 = vpop.f32.mrb[55].mxu0 }
0x103e   : > { %v2902_v20 = vpop.f32.mrb[56].mxu0 }
0x103f   : > { %v5122_v42 = vpop.f32.mrb[57].mxu0  ;;  %v2908_v43 = vsel %vm1735_vm7, %v2902_v20, -inf }
0x1040   : > { %2909 = vmax.xlane.f32.xlu1 %v2908_v43  ;;  %v2905_v44 = vpop.f32.mrb[58].mxu0 }
0x1041   : > { %v5123_v45 = vpop.f32.mrb[59].mxu0 }
0x10cd   : > { %v2910_v47 = vpop.xlane.xlu1 %2909 }
0x10ce   : > { %v2911_v50 = vrot.slane %v2910_v47, 4 }
0x10d0   : > { %v2912_v51 = vmax.f32 %v2910_v47, %v2911_v50 }
0x10d2   : > { %v2913_v52 = vrot.slane %v2912_v51, 2 }
0x10d4   : > { %v2914_v49 = vmax.f32 %v2912_v51, %v2913_v52 }
0x10d6   : > { %v2915_v54 = vrot.slane %v2914_v49, 1 }
0x10d8   : > { %v2916_v57 = vmax.f32 %v2914_v49, %v2915_v54 }
0x10da   : > { %v2917_v58 = vsub.f32 %v2902_v20, %v2916_v57 }
0x10dc   : > { %v2918_v59 = vmul.f32 1.442695, %v2917_v58 }
0x10de   : > { %5403 = vpow2.f32 %v2918_v59 }
0x10e8   : > { %v6207_v60 = vpop.eup %5403 }
0x10e9   : > { %v6211_v61 = vsel %vm1735_vm7, %v6207_v60, 0.0 }
0x10ea   : > { %2921 = vadd.xlane.f32.xlu1 %v6211_v61  ;;  %v2925_v43 = vrot.slane %v6211_v61, 4 }
0x10ec   : > { %v2926_v47 = vadd.f32 %v2925_v43, %v6211_v61  ;;  %v5307_v43 = vld [vmem:[%s5801_s23 + $0x20] sm:$0xff]  }
0x10ee   : > { %v2927_v52 = vrot.slane %v2926_v47, 2 }
0x10f0   : > { %v2928_v54 = vadd.f32 %v2927_v52, %v2926_v47  ;;  %v5310_v47 = vld [vmem:[%s5801_s23 + $0x70] sm:$0xff]   ;;  %v5313_v52 = vld [vmem:[%s5801_s23 + $0x38] sm:$0xff]  }
0x10f2   : > { %v2929_v57 = vrot.slane %v2928_v54, 1 }
0x10f4   : > { %v2930_v59 = vadd.f32 %v2929_v57, %v2928_v54  ;;  %v5314_v54 = vld [vmem:[%s5792_s3 + $0xc0] sm:$0xff]  }
0x10f5   : > { %v5315_v57 = vld [vmem:[%s5792_s3 + $0x80] sm:$0xff]  }
0x10fb   : > { %2799 = vrot.lane.b32.xlu1 %v6124_v39, %s5555_s5 }
0x1177   : > { %v2922_v38 = vpop.xlane.xlu1 %2921 }
0x1178   : > { %5405 = vrcp.f32 %v2922_v38 }
0x117b   : > { %v2800_v0 = vpop.permute.xlu1 %2799 }
0x117c   : > { %v2805_v1 = vsel %vm1826_vm6, %v2800_v0, 0 }
0x117d   : > { %5113 = vmatpush3.bf16.msra.mxu1 %v2805_v1 }
0x117e   : > { %5124 = vmatprep.subr.bf16.mxu1 %v5553_v5 }
0x1180   : > { %5115 = vmatmul.mubr.msk.bf16.vlgmr.msra.gmra.mrb[44].mxu1 %vm1822_vm9, %v2790_v24  ;;  %v4852_v24 = vpack.c.bf16 %v6054_v2, %v6054_v2 }
0x1181   : > { %5125 = vmatpush3.bf16.msra.mxu1 %v5985_v32  ;;  %5126 = vmatprep.mubr.msk.bf16.mxu1 %vm5554_vm4, %v5553_v5 }
0x1182   : > { %v5406_v7 = vpop.eup %5405  ;;  %5136 = vmatprep.subr.bf16.mxu1 %v5553_v5 }
0x1183   : > { %v2924_v39 = vmul.f32 %v5406_v7, %v6207_v60  ;;  %v4854_v7 = vpack.c.bf16 %v6204_v8, %v6204_v8 }
0x1185   : > { %v2933_v3 = vpack.c.bf16 %v2924_v39, %v2924_v39  ;;  %v5283_v39 = vld [vmem:[%s5792_s3 + $0x8] sm:$0xff]  }
0x1188   : > { %5127 = vmatmul.mubr.msk.bf16.vlgmr.msra.gmra.mrb[48].mxu1 %vm1735_vm7, %v2933_v3  ;;  %v5284_v3 = vld [vmem:[%s5792_s3 + $0x50] sm:$0xff]  }
0x1189   : > { %5138 = vmatprep.mubr.msk.bf16.mxu1 %vm5554_vm4, %v5553_v5 }
0x118a   : > { %5137 = vmatpush3.bf16.xpose.msra.mxu1 %v3055_v48  ;;  %v5285_v48 = vld [vmem:[%s5792_s3 + $0x10] sm:$0xff]  }
0x118b   : > { %5148 = vmatprep.subr.bf16.mxu1 %v5553_v5 }
0x1191   : > { %5139 = vmatmul.mubr.msk.bf16.vlgmr.msra.gmra.mrb[52].mxu1 %vm1688_vm5, %v3047_v63  ;;  %v4853_v63 = vpack.c.bf16 %v6133_v6, %v6133_v6 }
0x1192   : > { %5150 = vmatprep.mubr.msk.bf16.mxu1 %vm5554_vm4, %v5553_v5 }
0x1253   : > { %v6232_v9 = vpop.f32.mrb[44].mxu1 }
0x1254   : > { %v5116_v10 = vpop.f32.mrb[45].mxu1 }
0x1255   : > { %v6234_v11 = vpop.f32.mrb[46].mxu1  ;;  %v5286_v10 = vld [vmem:[%s5792_s3 + $0x58] sm:$0xff]  }
0x1256   : > { %v2856_v12 = vpack.c.bf16 %v6234_v11, %v6232_v9  ;;  %v5117_v46 = vpop.f32.mrb[47].mxu1 }
0x1257   : > { %v5287_v46 = vld [vmem:[%s5792_s3 + $0x18] sm:$0xff]  }
0x125b   : > { %v2971_v16 = vpop.f32.mrb[48].mxu1 }
0x125c   : > { %v3041_v18 = vpack.c.bf16 %v2971_v16, %v2971_v16  ;;  %v5128_v19 = vpop.f32.mrb[49].mxu1  ;;  %v5288_v16 = vld [vmem:[%s5792_s3 + $0x60] sm:$0xff]  }
0x125d   : > { %v2974_v21 = vpop.f32.mrb[50].mxu1  ;;  %v5289_v19 = vld [vmem:[%s5792_s3 + $0x20] sm:$0xff]  }
0x125e   : > { %3042 = vst.msk [vmem:[#allocation4 + $0xc] sm:$0xf] %vm1872_vm8, %v3041_v18  ;;  %v5129_v4 = vpop.f32.mrb[51].mxu1  ;;  %v5290_v21 = vld [vmem:[%s5792_s3 + $0x68] sm:$0xff]  }
0x1264   : > { %v3091_v23 = vpop.f32.mrb[52].mxu1 }
0x1265   : > { %v5140_v25 = vpop.f32.mrb[53].mxu1  ;;  %v3097_v17 = vsel %vm1735_vm7, %v3091_v23, -inf }
0x1266   : > { %3098 = vmax.xlane.f32.xlu1 %v3097_v17  ;;  %v3094_v15 = vpop.f32.mrb[54].mxu1  ;;  %v5294_v25 = vld [vmem:[%s5792_s3 + $0x70] sm:$0xff]  }
0x1267   : > { %v5141_v14 = vpop.f32.mrb[55].mxu1 }
0x1277   : > { %3124 = vrot.lane.b32.xlu1 %v5985_v32, %s5555_s5 }
0x127b   : > { %3188 = vrot.lane.b32.xlu1 %v6195_v28, %s5555_s5 }
0x12f3   : > { %v3099_v26 = vpop.xlane.xlu1 %3098 }
0x12f4   : > { %v3100_v27 = vrot.slane %v3099_v26, 4 }
0x12f6   : > { %v3101_v30 = vmax.f32 %v3099_v26, %v3100_v27  ;;  %v5295_v26 = vld [vmem:[%s5792_s3 + $0x30] sm:$0xff]   ;;  %v5296_v27 = vld [vmem:[%s5792_s3 + $0x78] sm:$0xff]  }
0x12f7   : > { %v3125_v22 = vpop.permute.xlu1 %3124 }
0x12f8   : > { %v3102_v33 = vrot.slane %v3101_v30, 2 }
0x12fa   : > { %v3103_v35 = vmax.f32 %v3101_v30, %v3102_v33  ;;  %v5298_v33 = vld [vmem:[%s5801_s23 + $0x40] sm:$0xff]  }
0x12fb   : > { %v3189_v29 = vpop.permute.xlu1 %3188 }
0x12fc   : > { %v3104_v36 = vrot.slane %v3103_v35, 1  ;;  %v3194_v37 = vsel %vm1826_vm6, %v3189_v29, 0 }
0x12fd   : > { %5149 = vmatpush3.bf16.msra.mxu1 %v3194_v37 }
0x12fe   : > { %v3105_v13 = vmax.f32 %v3103_v35, %v3104_v36  ;;  %v5299_v35 = vld [vmem:[%s5801_s23] sm:$0xff]   ;;  %v5300_v36 = vld [vmem:[%s5801_s23 + $0x48] sm:$0xff]   ;;  %4927 = vmatprep.subr.bf16.mxu1 %v5314_v54  ;;  %v5346_v54 = vld [vmem:[%s5801_s23 + $0xf8] sm:$0xff]  }
0x1300   : > { %v3106_v41 = vsub.f32 %v3091_v23, %v3105_v13  ;;  %v5291_v23 = vld [vmem:[%s5792_s3 + $0x28] sm:$0xff]  }
0x1301   : > { %v5301_v13 = vld [vmem:[%s5801_s23 + $0x8] sm:$0xff]  }
0x1302   : > { %v3107_v20 = vmul.f32 1.442695, %v3106_v41  ;;  %v5302_v41 = vld [vmem:[%s5801_s23 + $0x50] sm:$0xff]  }
0x1304   : > { %5407 = vpow2.f32 %v3107_v20  ;;  %v5303_v20 = vld [vmem:[%s5801_s23 + $0x10] sm:$0xff]  }
0x130e   : > { %v5408_v42 = vpop.eup %5407 }
0x130f   : > { %v3109_v32 = vsel %vm1735_vm7, %v5408_v42, 0.0 }
0x1310   : > { %3110 = vadd.xlane.f32.xlu0 %v3109_v32  ;;  %v3114_v28 = vrot.slane %v3109_v32, 4 }
0x1312   : > { %v3115_v44 = vadd.f32 %v3114_v28, %v3109_v32  ;;  %v5305_v32 = vld [vmem:[%s5801_s23 + $0x18] sm:$0xff]   ;;  %v5306_v28 = vld [vmem:[%s5801_s23 + $0x60] sm:$0xff]  }
0x1314   : > { %v3116_v45 = vrot.slane %v3115_v44, 2 }
0x1316   : > { %v3117_v50 = vadd.f32 %v3116_v45, %v3115_v44  ;;  %v5308_v44 = vld [vmem:[%s5801_s23 + $0x68] sm:$0xff]  }
0x1317   : > { %v5309_v45 = vld [vmem:[%s5801_s23 + $0x28] sm:$0xff]  }
0x1318   : > { %v3118_v51 = vrot.slane %v3117_v50, 1 }
0x131a   : > { %v3119_v49 = vadd.f32 %v3118_v51, %v3117_v50  ;;  %v5311_v50 = vld [vmem:[%s5801_s23 + $0x30] sm:$0xff]   ;;  %v5312_v51 = vld [vmem:[%s5801_s23 + $0x78] sm:$0xff]  }
0x131c   : > { %5409 = vrcp.f32 %v3119_v49 }
0x131d   : > { %5411 = vrcp.f32 %v2930_v59  ;;  %v5317_v59 = vld [vmem:[%s5792_s3 + $0x88] sm:$0xff]  }
0x1326   : > { %v5410_v58 = vpop.eup %5409 }
0x1327   : > { %v3121_v62 = vmul.f32 %v5410_v58, %v5408_v42  ;;  %v5412_v0 = vpop.eup %5411  ;;  %v5316_v58 = vld [vmem:[%s5792_s3 + $0xc8] sm:$0xff]  }
0x1328   : > { %v2932_v61 = vmul.f32 %v5412_v0, %v6207_v60  ;;  %v5282_v60 = vld [vmem:[%s5792_s3 + $0x48] sm:$0xff]   ;;  %v5321_v0 = vld [vmem:[%s5792_s3 + $0x98] sm:$0xff]  }
0x1329   : > { %v3170_v38 = vpack.c.bf16 %v3121_v62, %v3121_v62  ;;  %v5318_v62 = vld [vmem:[%s5792_s3 + $0xd0] sm:$0xff]  }
0x132a   : > { %v2977_v1 = vpack.c.bf16 %v2932_v61, %v2932_v61  ;;  %v5322_v61 = vld [vmem:[%s5792_s3 + $0xe0] sm:$0xff]  }
0x132b   : > { %3171 = vxpose.xlu1.c.b16.start.end [1/1] (short) (narrow) %v3170_v38, 16  ;;  %v5319_v38 = vld [vmem:[%s5792_s3 + $0x90] sm:$0xff]  }
0x132f   : > { %2463 = vrot.lane.b32.xlu1 %v4853_v63, %s5555_s5  ;;  %v5320_v63 = vld [vmem:[%s5792_s3 + $0xd8] sm:$0xff]  }
0x133d   : > { %2978 = vxpose.xlu0.c.b16.start.end [1/1] (short) (narrow) %v2977_v1, 16  ;;  %v5323_v1 = vld [vmem:[%s5792_s3 + $0xa0] sm:$0xff]  }
0x1346   : > { %2072 = vrot.lane.b32.xlu0 %v4852_v24, %s5555_s5  ;;  %v5324_v24 = vld [vmem:[%s5792_s3 + $0xe8] sm:$0xff]  }
0x134a   : > { %2852 = vrot.lane.b32.xlu0 %v4854_v7, %s5555_s5  ;;  %v5325_v7 = vld [vmem:[%s5792_s3 + $0xa8] sm:$0xff]  }
0x134e   : > { %2469 = vrot.lane.b32.xlu0 %v2467_v40, %s5555_s5 }
0x1352   : > { %2079 = vrot.lane.b32.xlu0 %v2077_v56, %s5555_s5  ;;  %v5281_v56 = vld [vmem:[%s5792_s3] sm:$0xff]  }
0x1391   : > { %v3179_v6 = vpop.trf.xlu1 }
0x1392   : > { %5151 = vmatmul.mubr.msk.bf16.vlgmr.msra.gmra.mrb[56].mxu1 %vm1822_vm9, %v3179_v6 }
0x1393   : > { %4928 = vmatpush3.bf16.msra.mxu1 %v5315_v57  ;;  %v5347_v57 = vld [vmem:[%s5801_s23 + $0xb8] sm:$0xff]  }
0x1394   : > { %4929 = vmatprep.subr.bf16.mxu1 %v5316_v58 }
0x1397   : > { %4930 = vmatpush3.bf16.msra.mxu1 %v5317_v59  ;;  %v5348_v59 = vld [vmem:[%s5811_s24] sm:$0xff]  }
0x1398   : > { %4931 = vmatprep.subr.bf16.mxu1 %v5318_v62  ;;  %v5349_v62 = vld [vmem:[%s5811_s24 + $0x8] sm:$0xff]  }
0x139b   : > { %4932 = vmatpush3.bf16.msra.mxu1 %v5319_v38 }
0x139c   : > { %4933 = vmatprep.subr.bf16.mxu1 %v5320_v63 }
0x139d   : > { %v3111_v2 = vpop.xlane.xlu0 %3110 }
0x139e   : > { %5413 = vrcp.f32 %v3111_v2 }
0x139f   : > { %4934 = vmatpush3.bf16.msra.mxu1 %v5321_v0 }
0x13a0   : > { %4935 = vmatprep.subr.bf16.mxu1 %v5322_v61 }
0x13a1   : > { %v2464_v8 = vpop.permute.xlu1 %2463 }
0x13a2   : > { %2466 = vst.msk [vmem:[#allocation4 + $0x4] sm:$0xf] %vm2075_vm10, %v2464_v8 }
0x13a3   : > { %v2986_v34 = vpop.trf.xlu0  ;;  %4936 = vmatpush3.bf16.msra.mxu1 %v5323_v1 }
0x13a4   : > { %5133 = vmatmul.mubr.msk.bf16.vlgmr.msra.gmra.mrb[60].mxu0 %vm1822_vm9, %v2986_v34  ;;  %4937 = vmatprep.subr.bf16.mxu1 %v5324_v24 }
0x13a5   : > { %5143 = vmatpush3.bf16.msra.mxu0 %v3125_v22  ;;  %5144 = vmatprep.mubr.msk.bf16.mxu0 %vm5554_vm4, %v5553_v5  ;;  %v5297_v22 = vld [vmem:[%s5792_s3 + $0x38] sm:$0xff]  }
0x13a6   : > { %4905 = vmatprep.subr.bf16.mxu0 %v5280_v31 }
0x13a7   : > { %4938 = vmatpush3.bf16.msra.mxu1 %v5325_v7 }
0x13a8   : > { %v5414_v53 = vpop.eup %5413 }
0x13a9   : > { %v3113_v55 = vmul.f32 %v5414_v53, %v5408_v42  ;;  %v5304_v42 = vld [vmem:[%s5801_s23 + $0x58] sm:$0xff]   ;;  %v5326_v53 = vld [vmem:[%s5792_s3 + $0xf0] sm:$0xff]  }
0x13aa   : > { %4939 = vmatprep.subr.bf16.mxu1 %v5326_v53  ;;  %v5351_v53 = vld [vmem:[%s5840_s8 + $0x8] sm:$0xff]  }
0x13ab   : > { %v3122_v40 = vpack.c.bf16 %v3113_v55, %v3113_v55  ;;  %v5327_v55 = vld [vmem:[%s5792_s3 + $0xb0] sm:$0xff]  }
0x13ac   : > { %4940 = vmatpush3.bf16.msra.mxu1 %v5327_v55  ;;  %v5352_v55 = vld [vmem:[%s5840_s8 + $0x10] sm:$0xff]  }
0x13ad   : > { %5145 = vmatmul.mubr.msk.bf16.vlgmr.msra.gmra.mrb[64].mxu0 %vm1735_vm7, %v3122_v40 }
0x13ae   : > { %4906 = vmatpush3.bf16.msra.mxu0 %v5281_v56 }
0x13af   : > { %4907 = vmatprep.subr.bf16.mxu0 %v5282_v60 }
0x13b2   : > { %4908 = vmatpush3.bf16.msra.mxu0 %v5283_v39 }
0x13b3   : > { %4909 = vmatprep.subr.bf16.mxu0 %v5284_v3 }
0x13b6   : > { %4910 = vmatpush3.bf16.msra.mxu0 %v5285_v48  ;;  %v5328_v48 = vld [vmem:[%s5792_s3 + $0xf8] sm:$0xff]  }
0x13b7   : > { %4911 = vmatprep.subr.bf16.mxu0 %v5286_v10  ;;  %v5329_v10 = vld [vmem:[%s5792_s3 + $0xb8] sm:$0xff]   ;;  %4941 = vmatprep.subr.bf16.mxu1 %v5328_v48  ;;  %s6639_s3 = scalar_lea.vmem %s6545_s9, %s5758_s25 }
0x13b8   : > { %v2073_v18 = vpop.permute.xlu0 %2072  ;;  %4942 = vmatpush3.bf16.msra.mxu1 %v5329_v10  ;;  %v4782_v7 = vld [vmem:[%s6639_s3] ss:$0 sm:$0xff] }
0x13b9   : > { %2076 = vst.msk [vmem:[#allocation4] sm:$0xf] %vm2075_vm10, %v2073_v18 }
0x13ba   : > { %4912 = vmatpush3.bf16.msra.mxu0 %v5287_v46  ;;  %v5332_v46 = vld [vmem:[%s5801_s23 + $0xc0] sm:$0xff]  }
0x13bb   : > { %4913 = vmatprep.subr.bf16.mxu0 %v5288_v16  ;;  %4971 = vmatprep.subr.bf16.mxu1 %v5332_v46  ;;  %v5422_v46 = vld [vmem:[#allocation3] sm:$0xff] }
0x13bc   : > { %v2853_v4 = vpop.permute.xlu0 %2852 }
0x13bd   : > { %2855 = vst.msk [vmem:[#allocation4 + $0x8] sm:$0xf] %vm2075_vm10, %v2853_v4 }
0x13be   : > { %4914 = vmatpush3.bf16.msra.mxu0 %v5289_v19 }
0x13bf   : > { %4915 = vmatprep.subr.bf16.mxu0 %v5290_v21 }
0x13c0   : > { %v2470_v17 = vpop.permute.xlu0 %2469  ;;  %v3251_v15 = vld [vmem:[#allocation4] sm:$0xff] }
0x13c1   : > { %2472 = vst.msk [vmem:[#allocation5 + $0x8] sm:$0xff] %vm2082_vm11, %v2470_v17  ;;  %v4747_v14 = vcombine.high %v3251_v15, %v3251_v15  ;;  %v4746_v29 = vcombine.low %v3251_v15, %v3251_v15 }
0x13c2   : > { %4916 = vmatpush3.bf16.msra.mxu0 %v5291_v23 }
0x13c3   : > { %3555 = vmatprep.mubr.bf16.mxu0 %v4747_v14  ;;  %4917 = vmatprep.subr.bf16.mxu0 %v5294_v25 }
0x13c4   : > { %v2080_v30 = vpop.permute.xlu0 %2079 }
0x13c5   : > { %2083 = vst.msk [vmem:[#allocation5] sm:$0xff] %vm2082_vm11, %v2080_v30 }
0x13c6   : > { %4918 = vmatpush3.bf16.msra.mxu0 %v5295_v26 }
0x13c7   : > { %4919 = vmatprep.subr.bf16.mxu0 %v5296_v27 }
0x13c8   : > { %v3613_v37 = vld [vmem:[#allocation5 + $0x8] sm:$0xff] }
0x13ca   : > { %4920 = vmatpush3.bf16.msra.mxu0 %v5297_v22 }
0x13cb   : > { %4949 = vmatprep.subr.bf16.mxu0 %v5298_v33 }
0x13cc   : > { %v3612_v49 = vld [vmem:[#allocation5] sm:$0xff] }
0x13cd   : > { %3556 = vmatmul.mubr.bf16.vlgmr.msra.gmra.mrb[68].mxu0 %v4746_v29 }
0x13ce   : > { %4950 = vmatpush3.bf16.msra.mxu0 %v5299_v35  ;;  %3904 = vmatprep.mubr.bf16.mxu0 %v3613_v37 }
0x13cf   : > { %4951 = vmatprep.subr.bf16.mxu0 %v5300_v36 }
0x13d2   : > { %4952 = vmatpush3.bf16.msra.mxu0 %v5301_v13  ;;  %v5333_v13 = vld [vmem:[%s5801_s23 + $0x80] sm:$0xff]  }
0x13d3   : > { %4953 = vmatprep.subr.bf16.mxu0 %v5302_v41  ;;  %v5334_v41 = vld [vmem:[%s5801_s23 + $0xc8] sm:$0xff]  }
0x13d6   : > { %4954 = vmatpush3.bf16.msra.mxu0 %v5303_v20 }
0x13d7   : > { %4955 = vmatprep.subr.bf16.mxu0 %v5304_v42  ;;  %v5335_v42 = vld [vmem:[%s5801_s23 + $0x88] sm:$0xff]  }
0x13da   : > { %4956 = vmatpush3.bf16.msra.mxu0 %v5305_v32  ;;  %v5336_v32 = vld [vmem:[%s5801_s23 + $0xd0] sm:$0xff]  }
0x13db   : > { %4957 = vmatprep.subr.bf16.mxu0 %v5306_v28  ;;  %v5337_v28 = vld [vmem:[%s5801_s23 + $0x90] sm:$0xff]  }
0x13de   : > { %4958 = vmatpush3.bf16.msra.mxu0 %v5307_v43  ;;  %v5338_v43 = vld [vmem:[%s5801_s23 + $0xd8] sm:$0xff]  }
0x13df   : > { %4959 = vmatprep.subr.bf16.mxu0 %v5308_v44  ;;  %v5339_v44 = vld [vmem:[%s5801_s23 + $0x98] sm:$0xff]  }
0x13e2   : > { %4960 = vmatpush3.bf16.msra.mxu0 %v5309_v45  ;;  %v5340_v45 = vld [vmem:[%s5801_s23 + $0xe0] sm:$0xff]  }
0x13e3   : > { %4961 = vmatprep.subr.bf16.mxu0 %v5310_v47  ;;  %v5341_v47 = vld [vmem:[%s5801_s23 + $0xa0] sm:$0xff]  }
0x13e6   : > { %4962 = vmatpush3.bf16.msra.mxu0 %v5311_v50  ;;  %v5342_v50 = vld [vmem:[%s5801_s23 + $0xe8] sm:$0xff]  }
0x13e7   : > { %4963 = vmatprep.subr.bf16.mxu0 %v5312_v51  ;;  %v5343_v51 = vld [vmem:[%s5801_s23 + $0xa8] sm:$0xff]  }
0x13ea   : > { %4964 = vmatpush3.bf16.msra.mxu0 %v5313_v52  ;;  %v5344_v52 = vld [vmem:[%s5801_s23 + $0xf0] sm:$0xff]  }
0x13eb   : > { %5154 = vmatprep.subr.bf16.mxu0 %v5553_v5 }
0x13ed   : > { %3905 = vmatmul.mubr.bf16.vlgmr.msra.gmra.mrb[72].mxu0 %v3612_v49  ;;  %v5345_v49 = vld [vmem:[%s5801_s23 + $0xb0] sm:$0xff]  }
0x13ee   : > { %5158 = vmatprep.mubr.msk.bf16.mxu0 %vm5554_vm4, %v5553_v5  ;;  %5155 = vmatpush3.bf16.msra.mxu0 %v5348_v59 }
0x13ef   : > { %5156 = vmatprep.subr.bf16.mxu0 %v5553_v5 }
0x13f2   : > { %5157 = vmatpush3.bf16.msra.mxu0 %v5349_v62 }
0x13f3   : > { %5174 = vmatprep.subr.bf16.mxu0 %v5553_v5 }
0x1465   : > { %v3230_v6 = vpop.f32.mrb[56].mxu1 }
0x1466   : > { %v5152_v2 = vpop.f32.mrb[57].mxu1 }
0x1467   : > { %v3233_v8 = vpop.f32.mrb[58].mxu1 }
0x1468   : > { %v3245_v31 = vpack.c.bf16 %v3233_v8, %v3230_v6  ;;  %v5153_v34 = vpop.f32.mrb[59].mxu1  ;;  %v5421_v6 = vld [vmem:[#allocation2] sm:$0xff] }
0x1477   : > { %v3034_v56 = vpop.f32.mrb[60].mxu0 }
0x1478   : > { %v5134_v40 = vpop.f32.mrb[61].mxu0 }
0x1479   : > { %v3037_v60 = vpop.f32.mrb[62].mxu0 }
0x147a   : > { %v3043_v39 = vpack.c.bf16 %v3037_v60, %v3034_v56  ;;  %v5135_v3 = vpop.f32.mrb[63].mxu0 }
0x147c   : > { %3044 = vst.msk [vmem:[#allocation5 + $0x18] sm:$0xff] %vm1688_vm5, %v3043_v39 }
0x1480   : > { %v3164_v16 = vpop.f32.mrb[64].mxu0 }
0x1481   : > { %v4855_v18 = vpack.c.bf16 %v3164_v16, %v3164_v16  ;;  %v5146_v19 = vpop.f32.mrb[65].mxu0 }
0x1482   : > { %v3167_v21 = vpop.f32.mrb[66].mxu0  ;;  %v4815_v19 = vld [vmem:[%s6640_s28] ss:$0 sm:$0xff] }
0x1483   : > { %3241 = vrot.lane.b32.xlu1 %v4855_v18, %s5555_s5  ;;  %v5147_v4 = vpop.f32.mrb[67].mxu0  ;;  %v5423_v21 = vld [vmem:[#allocation3 + $0x8] sm:$0xff] }
0x1487   : > { %3247 = vrot.lane.b32.xlu1 %v3245_v31, %s5555_s5  ;;  %v5350_v31 = vld [vmem:[%s5840_s8] sm:$0xff]  }
0x148b   : > { %2858 = vrot.lane.b32.xlu1 %v2856_v12, %s5555_s5 }
0x14a0   : > { %v4921_v23 = vpop.f32.mrb[68].mxu0 }
0x14a1   : > { %v4922_v25 = vpop.f32.mrb[69].mxu0 }
0x14a2   : > { %v6335_v17 = vadd.f32 %v4922_v25, %v4921_v23  ;;  %v4924_v15 = vpop.f32.mrb[70].mxu0 }
0x14a3   : > { %v4925_v14 = vpop.f32.mrb[71].mxu0  ;;  %v5353_v15 = vld [vmem:[%s5825_s20] sm:$0xff]  }
0x14a4   : > { %v5354_v14 = vld [vmem:[%s5825_s20 + $0x8] sm:$0xff]  }
0x14c0   : > { %v4965_v26 = vpop.f32.mrb[72].mxu0 }
0x14c1   : > { %v4966_v27 = vpop.f32.mrb[73].mxu0 }
0x14c2   : > { %v6337_v30 = vadd.f32 %v4966_v27, %v4965_v26  ;;  %v4968_v22 = vpop.f32.mrb[74].mxu0  ;;  %v5355_v26 = vld [vmem:[%s5825_s20 + $0x10] sm:$0xff]   ;;  %v5356_v27 = vld [vmem:[%s5825_s20 + $0x18] sm:$0xff]  }
0x14c3   : > { %v4969_v33 = vpop.f32.mrb[75].mxu0 }
0x14c4   : > { %v6339_v35 = vadd.f32 %v4969_v33, %v4968_v22 }
0x14f5   : > { %v3242_v29 = vpop.permute.xlu1 %3241 }
0x14f6   : > { %3244 = vst.msk [vmem:[#allocation4 + $0xc] sm:$0xf] %vm2075_vm10, %v3242_v29 }
0x14f9   : > { %v3248_v9 = vpop.permute.xlu1 %3247 }
0x14fa   : > { %3250 = vst.msk [vmem:[#allocation5 + $0x18] sm:$0xff] %vm2082_vm11, %v3248_v9 }
0x14fd   : > { %v2859_v11 = vpop.permute.xlu1 %2858  ;;  %v3252_v12 = vld [vmem:[#allocation4 + $0x8] sm:$0xff] }
0x14fe   : > { %2861 = vst.msk [vmem:[#allocation5 + $0x10] sm:$0xff] %vm2082_vm11, %v2859_v11  ;;  %v4748_v36 = vcombine.low %v3252_v12, %v3252_v12  ;;  %v4749_v37 = vcombine.high %v3252_v12, %v3252_v12 }
0x1500   : > { %3595 = vmatprep.mubr.bf16.mxu1 %v4749_v37 }
0x1501   : > { %3596 = vmatmul.mubr.bf16.vlgmr.msra.gmra.mrb[60].mxu1 %v4748_v36  ;;  %v3615_v20 = vld [vmem:[#allocation5 + $0x18] sm:$0xff] }
0x1502   : > { %4972 = vmatpush3.bf16.msra.mxu1 %v5333_v13  ;;  %3945 = vmatprep.mubr.bf16.mxu1 %v3615_v20 }
0x1503   : > { %4973 = vmatprep.subr.bf16.mxu1 %v5334_v41  ;;  %v5357_v41 = vld [vmem:[%s5835_s6] sm:$0xff]  }
0x1505   : > { %v3614_v58 = vld [vmem:[#allocation5 + $0x10] sm:$0xff] }
0x1506   : > { %4974 = vmatpush3.bf16.msra.mxu1 %v5335_v42  ;;  %v5358_v42 = vld [vmem:[%s5835_s6 + $0x8] sm:$0xff]  }
0x1507   : > { %4975 = vmatprep.subr.bf16.mxu1 %v5336_v32  ;;  %v5359_v32 = vld [vmem:[%s5835_s6 + $0x10] sm:$0xff]  }
0x150a   : > { %4976 = vmatpush3.bf16.msra.mxu1 %v5337_v28  ;;  %v5360_v28 = vld [vmem:[%s5835_s6 + $0x18] sm:$0xff]  }
0x150b   : > { %4977 = vmatprep.subr.bf16.mxu1 %v5338_v43  ;;  %v4826_v43 = vld [vmem:[%s986_s0] ss:$0 sm:$0xff] }
0x150e   : > { %4978 = vmatpush3.bf16.msra.mxu1 %v5339_v44 }
0x150f   : > { %4979 = vmatprep.subr.bf16.mxu1 %v5340_v45 }
0x1512   : > { %4980 = vmatpush3.bf16.msra.mxu1 %v5341_v47 }
0x1513   : > { %4981 = vmatprep.subr.bf16.mxu1 %v5342_v50 }
0x1516   : > { %4982 = vmatpush3.bf16.msra.mxu1 %v5343_v51 }
0x1517   : > { %4983 = vmatprep.subr.bf16.mxu1 %v5344_v52 }
0x151a   : > { %4984 = vmatpush3.bf16.msra.mxu1 %v5345_v49 }
0x151b   : > { %4985 = vmatprep.subr.bf16.mxu1 %v5346_v54 }
0x151e   : > { %4986 = vmatpush3.bf16.msra.mxu1 %v5347_v57 }
0x151f   : > { %5162 = vmatprep.subr.bf16.mxu1 %v5553_v5 }
0x1521   : > { %3946 = vmatmul.mubr.bf16.vlgmr.msra.gmra.mrb[64].mxu1 %v3614_v58 }
0x1522   : > { %5170 = vmatprep.mubr.msk.bf16.mxu1 %vm5554_vm4, %v5553_v5  ;;  %5163 = vmatpush3.bf16.msra.mxu1 %v5353_v15 }
0x1523   : > { %5164 = vmatprep.subr.bf16.mxu1 %v5553_v5 }
0x1526   : > { %5165 = vmatpush3.bf16.msra.mxu1 %v5354_v14 }
0x1527   : > { %5166 = vmatprep.subr.bf16.mxu1 %v5553_v5 }
0x152a   : > { %5167 = vmatpush3.bf16.msra.mxu1 %v5355_v26 }
0x152b   : > { %5168 = vmatprep.subr.bf16.mxu1 %v5553_v5 }
0x152e   : > { %5169 = vmatpush3.bf16.msra.mxu1 %v5356_v27 }
0x152f   : > { %5184 = vmatprep.subr.bf16.mxu1 %v5553_v5 }
0x15d4   : > { %v4943_v38 = vpop.f32.mrb[60].mxu1 }
0x15d5   : > { %v4944_v63 = vpop.f32.mrb[61].mxu1 }
0x15d6   : > { %v4945_v0 = vadd.f32 %v4944_v63, %v4943_v38  ;;  %v4946_v61 = vpop.f32.mrb[62].mxu1 }
0x15d7   : > { %v4947_v1 = vpop.f32.mrb[63].mxu1 }
0x15d8   : > { %v3598_v24 = vadd.f32 %v4945_v0, %v6335_v17  ;;  %v4820_v1 = vld [vmem:[%s6644_s27] ss:$0 sm:$0xff] }
0x15da   : > { %v3603_v2 = vadd.f32 %v5421_v6, %v3598_v24 }
0x15dc   : > { %v6372_v8 = vadd.f32 %v4782_v7, %v3603_v2 }
0x15de   : > { %v3965_v34 = vpack.c.bf16 %v6372_v8, %v6372_v8 }
0x15e0   : > { %5159 = vmatmul.mubr.msk.bf16.vlgmr.msra.gmra.mrb[76].mxu0 %vm1013_vm2, %v3965_v34 }
0x15e1   : > { %5175 = vmatpush3.bf16.msra.mxu0 %v5350_v31  ;;  %5180 = vmatprep.mubr.msk.bf16.mxu0 %vm5554_vm4, %v5553_v5 }
0x15e2   : > { %5176 = vmatprep.subr.bf16.mxu0 %v5553_v5 }
0x15e5   : > { %5177 = vmatpush3.bf16.msra.mxu0 %v5351_v53  ;;  %v4831_v53 = vld [vmem:[%s994_s2] ss:$0 sm:$0xff] }
0x15e6   : > { %5178 = vmatprep.subr.bf16.mxu0 %v5553_v5 }
0x15e9   : > { %5179 = vmatpush3.bf16.msra.mxu0 %v5352_v55 }
0x15f4   : > { %v4987_v56 = vpop.f32.mrb[64].mxu1 }
0x15f5   : > { %v4988_v40 = vpop.f32.mrb[65].mxu1 }
0x15f6   : > { %v4989_v60 = vadd.f32 %v4988_v40, %v4987_v56  ;;  %v4990_v39 = vpop.f32.mrb[66].mxu1 }
0x15f7   : > { %v4991_v3 = vpop.f32.mrb[67].mxu1 }
0x15f8   : > { %v3948_v48 = vadd.f32 %v4989_v60, %v6337_v30  ;;  %v4992_v10 = vadd.f32 %v4991_v3, %v4990_v39  ;;  %v4816_v30 = vld [vmem:[%s6642_s7] ss:$0 sm:$0xff] }
0x15fa   : > { %v3954_v16 = vadd.f32 %v5422_v46, %v3948_v48  ;;  %v3951_v18 = vadd.f32 %v4992_v10, %v6339_v35 }
0x15fc   : > { %v3955_v4 = vadd.f32 %v5423_v21, %v3951_v18  ;;  %v6391_v23 = vadd.f32 %v4815_v19, %v3954_v16 }
0x15fe   : > { %v6393_v25 = vadd.f32 %v4815_v19, %v3955_v4 }
0x1600   : > { %v4121_v17 = vpack.c.bf16 %v6393_v25, %v6391_v23 }
0x1602   : > { %5181 = vmatmul.mubr.msk.bf16.vlgmr.msra.gmra.mrb[80].mxu0 %vm1045_vm3, %v4121_v17 }
0x16b3   : > { %v4026_v22 = vpop.f32.mrb[76].mxu0 }
0x16b4   : > { %v4027_v33 = vadd.f32 %v4816_v30, %v4026_v22  ;;  %v5160_v35 = vpop.f32.mrb[77].mxu0 }
0x16b5   : > { %v4029_v29 = vpop.f32.mrb[78].mxu0 }
0x16b6   : > { %v4033_v9 = vmul.f32 0.70710677, %v4027_v33  ;;  %v5161_v11 = vpop.f32.mrb[79].mxu0  ;;  %v4032_v36 = vmul.f32 0.5, %v4027_v33 }
0x16b8   : > { %5415 = verf.f32 %v4033_v9 }
0x16c2   : > { %v5416_v12 = vpop.eup %5415 }
0x16c3   : > { %v4035_v37 = vadd.f32 1.0, %v5416_v12 }
0x16c5   : > { %v4036_v13 = vmul.f32 %v4035_v37, %v4032_v36 }
0x16c7   : > { %v4037_v20 = vpack.c.bf16 %v4036_v13, %v4036_v13 }
0x16c9   : > { %5171 = vmatmul.mubr.msk.bf16.vlgmr.msra.gmra.mrb[68].mxu1 %vm1688_vm5, %v4037_v20 }
0x16ca   : > { %5185 = vmatpush3.bf16.msra.mxu1 %v5357_v41  ;;  %5192 = vmatprep.mubr.msk.bf16.mxu1 %vm5554_vm4, %v5553_v5 }
0x16cb   : > { %5186 = vmatprep.subr.bf16.mxu1 %v5553_v5 }
0x16ce   : > { %5187 = vmatpush3.bf16.msra.mxu1 %v5358_v42 }
0x16cf   : > { %5188 = vmatprep.subr.bf16.mxu1 %v5553_v5 }
0x16d2   : > { %5189 = vmatpush3.bf16.msra.mxu1 %v5359_v32 }
0x16d3   : > { %5190 = vmatprep.subr.bf16.mxu1 %v5553_v5 }
0x16d5   : > { %v4190_v44 = vpop.f32.mrb[80].mxu0 }
0x16d6   : > { %v4191_v45 = vadd.f32 %v4826_v43, %v4190_v44  ;;  %v5182_v47 = vpop.f32.mrb[81].mxu0  ;;  %5191 = vmatpush3.bf16.msra.mxu1 %v5360_v28 }
0x16d7   : > { %v4193_v50 = vpop.f32.mrb[82].mxu0 }
0x16d8   : > { %v4199_v51 = vmul.f32 0.70710677, %v4191_v45  ;;  %v4194_v52 = vadd.f32 %v4826_v43, %v4193_v50  ;;  %v5183_v49 = vpop.f32.mrb[83].mxu0  ;;  %v4197_v62 = vmul.f32 0.5, %v4191_v45 }
0x16da   : > { %5417 = verf.f32 %v4199_v51  ;;  %v4200_v54 = vmul.f32 0.70710677, %v4194_v52  ;;  %v4198_v38 = vmul.f32 0.5, %v4194_v52 }
0x16dc   : > { %5419 = verf.f32 %v4200_v54 }
0x16e4   : > { %v5418_v57 = vpop.eup %5417 }
0x16e5   : > { %v4203_v58 = vadd.f32 1.0, %v5418_v57 }
0x16e6   : > { %v5420_v59 = vpop.eup %5419 }
0x16e7   : > { %v4204_v63 = vadd.f32 1.0, %v5420_v59  ;;  %v4205_v5 = vmul.f32 %v4203_v58, %v4197_v62 }
0x16e9   : > { %v4206_v0 = vmul.f32 %v4204_v63, %v4198_v38 }
0x16eb   : > { %v4207_v61 = vpack.c.bf16 %v4206_v0, %v4205_v5 }
0x16ed   : > { %5193 = vmatmul.mubr.msk.bf16.vlgmr.msra.gmra.mrb[72].mxu1 %vm1688_vm5, %v4207_v61 }
0x179c   : > { %v4114_v24 = vpop.f32.mrb[68].mxu1 }
0x179d   : > { %v4115_v7 = vadd.f32 %v4820_v1, %v4114_v24  ;;  %v5172_v6 = vpop.f32.mrb[69].mxu1 }
0x179e   : > { %v4117_v2 = vpop.f32.mrb[70].mxu1 }
0x179f   : > { %v4120_v31 = vadd.f32 %v4115_v7, %v6372_v8  ;;  %v5173_v34 = vpop.f32.mrb[71].mxu1 }
0x17a1   : > { %4293 = vst.msk [vmem:[#allocation2] sm:$0xff] %vm1013_vm2, %v4120_v31 }
0x17a8   : > { %v4300_v10 = vld [vmem:[#allocation2] sm:$0xff] (!%p4837_p1) }
0x17a9   : > { %4301 = vst.msk [vmem:[%s5848_s15] sm:$0xff] (!%p4837_p1), %vm1013_vm2, %v4300_v10 }
0x17c0   : > { %v4284_v55 = vpop.f32.mrb[72].mxu1 }
0x17c1   : > { %v4285_v56 = vadd.f32 %v4831_v53, %v4284_v55  ;;  %v5194_v40 = vpop.f32.mrb[73].mxu1  ;;  %4299 = sbr.rel (%p4837_p1) target bundleno = 6096 (0x17d0), region = 108 }
0x17c2   : > { %v4287_v60 = vpop.f32.mrb[74].mxu1 }
0x17c3   : > { %v4291_v39 = vadd.f32 %v4285_v56, %v6391_v23  ;;  %v4288_v3 = vadd.f32 %v4831_v53, %v4287_v60  ;;  %v5195_v48 = vpop.f32.mrb[75].mxu1 }
0x17c5   : > { %4294 = vst.msk [vmem:[#allocation3] sm:$0xff] %vm1045_vm3, %v4291_v39  ;;  %v4292_v8 = vadd.f32 %v4288_v3, %v6393_v25 }
0x17c7   : > { %4295 = vst.msk [vmem:[#allocation3 + $0x8] sm:$0xff] %vm1045_vm3, %v4292_v8 }
0x17cc   : > { %v4302_v46 = vld [vmem:[#allocation3] sm:$0xff] }
0x17cd   : > { %4304 = vst.msk [vmem:[%s5852_s10] sm:$0xff] %vm1045_vm3, %v4302_v46 }
0x17ce   : > { %v4303_v16 = vld [vmem:[#allocation3 + $0x8] sm:$0xff] }
0x17cf   : > { %4305 = vst.msk [vmem:[%s5852_s10 + $0x8] sm:$0xff] %vm1045_vm3, %v4303_v16 }
0x17d0 PF: > { %s6647_s25 = sld [smem:[#allocation16_spill]]  ;;  %s6649_s22 = sld [smem:[#allocation43_spill]] }
0x17d1   : > { %s4325_s24 = sshll.u32 %s5848_s15, 4  ;;  %s4307_s8 = scalar_lea.sflag [#allocation7], %s5740_s30  ;;  %s4326_s24 = int_to_ptr.vmem [resolvable:$true] %s4325_s24 }
0x17d2   : > { %s5424_s28 = scalar_lea.vmem %s4326_s24, 128  ;;  %s5556_s21 = smov [#allocation6]  }
0x17d3   : > { %p5425_p2 = scmp.ne.s32.totalorder %s4326_s24, %s5424_s28  ;;  %s5428_s29 = sshll.u32 %s5556_s21, 4  ;;  %s5429_s29 = int_to_ptr.vmem [resolvable:$false] %s5428_s29 }
0x17d4   : > { %s5430_s1 = scalar_lea.vmem %s5429_s29, 256  ;;  %p5431_p6 = scmp.lt.s32.totalorder %s4326_s24, %s5429_s29 }
0x17d5   : > { %p5426_p4 = pnand %p5425_p2, %p5719_p3  ;;  %p5432_p7 = scmp.lt.s32.totalorder %s5430_s1, %s5424_s28 }
0x17d6   : > { %s4840_s14 = sshll.u32 %s6647_s25, 7 }
0x17d7   : > { %s6454_s3 = scalar_lea.hbm %s6649_s22, %s4840_s14  ;;  %p5427_p5 = pneg %p5426_p4 }
0x17d8   : > { %p5433_p8 = por %p5432_p7, %p5431_p6 }
0x17da   : > { %p5434_p10 = pnand %p5433_p8, %p5427_p5 }
0x17dc   : > { %5437 = shalt.err (!%p5434_p10)
}
0x17dd   : > { %s5438_s15 = scalar_lea.hbm %s6454_s3, 128  ;;  %s5442_s16 = scalar_lea.hbm %s6649_s22, 256 }
0x17de   : > { %p5439_p11 = scmp.ne.s32.totalorder %s6454_s3, %s5438_s15  ;;  %p5443_p0 = scmp.lt.u32.totalorder %s6454_s3, %s6649_s22 }
0x17df   : > { %p5444_p1 = scmp.lt.u32.totalorder %s5442_s16, %s5438_s15  ;;  %p5446_p4 = scmp.lt.u32.totalorder %s5438_s15, %s6454_s3 }
0x17e0   : > { %p5440_p12 = pnand %p5439_p11, %p5719_p3 }
0x17e1   : > { %p5445_p2 = por %p5444_p1, %p5443_p0 }
0x17e2   : > { %p5441_p13 = pneg %p5440_p12 }
0x17e3   : > { %p5447_p5 = por %p5446_p4, %p5445_p2 }
0x17e5   : > { %p5448_p6 = pnand %p5447_p5, %p5441_p13 }
0x17e7   : > { %5451 = shalt.err (!%p5448_p6)
}
0x17e8   : > { %5198 = dma.vmem_to_hbm [thread:$0]  (%p5719_p3), %s4326_s24, 128, %s6454_s3, %s4307_s8  }
0x17e9   : > { %s4856_s26 = sshll.u32 %s6647_s25, 8  ;;  %s4338_s27 = sshll.u32 %s5852_s10, 4  ;;  %s6482_s27 = int_to_ptr.vmem [resolvable:$true] %s4338_s27 }
0x17ea   : > { %s6650_s12 = sld [smem:[#allocation44_spill]]  ;;  %s4312_s14 = scalar_lea.sflag [#allocation9], %s5740_s30 }
0x17eb   : > { %s5452_s5 = scalar_lea.vmem %s6482_s27, 256  ;;  %s5557_s23 = smov [#allocation8]  }
0x17ec   : > { %p5453_p7 = scmp.ne.s32.totalorder %s6482_s27, %s5452_s5  ;;  %s5456_s3 = sshll.u32 %s5557_s23, 4  ;;  %s5457_s3 = int_to_ptr.vmem [resolvable:$false] %s5456_s3 }
0x17ed   : > { %s5458_s10 = scalar_lea.vmem %s5457_s3, 512  ;;  %p5459_p11 = scmp.lt.s32.totalorder %s6482_s27, %s5457_s3 }
0x17ee   : > { %p5454_p8 = pnand %p5453_p7, %p5719_p3  ;;  %p5460_p12 = scmp.lt.s32.totalorder %s5458_s10, %s5452_s5 }
0x17f0   : > { %s6480_s13 = scalar_lea.hbm %s6650_s12, %s4856_s26  ;;  %p5455_p10 = pneg %p5454_p8 }
0x17f1   : > { %p5461_p13 = por %p5460_p12, %p5459_p11 }
0x17f3   : > { %p5462_p0 = pnand %p5461_p13, %p5455_p10 }
0x17f5   : > { %5465 = shalt.err (!%p5462_p0)
}
0x17f6   : > { %s5466_s25 = scalar_lea.hbm %s6480_s13, 256  ;;  %s5470_s28 = scalar_lea.hbm %s6650_s12, 512 }
0x17f7   : > { %p5467_p1 = scmp.ne.s32.totalorder %s6480_s13, %s5466_s25  ;;  %p5471_p5 = scmp.lt.u32.totalorder %s6480_s13, %s6650_s12 }
0x17f8   : > { %p5472_p6 = scmp.lt.u32.totalorder %s5470_s28, %s5466_s25  ;;  %p5474_p8 = scmp.lt.u32.totalorder %s5466_s25, %s6480_s13 }
0x17f9   : > { %p5468_p2 = pnand %p5467_p1, %p5719_p3 }
0x17fa   : > { %p5473_p7 = por %p5472_p6, %p5471_p5 }
0x17fb   : > { %p5469_p4 = pneg %p5468_p2 }
0x17fc   : > { %p5475_p10 = por %p5474_p8, %p5473_p7 }
0x17fe   : > { %p5476_p11 = pnand %p5475_p10, %p5469_p4 }
0x1800   : > { %5479 = shalt.err (!%p5476_p11)
}
0x1801   : > { %s5558_s1 = smov 128   ;;  %s5559_s15 = smov 8  }
0x1802   : > { %5199 = dma.vmem_to_hbm [thread:$0]  (%p5719_p3), %s6482_s27, 256, %s6480_s13, %s4312_s14, %s5558_s1, %s5558_s1, %s5559_s15  }
0x1803 PF: > { %s6651_s7 = sld [smem:[#allocation19_spill]]  ;;  %s6652_s20 = sld [smem:[#allocation12_spill]] }
0x1809   : > { %p5209_p12 = scmp.ge.s32.totalorder %s6651_s7, 2  ;;  %s4353_s0 = sand.u32 1, %s6652_s20  }
0x180a   : > { %s4354_s6 = scalar_lea.sflag [#allocation7], %s4353_s0 }
0x180b   : > { %p5203_p13 = pnand %p5209_p12, %p5729_p9 }
0x180d   : > { %5513 = dma.done.wait (!%p5203_p13), %s4354_s6, 128  }
0x180e   : > { %5515 = vsyncadd (!%p5203_p13), %s4354_s6, 4294967168  ;;  %s4363_s26 = scalar_lea.sflag [#allocation9], %s4353_s0 }
0x180f   : > { %5517 = dma.done.wait (!%p5203_p13), %s4363_s26, 256  }
0x1810   : > { %5519 = vsyncadd (!%p5203_p13), %s4363_s26, 4294967040  ;;  %s38_s0 = sadd.s32 1, %s6651_s7   ;;  %s6654_s2 = sld [smem:[#allocation13_spill]] }
0x1811   : > { %p35_p0 = scmp.ge.s32.totalorder %s38_s0, 6   ;;  %s6655_s25 = sld [smem:[#allocation14_spill]] }
0x1812   : > { %s6656_s26 = sld [smem:[#allocation24_spill]]  ;;  %s6657_s27 = sld [smem:[#allocation17_spill]] }
0x1813   : > { %s6658_s3 = sld [smem:[#allocation18_spill]]  ;;  %s6659_s28 = sld [smem:[#allocation20_spill]] }
0x1814   : > { %s6660_s29 = sld [smem:[#allocation22_spill]]  ;;  %37 = sbr.rel (!%p35_p0) target bundleno = 26 (0x1a), region = 217 }
0x181b   :  { %4368 = vsyncpa [#allocation7], 1 }
0x181c   :  { %4370 = vsyncpa [#allocation7 + $0x1], 1 }
0x181d   :  { %4371 = vsyncpa [#allocation9], 1 }
0x181e   :  { %4373 = vsyncpa [#allocation9 + $0x1], 1 }

</bundles_post_ra>
